<compile_context>
chip_gen: v5e
topology: v5e:2x2
jax: 0.10.0
libtpu: 0.0.40
codegen_flags: <defaults>
</compile_context>

<pallas_src>
import functools

import jax
import jax.numpy as jnp
from jax.experimental import pallas as pl
from jax.experimental.pallas import tpu as pltpu


# ---------------------------------------------------------------------------
# Fused Pallas kernel: whole bottleneck for one batch element, all
# intermediates resident in VMEM.
# ---------------------------------------------------------------------------
def _make_bottleneck_kernel(dilation):
    pad = dilation  # Conv2dBnRelu(padding=dilation)

    def kernel(x_ref, w1_ref, b1_ref, w2_ref, b2_ref, w3_ref, b3_ref,
               o_ref, y1p_ref):
        # x_ref  : (1, H, W, Cin)      bf16  NHWC input tile
        # w1_ref : (Cin, Cmid)         bf16  1x1 conv1 weight (BN1 scale folded)
        # b1_ref : (1, Cmid)           f32   BN1 shift
        # w2_ref : (3, 3, Cmid, Cmid)  bf16  3x3 conv2 weight (BN2 scale folded)
        # b2_ref : (1, Cmid)           f32   BN2 shift
        # w3_ref : (Cmid, Cout)        bf16  1x1 conv3 weight (BN3 scale folded)
        # b3_ref : (1, Cout)           f32   BN3 shift
        # o_ref  : (1, H, W, Cout)     bf16  NHWC output tile
        # y1p_ref: (H+2p, W+2p, Cmid)  bf16  VMEM scratch: zero-padded conv1 out
        _, H, W, Cin = x_ref.shape
        Cmid = w1_ref.shape[1]
        Cout = o_ref.shape[3]
        HW = H * W

        # ---- conv1: 1x1 conv + BN1 + ReLU (bf16 MXU operands, f32 accumulate) ----
        x2d = x_ref[0].reshape(HW, Cin)                      # bf16, no cast needed
        y1 = jnp.dot(x2d, w1_ref[...], preferred_element_type=jnp.float32)
        y1 = jnp.maximum(y1 + b1_ref[...], 0.0)

        # ---- zero ONLY the pad frame (interior is fully overwritten below). ----
        # Done every step (cheap) so megacore batch-parallel sharding stays correct.
        y1p_ref[0:pad, :, :] = jnp.zeros((pad, W + 2 * pad, Cmid), y1p_ref.dtype)
        y1p_ref[pad + H:pad + H + pad, :, :] = jnp.zeros(
            (pad, W + 2 * pad, Cmid), y1p_ref.dtype)
        y1p_ref[pad:pad + H, 0:pad, :] = jnp.zeros((H, pad, Cmid), y1p_ref.dtype)
        y1p_ref[pad:pad + H, pad + W:pad + W + pad, :] = jnp.zeros(
            (H, pad, Cmid), y1p_ref.dtype)

        # conv1 output kept resident in VMEM as bf16 (conv2 consumes bf16 anyway).
        y1p_ref[pad:pad + H, pad:pad + W, :] = (
            y1.reshape(H, W, Cmid).astype(y1p_ref.dtype))

        # ---- conv2: 3x3 (dilated) conv as 9 shifted matmuls, f32 accumulation ----
        # First tap initializes the accumulator (no zeros + add pass).
        acc = None
        for kh in range(3):
            for kw in range(3):
                tap = y1p_ref[kh * dilation:kh * dilation + H,
                              kw * dilation:kw * dilation + W, :]   # (H, W, Cmid) bf16
                part = jnp.dot(tap.reshape(HW, Cmid), w2_ref[kh, kw],
                               preferred_element_type=jnp.float32)
                acc = part if acc is None else acc + part
        y2 = jnp.maximum(acc + b2_ref[...], 0.0)

        # ---- conv3: 1x1 conv + BN3 shift + identity residual + ReLU ----
        # Single fused epilogue pass writing bf16.  The residual re-reads the
        # (still resident) input block instead of keeping an f32 copy live.
        y3 = jnp.dot(y2.astype(jnp.bfloat16), w3_ref[...],
                     preferred_element_type=jnp.float32) + b3_ref[...]
        res = x_ref[0].reshape(HW, Cout).astype(jnp.float32)
        out = jnp.maximum(y3 + res, 0.0)
        o_ref[0] = out.reshape(H, W, Cout).astype(o_ref.dtype)

    return kernel


# ---------------------------------------------------------------------------
# Glue: BN folding (once, at "init" time), weight re-layout, wrappers
# ---------------------------------------------------------------------------
def bn_scale_shift(gamma, beta, mean, var, eps=1e-5):
    s = gamma / jnp.sqrt(var + eps)
    return s, beta - mean * s


def prepare_params(w1, bn1, w2, bn2, w3, bn3):
    """Fold eval-mode BN scales into the conv weights and lay them out for matmul.

    Call once at init time; the per-call path then only runs the pallas_call.
    """
    s1, sh1 = bn_scale_shift(*bn1)
    s2, sh2 = bn_scale_shift(*bn2)
    s3, sh3 = bn_scale_shift(*bn3)
    Cmid = w1.shape[0]
    Cout = w3.shape[0]
    # scale folded in f32, single bf16 quantization of the product
    w1m = (jnp.transpose(w1[:, :, 0, 0]) * s1[None, :]).astype(jnp.bfloat16)            # (Cin, Cmid)
    w2m = (jnp.transpose(w2, (2, 3, 1, 0)) * s2[None, None, None, :]).astype(jnp.bfloat16)  # (3,3,Cmid,Cmid)
    w3m = (jnp.transpose(w3[:, :, 0, 0]) * s3[None, :]).astype(jnp.bfloat16)            # (Cmid, Cout)
    b1m = sh1.reshape(1, Cmid).astype(jnp.float32)
    b2m = sh2.reshape(1, Cmid).astype(jnp.float32)
    b3m = sh3.reshape(1, Cout).astype(jnp.float32)
    return w1m, b1m, w2m, b2m, w3m, b3m


@functools.partial(jax.jit, static_argnames=("dilation",))
def bottleneck_pallas_nhwc(x_nhwc, w1m, b1m, w2m, b2m, w3m, b3m, dilation=1):
    """Primary entry point: NHWC bf16 in -> NHWC bf16 out, no HBM layout passes."""
    N, H, W, Cin = x_nhwc.shape
    Cmid = w1m.shape[1]
    Cout = w3m.shape[1]
    assert Cin == Cout, "identity residual requires in_ch == out_ch * 4"
    pad = dilation

    kernel = _make_bottleneck_kernel(dilation)
    return pl.pallas_call(
        kernel,
        out_shape=jax.ShapeDtypeStruct((N, H, W, Cout), jnp.bfloat16),
        grid_spec=pltpu.PrefetchScalarGridSpec(
            num_scalar_prefetch=0,
            grid=(N,),
            in_specs=[
                pl.BlockSpec((1, H, W, Cin), lambda n: (n, 0, 0, 0)),
                pl.BlockSpec((Cin, Cmid), lambda n: (0, 0)),
                pl.BlockSpec((1, Cmid), lambda n: (0, 0)),
                pl.BlockSpec((3, 3, Cmid, Cmid), lambda n: (0, 0, 0, 0)),
                pl.BlockSpec((1, Cmid), lambda n: (0, 0)),
                pl.BlockSpec((Cmid, Cout), lambda n: (0, 0)),
                pl.BlockSpec((1, Cout), lambda n: (0, 0)),
            ],
            out_specs=pl.BlockSpec((1, H, W, Cout), lambda n: (n, 0, 0, 0)),
            scratch_shapes=[
                pltpu.VMEM((H + 2 * pad, W + 2 * pad, Cmid), jnp.bfloat16),
            ],
        ),
        compiler_params=pltpu.CompilerParams(
            dimension_semantics=("parallel",),
            # default scoped-VMEM limit is enough with bf16 activations/scratch;
            # raise here on v5e/v6e only if blocks are enlarged.
        ),
    )(x_nhwc.astype(jnp.bfloat16), w1m, b1m, w2m, b2m, w3m, b3m)


def bottleneck_pallas_nchw(x_nchw, w1, bn1, w2, bn2, w3, bn3,
                           stride=1, dilation=1):
    """PyTorch-API-compatible wrapper (NCHW f32).  Demo/compat only: in a real
    network keep activations NHWC bf16 end-to-end and call
    bottleneck_pallas_nhwc directly (no HBM transpose passes)."""
    if stride != 1:
        raise NotImplementedError(
            "downsample=None identity residual requires stride == 1")
    params = prepare_params(w1, bn1, w2, bn2, w3, bn3)
    x = jnp.transpose(x_nchw, (0, 2, 3, 1))
    out = bottleneck_pallas_nhwc(x, *params, dilation=dilation)
    return jnp.transpose(out.astype(jnp.float32), (0, 3, 1, 2))


# ---------------------------------------------------------------------------
# Pure-JAX reference (eval-mode BN, full f32), used for the correctness check
# ---------------------------------------------------------------------------
def ref_bottleneck(x, w1, bn1, w2, bn2, w3, bn3, stride=1, dilation=1):
    def conv(x, w, stride, padding, dilation):
        return jax.lax.conv_general_dilated(
            x, w, (stride, stride), [(padding, padding)] * 2,
            rhs_dilation=(dilation, dilation),
            dimension_numbers=("NCHW", "OIHW", "NCHW"),
            precision=jax.lax.Precision.HIGHEST)

    def bn(y, params):
        gamma, beta, mean, var = params
        s = gamma / jnp.sqrt(var + 1e-5)
        return y * s[None, :, None, None] + (beta - mean * s)[None, :, None, None]

    out = jnp.maximum(bn(conv(x, w1, 1, 0, 1), bn1), 0.0)
    out = jnp.maximum(bn(conv(out, w2, stride, dilation, dilation), bn2), 0.0)
    out = bn(conv(out, w3, 1, 0, 1), bn3)
    return jnp.maximum(out + x, 0.0)


# ---------------------------------------------------------------------------
if __name__ == "__main__":
    key = jax.random.PRNGKey(0)
    keys = jax.random.split(key, 8)

    # Shapes: downsample=None identity residual requires in_ch == out_ch*4, stride=1.
    N, H, W = 2, 16, 16
    out_ch = 4
    in_ch = out_ch * 4          # 16
    stride, dilation = 1, 1

    x = jax.random.normal(keys[0], (N, in_ch, H, W), jnp.float32)

    # Conv weights (PyTorch OIHW layout, bias=False)
    w1 = jax.random.normal(keys[1], (out_ch, in_ch, 1, 1), jnp.float32) * 0.1
    w2 = jax.random.normal(keys[2], (out_ch, out_ch, 3, 3), jnp.float32) * 0.1
    w3 = jax.random.normal(keys[3], (out_ch * 4, out_ch, 1, 1), jnp.float32) * 0.1

    def bn_params(k, C):
        k1, k2, k3, k4 = jax.random.split(k, 4)
        gamma = jax.random.uniform(k1, (C,), jnp.float32, 0.5, 1.5)
        beta = jax.random.normal(k2, (C,), jnp.float32) * 0.1
        mean = jax.random.normal(k3, (C,), jnp.float32) * 0.1
        var = jax.random.uniform(k4, (C,), jnp.float32, 0.5, 1.5)
        return gamma, beta, mean, var

    bn1 = bn_params(keys[4], out_ch)
    bn2 = bn_params(keys[5], out_ch)
    bn3 = bn_params(keys[6], out_ch * 4)

    # Production path: params folded once, activations NHWC bf16.
    params = prepare_params(w1, bn1, w2, bn2, w3, bn3)
    # (layout/dtype conversion below is demo-only; a real network stays NHWC bf16)
    x_nhwc = jnp.transpose(x, (0, 2, 3, 1)).astype(jnp.bfloat16)

    out_nhwc = bottleneck_pallas_nhwc(x_nhwc, *params, dilation=dilation)
    out_nhwc = jax.block_until_ready(out_nhwc)
    out = jnp.transpose(out_nhwc.astype(jnp.float32), (0, 3, 1, 2))

    # Reference in f32 on the bf16-rounded input (what the kernel actually sees).
    x_q = x.astype(jnp.bfloat16).astype(jnp.float32)
    ref = ref_bottleneck(x_q, w1, bn1, w2, bn2, w3, bn3,
                         stride=stride, dilation=dilation)

    assert out.shape == (N, out_ch * 4, H, W)
    # bf16 matmul operands / intermediates / output -> looser tolerance than f32.
    max_err = float(jnp.max(jnp.abs(out - ref)))
    assert max_err < 5e-2, f"max abs err = {max_err}"

    print("KERNEL_OK")
</pallas_src>

<mosaic_0001>
module attributes {stable_mosaic.version = 11 : i64} {
  func.func @kernel(%arg0: i32, %arg1: memref<1x16x16x16xbf16, #tpu.memory_space<vmem>>, %arg2: memref<16x4xbf16, #tpu.memory_space<vmem>>, %arg3: memref<1x4xf32, #tpu.memory_space<vmem>>, %arg4: memref<3x3x4x4xbf16, #tpu.memory_space<vmem>>, %arg5: memref<1x4xf32, #tpu.memory_space<vmem>>, %arg6: memref<4x16xbf16, #tpu.memory_space<vmem>>, %arg7: memref<1x16xf32, #tpu.memory_space<vmem>>, %arg8: memref<1x16x16x16xbf16, #tpu.memory_space<vmem>>, %arg9: memref<18x18x4xbf16, #tpu.memory_space<vmem>>) attributes {dimension_semantics = [#tpu.dimension_semantics<parallel>], iteration_bounds = array<i64: 2>, scalar_prefetch = 0 : i64, scratch_operands = 1 : i64, tpu.core_type = #tpu.core_type<tc>, window_params = [{transform_indices = @transform_0, window_bounds = array<i64: 1, 16, 16, 16>}, {pipeline_mode = #tpu.pipeline_mode<synchronous>, transform_indices = @transform_1, window_bounds = array<i64: 16, 4>}, {pipeline_mode = #tpu.pipeline_mode<synchronous>, transform_indices = @transform_2, window_bounds = array<i64: 1, 4>}, {pipeline_mode = #tpu.pipeline_mode<synchronous>, transform_indices = @transform_3, window_bounds = array<i64: 3, 3, 4, 4>}, {pipeline_mode = #tpu.pipeline_mode<synchronous>, transform_indices = @transform_4, window_bounds = array<i64: 1, 4>}, {pipeline_mode = #tpu.pipeline_mode<synchronous>, transform_indices = @transform_5, window_bounds = array<i64: 4, 16>}, {pipeline_mode = #tpu.pipeline_mode<synchronous>, transform_indices = @transform_6, window_bounds = array<i64: 1, 16>}, {transform_indices = @transform_7, window_bounds = array<i64: 1, 16, 16, 16>}]} {
    %c0 = arith.constant 0 : index
    %c0_0 = arith.constant 0 : index
    %c0_1 = arith.constant 0 : index
    %c0_2 = arith.constant 0 : index
    %0 = vector.load %arg1[%c0, %c0_0, %c0_1, %c0_2] : memref<1x16x16x16xbf16, #tpu.memory_space<vmem>>, vector<1x16x16x16xbf16>
    %1 = vector.shape_cast %0 : vector<1x16x16x16xbf16> to vector<16x16x16xbf16>
    %2 = vector.shape_cast %1 : vector<16x16x16xbf16> to vector<256x16xbf16>
    %c0_3 = arith.constant 0 : index
    %c0_4 = arith.constant 0 : index
    %3 = vector.load %arg2[%c0_3, %c0_4] : memref<16x4xbf16, #tpu.memory_space<vmem>>, vector<16x4xbf16>
    %cst = arith.constant dense<0.000000e+00> : vector<256x4xf32>
    %4 = tpu.matmul %2, %3, %cst {dimension_numbers = #tpu.dot_dimension_numbers<[1], [0], [0], [1], [0, 0, 1, 1], [], []>} : vector<256x16xbf16>, vector<16x4xbf16>, vector<256x4xf32> -> vector<256x4xf32>
    %c0_5 = arith.constant 0 : index
    %c0_6 = arith.constant 0 : index
    %5 = vector.load %arg3[%c0_5, %c0_6] : memref<1x4xf32, #tpu.memory_space<vmem>>, vector<1x4xf32>
    %6 = vector.broadcast %5 : vector<1x4xf32> to vector<256x4xf32>
    %7 = arith.addf %4, %6 : vector<256x4xf32>
    %cst_7 = arith.constant 0.000000e+00 : f32
    %8 = vector.broadcast %cst_7 : f32 to vector<256x4xf32>
    %9 = arith.maximumf %7, %8 : vector<256x4xf32>
    %cst_8 = arith.constant 0.000000e+00 : bf16
    %10 = vector.broadcast %cst_8 : bf16 to vector<1x18x4xbf16>
    %c0_9 = arith.constant 0 : index
    %c0_10 = arith.constant 0 : index
    %c0_11 = arith.constant 0 : index
    %11 = vector.load %arg9[%c0_9, %c0_10, %c0_11] : memref<18x18x4xbf16, #tpu.memory_space<vmem>>, vector<1x18x4xbf16>
    tpu.vector_store %arg9[%c0_9, %c0_10, %c0_11], %10 {strides = array<i32>} : memref<18x18x4xbf16, #tpu.memory_space<vmem>>, vector<1x18x4xbf16>,
    %cst_12 = arith.constant 0.000000e+00 : bf16
    %12 = vector.broadcast %cst_12 : bf16 to vector<1x18x4xbf16>
    %c17 = arith.constant 17 : index
    %c0_13 = arith.constant 0 : index
    %c0_14 = arith.constant 0 : index
    %13 = vector.load %arg9[%c17, %c0_13, %c0_14] : memref<18x18x4xbf16, #tpu.memory_space<vmem>>, vector<1x18x4xbf16>
    tpu.vector_store %arg9[%c17, %c0_13, %c0_14], %12 {strides = array<i32>} : memref<18x18x4xbf16, #tpu.memory_space<vmem>>, vector<1x18x4xbf16>,
    %cst_15 = arith.constant 0.000000e+00 : bf16
    %14 = vector.broadcast %cst_15 : bf16 to vector<16x1x4xbf16>
    %c1 = arith.constant 1 : index
    %c0_16 = arith.constant 0 : index
    %c0_17 = arith.constant 0 : index
    %15 = vector.load %arg9[%c1, %c0_16, %c0_17] : memref<18x18x4xbf16, #tpu.memory_space<vmem>>, vector<16x1x4xbf16>
    tpu.vector_store %arg9[%c1, %c0_16, %c0_17], %14 {strides = array<i32>} : memref<18x18x4xbf16, #tpu.memory_space<vmem>>, vector<16x1x4xbf16>,
    %cst_18 = arith.constant 0.000000e+00 : bf16
    %16 = vector.broadcast %cst_18 : bf16 to vector<16x1x4xbf16>
    %c1_19 = arith.constant 1 : index
    %c17_20 = arith.constant 17 : index
    %c0_21 = arith.constant 0 : index
    %17 = vector.load %arg9[%c1_19, %c17_20, %c0_21] : memref<18x18x4xbf16, #tpu.memory_space<vmem>>, vector<16x1x4xbf16>
    tpu.vector_store %arg9[%c1_19, %c17_20, %c0_21], %16 {strides = array<i32>} : memref<18x18x4xbf16, #tpu.memory_space<vmem>>, vector<16x1x4xbf16>,
    %18 = vector.shape_cast %9 : vector<256x4xf32> to vector<16x16x4xf32>
    %19 = arith.truncf %18 : vector<16x16x4xf32> to vector<16x16x4xbf16>
    %c1_22 = arith.constant 1 : index
    %c1_23 = arith.constant 1 : index
    %c0_24 = arith.constant 0 : index
    %20 = vector.load %arg9[%c1_22, %c1_23, %c0_24] : memref<18x18x4xbf16, #tpu.memory_space<vmem>>, vector<16x16x4xbf16>
    tpu.vector_store %arg9[%c1_22, %c1_23, %c0_24], %19 {strides = array<i32>} : memref<18x18x4xbf16, #tpu.memory_space<vmem>>, vector<16x16x4xbf16>,
    %c0_25 = arith.constant 0 : index
    %c0_26 = arith.constant 0 : index
    %c0_27 = arith.constant 0 : index
    %21 = vector.load %arg9[%c0_25, %c0_26, %c0_27] : memref<18x18x4xbf16, #tpu.memory_space<vmem>>, vector<16x16x4xbf16>
    %22 = vector.shape_cast %21 : vector<16x16x4xbf16> to vector<256x4xbf16>
    %c0_28 = arith.constant 0 : index
    %c0_29 = arith.constant 0 : index
    %c0_30 = arith.constant 0 : index
    %c0_31 = arith.constant 0 : index
    %23 = vector.load %arg4[%c0_28, %c0_29, %c0_30, %c0_31] : memref<3x3x4x4xbf16, #tpu.memory_space<vmem>>, vector<1x1x4x4xbf16>
    %24 = vector.shape_cast %23 : vector<1x1x4x4xbf16> to vector<4x4xbf16>
    %cst_32 = arith.constant dense<0.000000e+00> : vector<256x4xf32>
    %25 = tpu.matmul %22, %24, %cst_32 {dimension_numbers = #tpu.dot_dimension_numbers<[1], [0], [0], [1], [0, 0, 1, 1], [], []>} : vector<256x4xbf16>, vector<4x4xbf16>, vector<256x4xf32> -> vector<256x4xf32>
    %c0_33 = arith.constant 0 : index
    %c1_34 = arith.constant 1 : index
    %c0_35 = arith.constant 0 : index
    %26 = vector.load %arg9[%c0_33, %c1_34, %c0_35] : memref<18x18x4xbf16, #tpu.memory_space<vmem>>, vector<16x16x4xbf16>
    %27 = vector.shape_cast %26 : vector<16x16x4xbf16> to vector<256x4xbf16>
    %c0_36 = arith.constant 0 : index
    %c1_37 = arith.constant 1 : index
    %c0_38 = arith.constant 0 : index
    %c0_39 = arith.constant 0 : index
    %28 = vector.load %arg4[%c0_36, %c1_37, %c0_38, %c0_39] : memref<3x3x4x4xbf16, #tpu.memory_space<vmem>>, vector<1x1x4x4xbf16>
    %29 = vector.shape_cast %28 : vector<1x1x4x4xbf16> to vector<4x4xbf16>
    %cst_40 = arith.constant dense<0.000000e+00> : vector<256x4xf32>
    %30 = tpu.matmul %27, %29, %cst_40 {dimension_numbers = #tpu.dot_dimension_numbers<[1], [0], [0], [1], [0, 0, 1, 1], [], []>} : vector<256x4xbf16>, vector<4x4xbf16>, vector<256x4xf32> -> vector<256x4xf32>
    %31 = arith.addf %25, %30 : vector<256x4xf32>
    %c0_41 = arith.constant 0 : index
    %c2 = arith.constant 2 : index
    %c0_42 = arith.constant 0 : index
    %32 = vector.load %arg9[%c0_41, %c2, %c0_42] : memref<18x18x4xbf16, #tpu.memory_space<vmem>>, vector<16x16x4xbf16>
    %33 = vector.shape_cast %32 : vector<16x16x4xbf16> to vector<256x4xbf16>
    %c0_43 = arith.constant 0 : index
    %c2_44 = arith.constant 2 : index
    %c0_45 = arith.constant 0 : index
    %c0_46 = arith.constant 0 : index
    %34 = vector.load %arg4[%c0_43, %c2_44, %c0_45, %c0_46] : memref<3x3x4x4xbf16, #tpu.memory_space<vmem>>, vector<1x1x4x4xbf16>
    %35 = vector.shape_cast %34 : vector<1x1x4x4xbf16> to vector<4x4xbf16>
    %cst_47 = arith.constant dense<0.000000e+00> : vector<256x4xf32>
    %36 = tpu.matmul %33, %35, %cst_47 {dimension_numbers = #tpu.dot_dimension_numbers<[1], [0], [0], [1], [0, 0, 1, 1], [], []>} : vector<256x4xbf16>, vector<4x4xbf16>, vector<256x4xf32> -> vector<256x4xf32>
    %37 = arith.addf %31, %36 : vector<256x4xf32>
    %c1_48 = arith.constant 1 : index
    %c0_49 = arith.constant 0 : index
    %c0_50 = arith.constant 0 : index
    %38 = vector.load %arg9[%c1_48, %c0_49, %c0_50] : memref<18x18x4xbf16, #tpu.memory_space<vmem>>, vector<16x16x4xbf16>
    %39 = vector.shape_cast %38 : vector<16x16x4xbf16> to vector<256x4xbf16>
    %c1_51 = arith.constant 1 : index
    %c0_52 = arith.constant 0 : index
    %c0_53 = arith.constant 0 : index
    %c0_54 = arith.constant 0 : index
    %40 = vector.load %arg4[%c1_51, %c0_52, %c0_53, %c0_54] : memref<3x3x4x4xbf16, #tpu.memory_space<vmem>>, vector<1x1x4x4xbf16>
    %41 = vector.shape_cast %40 : vector<1x1x4x4xbf16> to vector<4x4xbf16>
    %cst_55 = arith.constant dense<0.000000e+00> : vector<256x4xf32>
    %42 = tpu.matmul %39, %41, %cst_55 {dimension_numbers = #tpu.dot_dimension_numbers<[1], [0], [0], [1], [0, 0, 1, 1], [], []>} : vector<256x4xbf16>, vector<4x4xbf16>, vector<256x4xf32> -> vector<256x4xf32>
    %43 = arith.addf %37, %42 : vector<256x4xf32>
    %c1_56 = arith.constant 1 : index
    %c1_57 = arith.constant 1 : index
    %c0_58 = arith.constant 0 : index
    %44 = vector.load %arg9[%c1_56, %c1_57, %c0_58] : memref<18x18x4xbf16, #tpu.memory_space<vmem>>, vector<16x16x4xbf16>
    %45 = vector.shape_cast %44 : vector<16x16x4xbf16> to vector<256x4xbf16>
    %c1_59 = arith.constant 1 : index
    %c1_60 = arith.constant 1 : index
    %c0_61 = arith.constant 0 : index
    %c0_62 = arith.constant 0 : index
    %46 = vector.load %arg4[%c1_59, %c1_60, %c0_61, %c0_62] : memref<3x3x4x4xbf16, #tpu.memory_space<vmem>>, vector<1x1x4x4xbf16>
    %47 = vector.shape_cast %46 : vector<1x1x4x4xbf16> to vector<4x4xbf16>
    %cst_63 = arith.constant dense<0.000000e+00> : vector<256x4xf32>
    %48 = tpu.matmul %45, %47, %cst_63 {dimension_numbers = #tpu.dot_dimension_numbers<[1], [0], [0], [1], [0, 0, 1, 1], [], []>} : vector<256x4xbf16>, vector<4x4xbf16>, vector<256x4xf32> -> vector<256x4xf32>
    %49 = arith.addf %43, %48 : vector<256x4xf32>
    %c1_64 = arith.constant 1 : index
    %c2_65 = arith.constant 2 : index
    %c0_66 = arith.constant 0 : index
    %50 = vector.load %arg9[%c1_64, %c2_65, %c0_66] : memref<18x18x4xbf16, #tpu.memory_space<vmem>>, vector<16x16x4xbf16>
    %51 = vector.shape_cast %50 : vector<16x16x4xbf16> to vector<256x4xbf16>
    %c1_67 = arith.constant 1 : index
    %c2_68 = arith.constant 2 : index
    %c0_69 = arith.constant 0 : index
    %c0_70 = arith.constant 0 : index
    %52 = vector.load %arg4[%c1_67, %c2_68, %c0_69, %c0_70] : memref<3x3x4x4xbf16, #tpu.memory_space<vmem>>, vector<1x1x4x4xbf16>
    %53 = vector.shape_cast %52 : vector<1x1x4x4xbf16> to vector<4x4xbf16>
    %cst_71 = arith.constant dense<0.000000e+00> : vector<256x4xf32>
    %54 = tpu.matmul %51, %53, %cst_71 {dimension_numbers = #tpu.dot_dimension_numbers<[1], [0], [0], [1], [0, 0, 1, 1], [], []>} : vector<256x4xbf16>, vector<4x4xbf16>, vector<256x4xf32> -> vector<256x4xf32>
    %55 = arith.addf %49, %54 : vector<256x4xf32>
    %c2_72 = arith.constant 2 : index
    %c0_73 = arith.constant 0 : index
    %c0_74 = arith.constant 0 : index
    %56 = vector.load %arg9[%c2_72, %c0_73, %c0_74] : memref<18x18x4xbf16, #tpu.memory_space<vmem>>, vector<16x16x4xbf16>
    %57 = vector.shape_cast %56 : vector<16x16x4xbf16> to vector<256x4xbf16>
    %c2_75 = arith.constant 2 : index
    %c0_76 = arith.constant 0 : index
    %c0_77 = arith.constant 0 : index
    %c0_78 = arith.constant 0 : index
    %58 = vector.load %arg4[%c2_75, %c0_76, %c0_77, %c0_78] : memref<3x3x4x4xbf16, #tpu.memory_space<vmem>>, vector<1x1x4x4xbf16>
    %59 = vector.shape_cast %58 : vector<1x1x4x4xbf16> to vector<4x4xbf16>
    %cst_79 = arith.constant dense<0.000000e+00> : vector<256x4xf32>
    %60 = tpu.matmul %57, %59, %cst_79 {dimension_numbers = #tpu.dot_dimension_numbers<[1], [0], [0], [1], [0, 0, 1, 1], [], []>} : vector<256x4xbf16>, vector<4x4xbf16>, vector<256x4xf32> -> vector<256x4xf32>
    %61 = arith.addf %55, %60 : vector<256x4xf32>
    %c2_80 = arith.constant 2 : index
    %c1_81 = arith.constant 1 : index
    %c0_82 = arith.constant 0 : index
    %62 = vector.load %arg9[%c2_80, %c1_81, %c0_82] : memref<18x18x4xbf16, #tpu.memory_space<vmem>>, vector<16x16x4xbf16>
    %63 = vector.shape_cast %62 : vector<16x16x4xbf16> to vector<256x4xbf16>
    %c2_83 = arith.constant 2 : index
    %c1_84 = arith.constant 1 : index
    %c0_85 = arith.constant 0 : index
    %c0_86 = arith.constant 0 : index
    %64 = vector.load %arg4[%c2_83, %c1_84, %c0_85, %c0_86] : memref<3x3x4x4xbf16, #tpu.memory_space<vmem>>, vector<1x1x4x4xbf16>
    %65 = vector.shape_cast %64 : vector<1x1x4x4xbf16> to vector<4x4xbf16>
    %cst_87 = arith.constant dense<0.000000e+00> : vector<256x4xf32>
    %66 = tpu.matmul %63, %65, %cst_87 {dimension_numbers = #tpu.dot_dimension_numbers<[1], [0], [0], [1], [0, 0, 1, 1], [], []>} : vector<256x4xbf16>, vector<4x4xbf16>, vector<256x4xf32> -> vector<256x4xf32>
    %67 = arith.addf %61, %66 : vector<256x4xf32>
    %c2_88 = arith.constant 2 : index
    %c2_89 = arith.constant 2 : index
    %c0_90 = arith.constant 0 : index
    %68 = vector.load %arg9[%c2_88, %c2_89, %c0_90] : memref<18x18x4xbf16, #tpu.memory_space<vmem>>, vector<16x16x4xbf16>
    %69 = vector.shape_cast %68 : vector<16x16x4xbf16> to vector<256x4xbf16>
    %c2_91 = arith.constant 2 : index
    %c2_92 = arith.constant 2 : index
    %c0_93 = arith.constant 0 : index
    %c0_94 = arith.constant 0 : index
    %70 = vector.load %arg4[%c2_91, %c2_92, %c0_93, %c0_94] : memref<3x3x4x4xbf16, #tpu.memory_space<vmem>>, vector<1x1x4x4xbf16>
    %71 = vector.shape_cast %70 : vector<1x1x4x4xbf16> to vector<4x4xbf16>
    %cst_95 = arith.constant dense<0.000000e+00> : vector<256x4xf32>
    %72 = tpu.matmul %69, %71, %cst_95 {dimension_numbers = #tpu.dot_dimension_numbers<[1], [0], [0], [1], [0, 0, 1, 1], [], []>} : vector<256x4xbf16>, vector<4x4xbf16>, vector<256x4xf32> -> vector<256x4xf32>
    %73 = arith.addf %67, %72 : vector<256x4xf32>
    %c0_96 = arith.constant 0 : index
    %c0_97 = arith.constant 0 : index
    %74 = vector.load %arg5[%c0_96, %c0_97] : memref<1x4xf32, #tpu.memory_space<vmem>>, vector<1x4xf32>
    %75 = vector.broadcast %74 : vector<1x4xf32> to vector<256x4xf32>
    %76 = arith.addf %73, %75 : vector<256x4xf32>
    %cst_98 = arith.constant 0.000000e+00 : f32
    %77 = vector.broadcast %cst_98 : f32 to vector<256x4xf32>
    %78 = arith.maximumf %76, %77 : vector<256x4xf32>
    %79 = arith.truncf %78 : vector<256x4xf32> to vector<256x4xbf16>
    %c0_99 = arith.constant 0 : index
    %c0_100 = arith.constant 0 : index
    %80 = vector.load %arg6[%c0_99, %c0_100] : memref<4x16xbf16, #tpu.memory_space<vmem>>, vector<4x16xbf16>
    %cst_101 = arith.constant dense<0.000000e+00> : vector<256x16xf32>
    %81 = tpu.matmul %79, %80, %cst_101 {dimension_numbers = #tpu.dot_dimension_numbers<[1], [0], [0], [1], [0, 0, 1, 1], [], []>} : vector<256x4xbf16>, vector<4x16xbf16>, vector<256x16xf32> -> vector<256x16xf32>
    %c0_102 = arith.constant 0 : index
    %c0_103 = arith.constant 0 : index
    %82 = vector.load %arg7[%c0_102, %c0_103] : memref<1x16xf32, #tpu.memory_space<vmem>>, vector<1x16xf32>
    %83 = vector.broadcast %82 : vector<1x16xf32> to vector<256x16xf32>
    %84 = arith.addf %81, %83 : vector<256x16xf32>
    %c0_104 = arith.constant 0 : index
    %c0_105 = arith.constant 0 : index
    %c0_106 = arith.constant 0 : index
    %c0_107 = arith.constant 0 : index
    %85 = vector.load %arg1[%c0_104, %c0_105, %c0_106, %c0_107] : memref<1x16x16x16xbf16, #tpu.memory_space<vmem>>, vector<1x16x16x16xbf16>
    %86 = vector.shape_cast %85 : vector<1x16x16x16xbf16> to vector<16x16x16xbf16>
    %87 = vector.shape_cast %86 : vector<16x16x16xbf16> to vector<256x16xbf16>
    %88 = arith.extf %87 : vector<256x16xbf16> to vector<256x16xf32>
    %89 = arith.addf %84, %88 : vector<256x16xf32>
    %cst_108 = arith.constant 0.000000e+00 : f32
    %90 = vector.broadcast %cst_108 : f32 to vector<256x16xf32>
    %91 = arith.maximumf %89, %90 : vector<256x16xf32>
    %92 = vector.shape_cast %91 : vector<256x16xf32> to vector<16x16x16xf32>
    %93 = arith.truncf %92 : vector<16x16x16xf32> to vector<16x16x16xbf16>
    %c0_109 = arith.constant 0 : index
    %c0_110 = arith.constant 0 : index
    %c0_111 = arith.constant 0 : index
    %c0_112 = arith.constant 0 : index
    %94 = vector.load %arg8[%c0_109, %c0_110, %c0_111, %c0_112] : memref<1x16x16x16xbf16, #tpu.memory_space<vmem>>, vector<1x16x16x16xbf16>
    %95 = vector.shape_cast %94 : vector<1x16x16x16xbf16> to vector<16x16x16xbf16>
    %96 = vector.shape_cast %93 : vector<16x16x16xbf16> to vector<1x16x16x16xbf16>
    tpu.vector_store %arg8[%c0_109, %c0_110, %c0_111, %c0_112], %96 {strides = array<i32>} : memref<1x16x16x16xbf16, #tpu.memory_space<vmem>>, vector<1x16x16x16xbf16>,
    return
  }
  func.func @transform_0(%arg0: i32) -> (i32, i32, i32, i32) {
    %c0_i32 = arith.constant 0 : i32
    %c0_i32_0 = arith.constant 0 : i32
    %c0_i32_1 = arith.constant 0 : i32
    %c0_i32_2 = arith.constant 0 : i32
    return %arg0, %c0_i32, %c0_i32_0, %c0_i32_1 : i32, i32, i32, i32
  }
  func.func @transform_1(%arg0: i32) -> (i32, i32) {
    %c0_i32 = arith.constant 0 : i32
    %c0_i32_0 = arith.constant 0 : i32
    %c0_i32_1 = arith.constant 0 : i32
    return %c0_i32, %c0_i32_0 : i32, i32
  }
  func.func @transform_2(%arg0: i32) -> (i32, i32) {
    %c0_i32 = arith.constant 0 : i32
    %c0_i32_0 = arith.constant 0 : i32
    %c0_i32_1 = arith.constant 0 : i32
    return %c0_i32, %c0_i32_0 : i32, i32
  }
  func.func @transform_3(%arg0: i32) -> (i32, i32, i32, i32) {
    %c0_i32 = arith.constant 0 : i32
    %c0_i32_0 = arith.constant 0 : i32
    %c0_i32_1 = arith.constant 0 : i32
    %c0_i32_2 = arith.constant 0 : i32
    %c0_i32_3 = arith.constant 0 : i32
    return %c0_i32, %c0_i32_0, %c0_i32_1, %c0_i32_2 : i32, i32, i32, i32
  }
  func.func @transform_4(%arg0: i32) -> (i32, i32) {
    %c0_i32 = arith.constant 0 : i32
    %c0_i32_0 = arith.constant 0 : i32
    %c0_i32_1 = arith.constant 0 : i32
    return %c0_i32, %c0_i32_0 : i32, i32
  }
  func.func @transform_5(%arg0: i32) -> (i32, i32) {
    %c0_i32 = arith.constant 0 : i32
    %c0_i32_0 = arith.constant 0 : i32
    %c0_i32_1 = arith.constant 0 : i32
    return %c0_i32, %c0_i32_0 : i32, i32
  }
  func.func @transform_6(%arg0: i32) -> (i32, i32) {
    %c0_i32 = arith.constant 0 : i32
    %c0_i32_0 = arith.constant 0 : i32
    %c0_i32_1 = arith.constant 0 : i32
    return %c0_i32, %c0_i32_0 : i32, i32
  }
  func.func @transform_7(%arg0: i32) -> (i32, i32, i32, i32) {
    %c0_i32 = arith.constant 0 : i32
    %c0_i32_0 = arith.constant 0 : i32
    %c0_i32_1 = arith.constant 0 : i32
    %c0_i32_2 = arith.constant 0 : i32
    return %arg0, %c0_i32, %c0_i32_0, %c0_i32_1 : i32, i32, i32, i32
  }
}

</mosaic_0001>

<bundles_post_ra>
// kernel: bottleneck_pallas_nhwc.1
= control target key start
LH: loop header
LB: loop body
LE: loop exit
PB: predicated region body
PF: predicated region fallthrough
CT: control target
= control target key end

     0   :  { %s8926_s0 = inlined_call_operand.hbm [shape: bf16[2,16,16,16], index: 0, kind: input, shape index: {}]   ;;  %s8927_s1 = inlined_call_operand.vmem [shape: bf16[16,4], index: 1, kind: input, shape index: {}]   ;;  %s8928_s2 = inlined_call_operand.vmem [shape: f32[1,4], index: 2, kind: input, shape index: {}]   ;;  %s8929_s3 = inlined_call_operand.hbm [shape: bf16[3,3,4,4], index: 3, kind: input, shape index: {}]   ;;  %s8930_s4 = inlined_call_operand.vmem [shape: f32[1,4], index: 4, kind: input, shape index: {}]   ;;  %s8931_s5 = inlined_call_operand.vmem [shape: bf16[4,16], index: 5, kind: input, shape index: {}]   ;;  %s8932_s6 = inlined_call_operand.vmem [shape: f32[1,16], index: 6, kind: input, shape index: {}]   ;;  %s8933_s7 = inlined_call_operand.hbm [shape: bf16[2,16,16,16], index: 7, kind: output, shape index: {}]  }
   0x1   :  { %8939 = sst [smem:[#allocation94_spill]] %s8929_s3 }
   0x2   :  { %12 = vsyncpa [#allocation4], 0 }
   0x3   :  { %14 = vsyncpa [#allocation4 + $0x1], 0 }
   0x4   :  { %15 = vsyncpa [#allocation7], 0 }
   0x5   :  { %16 = vsyncpa [#allocation5], 0 }
   0x6   :  { %18 = vsyncpa [#allocation5 + $0x1], 0  ;;  %s6550_s24 = smov 0   ;;  %s6552_s25 = smov 0  }
   0x7   :  { %s6554_s26 = smov 0   ;;  %s6556_s27 = smov 0  }
   0x8 LB: > { %s6571_s28 = sadd.s32 4294967295, %s6500_s27   ;;  %s5621_s29 = sadd.s32 4294967294, %s6500_s27   ;;  %s6500_s27 = sphi %s6556_s27, %s9192_s27   ;;  %s6496_s26 = sphi %s6554_s26, %s9191_s26   ;;  %s6492_s25 = sphi %s6552_s25, %s9190_s25   ;;  %s6488_s24 = sphi %s6550_s24, %s9189_s24  }
   0x9   : > { %p44_p0 = scmp.ne.s32.totalorder %s6492_s25, %s6488_s24  ;;  %p45_p1 = scmp.eq.s32.totalorder %s6571_s28, 0 }
   0xa   : > { %p194_p2 = scmp.eq.s32.totalorder %s6571_s28, 1  ;;  %p200_p3 = scmp.eq.s32.totalorder %s5621_s29, 1 }
   0xb   : > { %p6580_p4 = por %p45_p1, %p44_p0  ;;  %p5622_p5 = scmp.ge.s32.totalorder %s6500_s27, 1 }
   0xc   : > { %p6585_p6 = por %p200_p3, %p44_p0  ;;  %p207_p7 = scmp.lt.s32.totalorder %s6500_s27, 3 }
   0xd   : > { %s8942_s3 = sld [smem:[#allocation94_spill]]  ;;  %s6502_s13 = smov [#allocation6]  }
   0xe   : > { %p6593_p8 = pnand %p5622_p5, %p207_p7  ;;  %s226_s14 = sshll.u32 %s6502_s13, 4  ;;  %s227_s14 = int_to_ptr.vmem [resolvable:$true] %s226_s14 }
   0xf   : > { %s6603_s15 = sadd.s32 1, %s6500_s27   ;;  %s6503_s16 = smov 32  }
  0x10   : > { %p6278_p9 = pneg %p6593_p8  ;;  %s6504_s17 = smov 2  }
  0x11   : > { %s28_s18 = ssub.s32 %s6500_s27, %s6603_s15  ;;  %s31_s19 = sadd.s32 1, %s6496_s26 }
  0x12   : > { %p6279_p10 = pnand %p6278_p9, %p45_p1  ;;  %p29_p12 = scmp.eq.s32.totalorder %s28_s18, 0 }
  0x13   : > { %s224_s11 = sshll.u32 %s8942_s3, 4  ;;  %p38_p13 = scmp.ne.s32.totalorder %s6496_s26, %s6492_s25  ;;  %s225_s11 = int_to_ptr.hbm [resolvable:$true] %s224_s11 }
  0x14   : > { %6281 = dma.hbm_to_vmem [thread:$0]  (!%p6279_p10), %s225_s11, 288, %s227_s14, [#allocation7], %s6503_s16, %s6503_s16, %s6504_s17  }
  0x15   : > { %p39_p0 = scmp.eq.s32.totalorder %s6500_s27, 0  ;;  %p6291_p3 = scmp.lt.s32.totalorder %s6500_s27, 2 }
  0x16   : > { %s6613_s20 = scalar_select %p29_p12, %s6496_s26, %s31_s19  }
  0x17   : > { %p40_p5 = por %p39_p0, %p38_p13  ;;  %p6617_p7 = por %p194_p2, %p38_p13 }
  0x18   : > { %s249_s22 = sand.u32 1, %s6496_s26   ;;  %s6121_s23 = sshll.u32 %s6500_s27, 7 }
  0x19   : > { %s5625_s29 = sshll.u32 %s249_s22, 7  ;;  %s258_s11 = scalar_lea.hbm %s8926_s0, %s6121_s23 }
  0x1a   : > { %s259_s13 = sshll.u32 %s258_s11, 4  ;;  %s253_s14 = scalar_lea.vmem [#allocation3], %s5625_s29  ;;  %s260_s13 = int_to_ptr.hbm [resolvable:$true] %s259_s13 }
  0x1b   : > { %s261_s16 = sshll.u32 %s253_s14, 4  ;;  %p6628_p9 = pnand %p6291_p3, %p40_p5  ;;  %s262_s16 = int_to_ptr.vmem [resolvable:$true] %s261_s16 }
  0x1c   : > { %s250_s18 = scalar_lea.sflag [#allocation4], %s249_s22  ;;  %s6400_s19 = sshra.s32 %s260_s13, 4  ;;  %s6401_s19 = int_to_ptr.hbm [resolvable:$true] %s6400_s19 }
  0x1d   : > { %s6402_s3 = scalar_lea.hbm %s6401_s19, 128  ;;  %p6404_p10 = pneg %p6628_p9 }
  0x1e   : > { %p6403_p2 = scmp.ne.s32.totalorder %s6401_s19, %s6402_s3  ;;  %s6407_s9 = scalar_lea.hbm %s8926_s0, 256 }
  0x1f   : > { %p6408_p0 = scmp.lt.s32.totalorder %s6401_s19, %s8926_s0  ;;  %p6409_p3 = scmp.lt.s32.totalorder %s6407_s9, %s6402_s3 }
  0x20   : > { %p6405_p12 = pnand %p6404_p10, %p6403_p2 }
  0x21   : > { %p6410_p5 = por %p6409_p3, %p6408_p0 }
  0x22   : > { %p6406_p13 = pneg %p6405_p12 }
  0x24   : > { %p6411_p11 = pnand %p6410_p5, %p6406_p13 }
  0x26   : > { %6414 = shalt.err (!%p6411_p11)
}
  0x27   : > { %s6505_s22 = smov 64   ;;  %s6506_s14 = smov 4  }
  0x28   : > { %6285 = dma.hbm_to_vmem [thread:$0]  (!%p6628_p9), %s260_s13, 2048, %s262_s16, %s250_s18, %s6505_s22, %s6505_s22, %s6506_s14  }
  0x29   : > { %273 = sbr.rel (%p6593_p8) target bundleno = 1328 (0x530), region = 48 }
  0x2e   : > { %s6645_s23 = sand.u32 1, %s6492_s25  }
  0x2f   : > { %s5629_s19 = sshll.u32 %s6645_s23, 7  ;;  %s276_s3 = scalar_lea.sflag [#allocation4], %s6645_s23 }
  0x30   : > { %s6651_s29 = scalar_lea.vmem [#allocation3], %s5629_s19 }
  0x31   : > { %6475 = dma.done.wait (%p6580_p4), %s276_s3, 2048  }
  0x32   : > { %6477 = vsyncadd (%p6580_p4), %s276_s3, 4294965248 }
  0x33   : > { %6479 = dma.done.wait (%p45_p1), [#allocation7], 288  }
  0x34   : > { %6481 = vsyncadd (%p45_p1), [#allocation7], 4294967008  ;;  %v6138_v0 = vld [vmem:[%s8927_s1] sm:$0xff]  ;;  %v6122_v1 = vld [vmem:[%s6651_s29] sm:$0xff]  ;;  %vm441_vm0 = vcmask 130048   ;;  %vm614_vm1 = vcmask 24576  }
  0x35   : > { %497 = vmatpush.bf16.msra.mxu0 %v6138_v0  ;;  %6267 = vmatpush.bf16.msra.mxu3 %v6138_v0  ;;  %v6123_v2 = vld [vmem:[%s6651_s29 + $0x8] sm:$0xff]  ;;  %v6124_v3 = vld [vmem:[%s6651_s29 + $0x10] sm:$0xff]  ;;  %v6125_v4 = vld [vmem:[%s6651_s29 + $0x18] sm:$0xff]  ;;  %vm622_vm2 = vsmask.f32 256  ;;  %vm611_vm4 = vcmask 27648  }
  0x36   : > { %v6126_v5 = vld [vmem:[%s6651_s29 + $0x20] sm:$0xff]  ;;  %v6127_v6 = vld [vmem:[%s6651_s29 + $0x28] sm:$0xff]  ;;  %v6128_v7 = vld [vmem:[%s6651_s29 + $0x30] sm:$0xff]  ;;  %v6507_v11 = vmov 0   ;;  %vm672_vm5 = vsmask.f32 7938 }
  0x37   : > { %vm6680_vm3 = vmand %vm614_vm1, %vm622_vm2  ;;  %v624_v9 = vld [vmem:[#allocation2 + $0xc] sm:$0x1]  ;;  %612 = vst.msk [vmem:[#allocation2] sm:$0xf] %vm611_vm4, %v6507_v11  ;;  %v674_v12 = vld [vmem:[#allocation2 + $0x14] sm:$0x1] }
  0x38   : > { %5700 = vmatmul.msk.bf16.vlgmr.msra.gmra.mxu0 %vm441_vm0, %v6122_v1  ;;  %v625_v10 = vsel %vm6680_vm3, 0, %v624_v9  ;;  %613 = vst.msk [vmem:[#allocation2 + $0x4] sm:$0xf] %vm611_vm4, %v6507_v11  ;;  %v1222_v13 = vld [vmem:[#allocation6] sm:$0x3]  ;;  %vm1725_vm6 = vcmask 1041408   ;;  %vm6692_vm7 = vmand %vm614_vm1, %vm672_vm5 }
  0x39   : > { %626 = vst [vmem:[#allocation2 + $0xc] sm:$0x1] %v625_v10  ;;  %v6697_v15 = vsel %vm1725_vm6, %v1222_v13, 0  ;;  %v675_v16 = vsel %vm6692_vm7, 0, %v674_v12  ;;  %v6129_v17 = vld [vmem:[%s6651_s29 + $0x38] sm:$0xff]  ;;  %vm1676_vm8 = vcmask 31744   ;;  %vm6738_vm14 = vmand %vm611_vm4, %vm672_vm5 }
  0x3a   : > { %615 = vst.msk [vmem:[#allocation2 + $0x8] sm:$0x1] %vm614_vm1, %v6507_v11  ;;  %1956 = vmatpush.bf16.msra.mxu2 %v6697_v15  ;;  %v627_v32 = vld [vmem:[#allocation2 + $0x18] sm:$0x1]  ;;  %vm1239_vm9 = vsmask.f32 3328 }
  0x3b   : > { %617 = vst.msk [vmem:[#allocation2 + $0xcc] sm:$0xf] %vm611_vm4, %v6507_v11  ;;  %v628_v34 = vsel %vm6680_vm3, 0, %v627_v32  ;;  %vm1240_vm10 = vsmask.f32 7440  ;;  %v6130_v49 = vld [vmem:[%s6651_s29 + $0x40] sm:$0xff] }
  0x3c   : > { %618 = vst.msk [vmem:[#allocation2 + $0xd0] sm:$0xf] %vm611_vm4, %v6507_v11  ;;  %v1627_v38 = vld [vmem:[#allocation6 + $0x2] sm:$0x3]  ;;  %vm6713_vm11 = vmor %vm1239_vm9, %vm1240_vm10  ;;  %v677_v46 = vld [vmem:[#allocation2 + $0x20] sm:$0x1] }
  0x3d   : > { %619 = vst.msk [vmem:[#allocation2 + $0xd4] sm:$0x1] %vm614_vm1, %v6507_v11  ;;  %v1727_v40 = vsel %vm1725_vm6, %v1627_v38, 0  ;;  %v6725_v47 = vld [vmem:[%s8928_s2] ss:$0 sm:$0xff]  ;;  %v678_v48 = vsel %vm6692_vm7, 0, %v677_v46 }
  0x3e   : > { %676 = vst [vmem:[#allocation2 + $0x14] sm:$0x1] %v675_v16  ;;  %v1190_v18 = vld [vmem:[#allocation2] sm:$0xf]  ;;  %1736 = vmatpush.bf16.msra.mxu1 %v1727_v40  ;;  %6268 = vmatpush.bf16.msrb.mxu3 %v1727_v40  ;;  %v630_v53 = vld [vmem:[#allocation2 + $0x24] sm:$0x1] }
  0x3f   : > { %v6139_v19 = vld [vmem:[#allocation2] sm:$0xff]  ;;  %v1243_v21 = vshrl.u32 %v1190_v18, 16  ;;  %v1246_v22 = vshll.u32 %v1190_v18, 16  ;;  %629 = vst [vmem:[#allocation2 + $0x18] sm:$0x1] %v628_v34  ;;  %v631_v55 = vsel %vm6680_vm3, 0, %v630_v53 }
  0x40   : > { %v6705_v20 = vld [vmem:[#allocation2 + $0x4] sm:$0xf]  ;;  %5796 = vmatmul.msk.bf16.vlgmr.msra.gmra.mxu2 %vm1676_vm8, %v6139_v19  ;;  %679 = vst [vmem:[#allocation2 + $0x20] sm:$0x1] %v678_v48  ;;  %vm2086_vm12 = vcmask 1042432   ;;  %vm2087_vm13 = vcmask 1046532  }
  0x41   : > { %v1252_v23 = vshll.u32 %v6705_v20, 16  ;;  %v1256_v24 = vshrl.u32 %v6705_v20, 16  ;;  %v1245_v25 = vrot.slane %v1243_v21, 4  ;;  %v1248_v26 = vrot.slane %v1246_v22, 5  ;;  %v1223_v27 = vld [vmem:[#allocation2 + $0x8] sm:$0x1]  ;;  %vm6745_vm15 = vmor %vm2086_vm12, %vm2087_vm13 }
  0x42   : > { %v1262_v31 = vshll.u32 %v1223_v27, 16  ;;  %632 = vst [vmem:[#allocation2 + $0x24] sm:$0x1] %v631_v55  ;;  %v8934_v57 = vrot.slane %v6705_v20, 5  ;;  %v2094_v58 = vrot.slane %v1223_v27, 5  ;;  %v6134_v11 = vld [vmem:[%s6651_s29 + $0x60] sm:$0xff] }
  0x43   : > { %v1254_v28 = vrot.slane %v1252_v23, 5  ;;  %v1258_v29 = vrot.slane %v1256_v24, 4  ;;  %v1249_v30 = vor.u32 %v1248_v26, %v1245_v25  ;;  %v1078_v1 = vld [vmem:[#allocation2 + $0xc] sm:$0xf]  ;;  %vm754_vm1 = vsmask.f32 4368  ;;  %5712 = vmatmul.msk.bf16.vlgmr.msra.gmra.mxu3 %vm441_vm0, %v6134_v11 }
  0x44   : > { %v1264_v37 = vrot.slane %v1262_v31, 5  ;;  %v2093_v0 = vrot.slane %v8934_v57, 4  ;;  %v6131_v13 = vld [vmem:[%s6651_s29 + $0x48] sm:$0xff]  ;;  %6269 = vmatpush.bf16.msra.mxu3 %v6697_v15  ;;  %vm6763_vm5 = vmor %vm622_vm2, %vm754_vm1  ;;  %v633_v27 = vld [vmem:[#allocation2 + $0x30] sm:$0x1]  ;;  %s8715_s30 = scalar_lea.vmem [#allocation8], %s5629_s19 }
  0x45   : > { %v1259_v33 = vor.u32 %v1258_v29, %v1254_v28  ;;  %v1250_v35 = vrot.slane %v1249_v30, 4  ;;  %v1082_v22 = vld [vmem:[#allocation2 + $0x14] sm:$0x1]  ;;  %v634_v31 = vsel %vm6680_vm3, 0, %v633_v27  ;;  %s6187_s17 = sshll.u32 %s6571_s28, 7  ;;  %s5535_s10 = sshll.u32 %s8715_s30, 4  ;;  %s5536_s10 = int_to_ptr.vmem [resolvable:$true] %s5535_s10 }
  0x46   : > { %635 = vst [vmem:[#allocation2 + $0x30] sm:$0x1] %v634_v31  ;;  %v1085_v40 = vld [vmem:[#allocation2 + $0x18] sm:$0xf]  ;;  %s5523_s28 = scalar_lea.sflag [#allocation5], %s6645_s23  ;;  %s6450_s13 = scalar_lea.hbm %s8933_s7, 256 }
  0x47   : > { %v1260_v36 = vrot.slane %v1259_v33, 4  ;;  %v1255_v41 = vsel %vm6713_vm11, %v1250_v35, %v1254_v28 }
  0x48   : > { %5701 = vmatmul.msk.bf16.gmra.mxu0 %vm441_vm0, %v6123_v2  ;;  %v1628_v43 = vunpack.c.l.b16 %v1255_v41 }
  0x49   : > { %v1265_v42 = vsel %vm6713_vm11, %v1260_v36, %v1264_v37 }
  0x4a   : > { %v1629_v44 = vunpack.c.l.b16 %v1265_v42 }
  0x4c   : > { %v1660_v45 = vpack.c.b16 %v1629_v44, %v1628_v43 }
  0x4e   : > { %5716 = vmatmul.msk.bf16.vlgmr.msra.gmra.mxu1 %vm1676_vm8, %v1660_v45  ;;  %v683_v45 = vld [vmem:[#allocation2 + $0x38] sm:$0x1] }
  0x58   : > { %5702 = vmatmul.msk.bf16.gmra.mxu0 %vm441_vm0, %v6124_v3 }
  0x68   : > { %5703 = vmatmul.msk.bf16.gmra.mxu0 %vm441_vm0, %v6125_v4 }
  0x78   : > { %5704 = vmatmul.msk.bf16.gmra.mxu0 %vm441_vm0, %v6126_v5  ;;  %v6751_v5 = vsel %vm6745_vm15, %v2093_v0, %v2094_v58  ;;  %v6132_v58 = vld [vmem:[%s6651_s29 + $0x50] sm:$0xff]  ;;  %v6135_v0 = vld [vmem:[%s6651_s29 + $0x68] sm:$0xff] }
  0x79   : > { %5713 = vmatmul.msk.bf16.gmra.mxu3 %vm441_vm0, %v6135_v0  ;;  %v6136_v0 = vld [vmem:[%s6651_s29 + $0x70] sm:$0xff] }
  0x88   : > { %5705 = vmatmul.msk.bf16.gmra.mxu0 %vm441_vm0, %v6127_v6  ;;  %v680_v6 = vld [vmem:[#allocation2 + $0x2c] sm:$0x1] }
  0x89   : > { %v681_v10 = vsel %vm6692_vm7, 0, %v680_v6  ;;  %v2456_v6 = vld [vmem:[#allocation6 + $0x6] sm:$0x3]  ;;  %5714 = vmatmul.msk.bf16.gmra.mxu3 %vm441_vm0, %v6136_v0 }
  0x8a   : > { %682 = vst [vmem:[#allocation2 + $0x2c] sm:$0x1] %v681_v10  ;;  %v2586_v11 = vsel %vm1725_vm6, %v2456_v6, 0 }
  0x8b   : > { %2595 = vmatpush.bf16.msrb.mxu0 %v2586_v11 }
  0x91   : > { %v1096_v6 = vld [vmem:[#allocation2 + $0x2c] sm:$0x1] }
  0x98   : > { %5706 = vmatmul.msk.bf16.gmra.mxu0 %vm441_vm0, %v6128_v7 }
  0xa8   : > { %5707 = vmatmul.msk.bf16.gmra.mxu0 %vm441_vm0, %v6129_v17 }
  0xb5   : > { %v499_v50 = vpop.f32.mrf.mxu0 }
  0xb6   : > { %v500_v51 = vadd.f32 %v6725_v47, %v499_v50 }
  0xb8   : > { %v579_v52 = vmax.f32 %v500_v51, 0.0  ;;  %5708 = vmatmul.msk.bf16.gmra.mxu0 %vm441_vm0, %v6130_v49  ;;  %v684_v51 = vsel %vm6692_vm7, 0, %v683_v45  ;;  %v686_v45 = vld [vmem:[#allocation2 + $0x44] sm:$0x1] }
  0xb9   : > { %685 = vst [vmem:[#allocation2 + $0x38] sm:$0x1] %v684_v51  ;;  %v687_v51 = vsel %vm6692_vm7, 0, %v686_v45 }
  0xba   : > { %v722_v54 = vpack.c.bf16 %v579_v52, %v579_v52  ;;  %688 = vst [vmem:[#allocation2 + $0x44] sm:$0x1] %v687_v51 }
  0xbc   : > { %v757_v56 = vshrl.u32 %v722_v54, 16  ;;  %v760_v61 = vshll.u32 %v722_v54, 16 }
  0xbd   : > { %v501_v59 = vpop.f32.mrf.mxu0 }
  0xbe   : > { %v759_v60 = vrot.slane %v757_v56, 7  ;;  %v502_v63 = vadd.f32 %v6725_v47, %v501_v59 }
  0xc0   : > { %v762_v3 = vor.u32 %v760_v61, %v759_v60  ;;  %v580_v4 = vmax.f32 %v502_v63, 0.0  ;;  %v763_v23 = vrot.slane %v759_v60, 4 }
  0xc2   : > { %v1079_v7 = vsel %vm6738_vm14, %v762_v3, %v1078_v1  ;;  %v723_v9 = vpack.c.bf16 %v580_v4, %v580_v4 }
  0xc3   : > { %1080 = vst [vmem:[#allocation2 + $0xc] sm:$0xf] %v1079_v7  ;;  %v1089_v7 = vld [vmem:[#allocation2 + $0x20] sm:$0x1] }
  0xc4   : > { %v765_v12 = vshrl.u32 %v723_v9, 16  ;;  %v768_v18 = vshll.u32 %v723_v9, 16 }
  0xc5   : > { %v504_v16 = vpop.f32.mrf.mxu0 }
  0xc6   : > { %v767_v17 = vrot.slane %v765_v12, 7  ;;  %v505_v19 = vadd.f32 %v6725_v47, %v504_v16 }
  0xc8   : > { %v770_v24 = vor.u32 %v768_v18, %v767_v17  ;;  %v772_v25 = vrot.slane %v767_v17, 4  ;;  %v581_v26 = vmax.f32 %v505_v19, 0.0  ;;  %5709 = vmatmul.msk.bf16.gmra.mxu0 %vm441_vm0, %v6131_v13 }
  0xca   : > { %v771_v28 = vsel %vm6763_vm5, %v763_v23, %v770_v24  ;;  %v1083_v29 = vsel %vm6680_vm3, %v772_v25, %v1082_v22  ;;  %v724_v15 = vpack.c.bf16 %v581_v26, %v581_v26  ;;  %v1192_v30 = vld [vmem:[#allocation2 + $0xc] sm:$0xf]  ;;  %v636_v23 = vld [vmem:[#allocation2 + $0x3c] sm:$0x1] }
  0xcb   : > { %1081 = vst.msk [vmem:[#allocation2 + $0x10] sm:$0xf] %vm611_vm4, %v771_v28  ;;  %v1267_v32 = vshrl.u32 %v1192_v30, 16  ;;  %v1270_v33 = vshll.u32 %v1192_v30, 16  ;;  %v637_v28 = vsel %vm6680_vm3, 0, %v636_v23 }
  0xcc   : > { %1084 = vst [vmem:[#allocation2 + $0x14] sm:$0x1] %v1083_v29  ;;  %v774_v34 = vshrl.u32 %v724_v15, 16  ;;  %v777_v37 = vshll.u32 %v724_v15, 16 }
  0xcd   : > { %v506_v35 = vpop.f32.mrf.mxu0  ;;  %v1269_v41 = vrot.slane %v1267_v32, 4  ;;  %v1272_v42 = vrot.slane %v1270_v33, 5  ;;  %638 = vst [vmem:[#allocation2 + $0x3c] sm:$0x1] %v637_v28 }
  0xce   : > { %v776_v36 = vrot.slane %v774_v34, 7  ;;  %v507_v38 = vadd.f32 %v6725_v47, %v506_v35 }
  0xcf   : > { %v1273_v53 = vor.u32 %v1272_v42, %v1269_v41 }
  0xd0   : > { %v779_v43 = vor.u32 %v777_v37, %v776_v36  ;;  %v582_v44 = vmax.f32 %v507_v38, 0.0  ;;  %v780_v12 = vrot.slane %v776_v36, 4 }
  0xd1   : > { %v1274_v9 = vrot.slane %v1273_v53, 4 }
  0xd2   : > { %v1086_v46 = vsel %vm6738_vm14, %v779_v43, %v1085_v40  ;;  %v725_v48 = vpack.c.bf16 %v582_v44, %v582_v44  ;;  %v6140_v49 = vld [vmem:[#allocation2 + $0xc] sm:$0xff]  ;;  %v1092_v40 = vld [vmem:[#allocation2 + $0x24] sm:$0xf] }
  0xd3   : > { %v1193_v50 = vld [vmem:[#allocation2 + $0x10] sm:$0xf]  ;;  %1087 = vst [vmem:[#allocation2 + $0x18] sm:$0xf] %v1086_v46  ;;  %v1224_v52 = vld [vmem:[#allocation2 + $0x14] sm:$0x1]  ;;  %5797 = vmatmul.msk.bf16.gmra.mxu2 %vm1676_vm8, %v6140_v49 }
  0xd4   : > { %v1276_v54 = vshll.u32 %v1193_v50, 16  ;;  %v1280_v55 = vshrl.u32 %v1193_v50, 16  ;;  %v782_v56 = vshrl.u32 %v725_v48, 16  ;;  %v1286_v63 = vshll.u32 %v1224_v52, 16  ;;  %v6155_v0 = vld [vmem:[#allocation2 + $0xc] sm:$0xff] }
  0xd5   : > { %v509_v59 = vpop.f32.mrf.mxu0  ;;  %v785_v3 = vshll.u32 %v725_v48, 16 }
  0xd6   : > { %v1278_v60 = vrot.slane %v1276_v54, 5  ;;  %v1282_v61 = vrot.slane %v1280_v55, 4  ;;  %v784_v1 = vrot.slane %v782_v56, 7  ;;  %v510_v4 = vadd.f32 %v6725_v47, %v509_v59 }
  0xd7   : > { %v1288_v22 = vrot.slane %v1286_v63, 5 }
  0xd8   : > { %v1283_v10 = vor.u32 %v1282_v61, %v1278_v60  ;;  %v787_v13 = vor.u32 %v785_v3, %v784_v1  ;;  %v789_v16 = vrot.slane %v784_v1, 4  ;;  %v583_v17 = vmax.f32 %v510_v4, 0.0  ;;  %5710 = vmatmul.msk.bf16.gmra.mxu0 %vm441_vm0, %v6132_v58  ;;  %v6133_v58 = vld [vmem:[%s6651_s29 + $0x58] sm:$0xff] }
  0xd9   : > { %v1279_v18 = vsel %vm6713_vm11, %v1274_v9, %v1278_v60 }
  0xda   : > { %v1284_v19 = vrot.slane %v1283_v10, 4  ;;  %v788_v24 = vsel %vm6763_vm5, %v780_v12, %v787_v13  ;;  %v1090_v25 = vsel %vm6680_vm3, %v789_v16, %v1089_v7  ;;  %v726_v26 = vpack.c.bf16 %v583_v17, %v583_v17  ;;  %v1194_v27 = vld [vmem:[#allocation2 + $0x18] sm:$0xf] }
  0xdb   : > { %1088 = vst.msk [vmem:[#allocation2 + $0x1c] sm:$0xf] %vm611_vm4, %v788_v24  ;;  %v1291_v15 = vshrl.u32 %v1194_v27, 16  ;;  %v1294_v30 = vshll.u32 %v1194_v27, 16  ;;  %v1630_v32 = vunpack.c.l.b16 %v1279_v18 }
  0xdc   : > { %v1289_v29 = vsel %vm6713_vm11, %v1284_v19, %v1288_v22  ;;  %1091 = vst [vmem:[#allocation2 + $0x20] sm:$0x1] %v1090_v25  ;;  %v791_v31 = vshrl.u32 %v726_v26, 16  ;;  %v794_v36 = vshll.u32 %v726_v26, 16  ;;  %v639_v19 = vld [vmem:[#allocation2 + $0x48] sm:$0x1] }
  0xdd   : > { %v1631_v33 = vunpack.c.l.b16 %v1289_v29  ;;  %v511_v34 = vpop.f32.mrf.mxu0  ;;  %v1293_v41 = vrot.slane %v1291_v15, 4  ;;  %v1296_v42 = vrot.slane %v1294_v30, 5  ;;  %v640_v26 = vsel %vm6680_vm3, 0, %v639_v19 }
  0xde   : > { %v793_v35 = vrot.slane %v791_v31, 7  ;;  %v512_v37 = vadd.f32 %v6725_v47, %v511_v34  ;;  %641 = vst [vmem:[#allocation2 + $0x48] sm:$0x1] %v640_v26 }
  0xdf   : > { %v1661_v38 = vpack.c.b16 %v1631_v33, %v1630_v32  ;;  %v1297_v53 = vor.u32 %v1296_v42, %v1293_v41 }
  0xe0   : > { %v796_v43 = vor.u32 %v794_v36, %v793_v35  ;;  %v584_v44 = vmax.f32 %v512_v37, 0.0  ;;  %v797_v10 = vrot.slane %v793_v35, 4  ;;  %v1099_v37 = vld [vmem:[#allocation2 + $0x30] sm:$0xf] }
  0xe1   : > { %5717 = vmatmul.msk.bf16.gmra.mxu1 %vm1676_vm8, %v1661_v38  ;;  %v1298_v7 = vrot.slane %v1297_v53, 4 }
  0xe2   : > { %v1093_v46 = vsel %vm6738_vm14, %v796_v43, %v1092_v40  ;;  %v727_v48 = vpack.c.bf16 %v584_v44, %v584_v44  ;;  %v6141_v49 = vld [vmem:[#allocation2 + $0x18] sm:$0xff]  ;;  %v689_v43 = vld [vmem:[#allocation2 + $0x50] sm:$0x1] }
  0xe3   : > { %v1195_v50 = vld [vmem:[#allocation2 + $0x1c] sm:$0xf]  ;;  %1094 = vst [vmem:[#allocation2 + $0x24] sm:$0xf] %v1093_v46  ;;  %v1225_v52 = vld [vmem:[#allocation2 + $0x20] sm:$0x1]  ;;  %5798 = vmatmul.msk.bf16.gmra.mxu2 %vm1676_vm8, %v6141_v49 }
  0xe4   : > { %v1300_v54 = vshll.u32 %v1195_v50, 16  ;;  %v1304_v55 = vshrl.u32 %v1195_v50, 16  ;;  %v799_v56 = vshrl.u32 %v727_v48, 16  ;;  %v1310_v63 = vshll.u32 %v1225_v52, 16 }
  0xe5   : > { %v514_v59 = vpop.f32.mrf.mxu0  ;;  %v802_v3 = vshll.u32 %v727_v48, 16  ;;  %v690_v49 = vsel %vm6692_vm7, 0, %v689_v43 }
  0xe6   : > { %v1302_v60 = vrot.slane %v1300_v54, 5  ;;  %v1306_v61 = vrot.slane %v1304_v55, 4  ;;  %v801_v1 = vrot.slane %v799_v56, 7  ;;  %v515_v4 = vadd.f32 %v6725_v47, %v514_v59  ;;  %691 = vst [vmem:[#allocation2 + $0x50] sm:$0x1] %v690_v49 }
  0xe7   : > { %v1312_v18 = vrot.slane %v1310_v63, 5 }
  0xe8   : > { %v1307_v9 = vor.u32 %v1306_v61, %v1302_v60  ;;  %v804_v11 = vor.u32 %v802_v3, %v801_v1  ;;  %v806_v12 = vrot.slane %v801_v1, 4  ;;  %v585_v13 = vmax.f32 %v515_v4, 0.0  ;;  %5711 = vmatmul.msk.bf16.gmra.mxu0 %vm441_vm0, %v6133_v58  ;;  %v1103_v1 = vld [vmem:[#allocation2 + $0x38] sm:$0x1] }
  0xe9   : > { %v1303_v16 = vsel %vm6713_vm11, %v1298_v7, %v1302_v60 }
  0xea   : > { %v1308_v17 = vrot.slane %v1307_v9, 4  ;;  %v805_v22 = vsel %vm6763_vm5, %v797_v10, %v804_v11  ;;  %v1097_v23 = vsel %vm6680_vm3, %v806_v12, %v1096_v6  ;;  %v728_v24 = vpack.c.bf16 %v585_v13, %v585_v13  ;;  %v1196_v25 = vld [vmem:[#allocation2 + $0x24] sm:$0xf] }
  0xeb   : > { %1095 = vst.msk [vmem:[#allocation2 + $0x28] sm:$0xf] %vm611_vm4, %v805_v22  ;;  %v1315_v28 = vshrl.u32 %v1196_v25, 16  ;;  %v1318_v29 = vshll.u32 %v1196_v25, 16  ;;  %v1632_v30 = vunpack.c.l.b16 %v1303_v16  ;;  %v642_v16 = vld [vmem:[#allocation2 + $0x54] sm:$0x1] }
  0xec   : > { %v1313_v27 = vsel %vm6713_vm11, %v1308_v17, %v1312_v18  ;;  %1098 = vst [vmem:[#allocation2 + $0x2c] sm:$0x1] %v1097_v23  ;;  %v808_v15 = vshrl.u32 %v728_v24, 16  ;;  %v811_v34 = vshll.u32 %v728_v24, 16  ;;  %v643_v23 = vsel %vm6680_vm3, 0, %v642_v16 }
  0xed   : > { %v1633_v31 = vunpack.c.l.b16 %v1313_v27  ;;  %v516_v32 = vpop.f32.mrf.mxu0  ;;  %v1317_v38 = vrot.slane %v1315_v28, 4  ;;  %v1320_v40 = vrot.slane %v1318_v29, 5  ;;  %644 = vst [vmem:[#allocation2 + $0x54] sm:$0x1] %v643_v23 }
  0xee   : > { %v810_v33 = vrot.slane %v808_v15, 7  ;;  %v517_v35 = vadd.f32 %v6725_v47, %v516_v32 }
  0xef   : > { %v1662_v36 = vpack.c.b16 %v1633_v31, %v1632_v30  ;;  %v1321_v51 = vor.u32 %v1320_v40, %v1317_v38  ;;  %v692_v40 = vld [vmem:[#allocation2 + $0x5c] sm:$0x1] }
  0xf0   : > { %v813_v41 = vor.u32 %v811_v34, %v810_v33  ;;  %v586_v42 = vmax.f32 %v517_v35, 0.0  ;;  %v814_v6 = vrot.slane %v810_v33, 4  ;;  %v1106_v34 = vld [vmem:[#allocation2 + $0x3c] sm:$0xf] }
  0xf1   : > { %5718 = vmatmul.msk.bf16.gmra.mxu1 %vm1676_vm8, %v1662_v36  ;;  %v1322_v3 = vrot.slane %v1321_v51, 4 }
  0xf2   : > { %v1100_v44 = vsel %vm6738_vm14, %v813_v41, %v1099_v37  ;;  %v729_v45 = vpack.c.bf16 %v586_v42, %v586_v42  ;;  %v6142_v46 = vld [vmem:[#allocation2 + $0x24] sm:$0xff] }
  0xf3   : > { %v1197_v48 = vld [vmem:[#allocation2 + $0x28] sm:$0xf]  ;;  %1101 = vst [vmem:[#allocation2 + $0x30] sm:$0xf] %v1100_v44  ;;  %v1226_v50 = vld [vmem:[#allocation2 + $0x2c] sm:$0x1]  ;;  %5799 = vmatmul.msk.bf16.gmra.mxu2 %vm1676_vm8, %v6142_v46 }
  0xf4   : > { %v1324_v52 = vshll.u32 %v1197_v48, 16  ;;  %v1328_v53 = vshrl.u32 %v1197_v48, 16  ;;  %v816_v54 = vshrl.u32 %v729_v45, 16  ;;  %v1334_v59 = vshll.u32 %v1226_v50, 16 }
  0xf5   : > { %v519_v55 = vpop.f32.mrf.mxu0  ;;  %v819_v61 = vshll.u32 %v729_v45, 16  ;;  %v693_v45 = vsel %vm6692_vm7, 0, %v692_v40 }
  0xf6   : > { %v1326_v56 = vrot.slane %v1324_v52, 5  ;;  %v1330_v58 = vrot.slane %v1328_v53, 4  ;;  %v818_v60 = vrot.slane %v816_v54, 7  ;;  %v520_v63 = vadd.f32 %v6725_v47, %v519_v55  ;;  %694 = vst [vmem:[#allocation2 + $0x5c] sm:$0x1] %v693_v45 }
  0xf7   : > { %v1336_v13 = vrot.slane %v1334_v59, 5 }
  0xf8   : > { %v1331_v4 = vor.u32 %v1330_v58, %v1326_v56  ;;  %v821_v7 = vor.u32 %v819_v61, %v818_v60  ;;  %v823_v9 = vrot.slane %v818_v60, 4  ;;  %v587_v10 = vmax.f32 %v520_v63, 0.0  ;;  %5908 = vmatmul.msk.bf16.vlgmr.msrb.gmra.mxu0 %vm1676_vm8, %v6155_v0  ;;  %v6156_v60 = vld [vmem:[#allocation2 + $0x18] sm:$0xff]  ;;  %v1110_v61 = vld [vmem:[#allocation2 + $0x44] sm:$0x1] }
  0xf9   : > { %v1327_v11 = vsel %vm6713_vm11, %v1322_v3, %v1326_v56 }
  0xfa   : > { %v1332_v12 = vrot.slane %v1331_v4, 4  ;;  %v822_v17 = vsel %vm6763_vm5, %v814_v6, %v821_v7  ;;  %v1104_v18 = vsel %vm6680_vm3, %v823_v9, %v1103_v1  ;;  %v730_v19 = vpack.c.bf16 %v587_v10, %v587_v10  ;;  %v1198_v22 = vld [vmem:[#allocation2 + $0x30] sm:$0xf] }
  0xfb   : > { %1102 = vst.msk [vmem:[#allocation2 + $0x34] sm:$0xf] %vm611_vm4, %v822_v17  ;;  %v1339_v25 = vshrl.u32 %v1198_v22, 16  ;;  %v1342_v26 = vshll.u32 %v1198_v22, 16  ;;  %v1634_v28 = vunpack.c.l.b16 %v1327_v11  ;;  %v645_v11 = vld [vmem:[#allocation2 + $0x60] sm:$0x1] }
  0xfc   : > { %v1337_v24 = vsel %vm6713_vm11, %v1332_v12, %v1336_v13  ;;  %1105 = vst [vmem:[#allocation2 + $0x38] sm:$0x1] %v1104_v18  ;;  %v825_v27 = vshrl.u32 %v730_v19, 16  ;;  %v828_v31 = vshll.u32 %v730_v19, 16  ;;  %v646_v18 = vsel %vm6680_vm3, 0, %v645_v11 }
  0xfd   : > { %v1635_v29 = vunpack.c.l.b16 %v1337_v24  ;;  %v521_v15 = vpop.f32.mrf.mxu0  ;;  %v1341_v35 = vrot.slane %v1339_v25, 4  ;;  %v1344_v36 = vrot.slane %v1342_v26, 5  ;;  %647 = vst [vmem:[#allocation2 + $0x60] sm:$0x1] %v646_v18 }
  0xfe   : > { %v827_v30 = vrot.slane %v825_v27, 7  ;;  %v522_v32 = vadd.f32 %v6725_v47, %v521_v15 }
  0xff   : > { %v1663_v33 = vpack.c.b16 %v1635_v29, %v1634_v28  ;;  %v1345_v48 = vor.u32 %v1344_v36, %v1341_v35  ;;  %v695_v36 = vld [vmem:[#allocation2 + $0x68] sm:$0x1] }
 0x100   : > { %v830_v37 = vor.u32 %v828_v31, %v827_v30  ;;  %v588_v38 = vmax.f32 %v522_v32, 0.0  ;;  %v831_v1 = vrot.slane %v827_v30, 4  ;;  %v1113_v31 = vld [vmem:[#allocation2 + $0x48] sm:$0xf] }
 0x101   : > { %5719 = vmatmul.msk.bf16.gmra.mxu1 %vm1676_vm8, %v1663_v33  ;;  %v1346_v63 = vrot.slane %v1345_v48, 4 }
 0x102   : > { %v1107_v41 = vsel %vm6738_vm14, %v830_v37, %v1106_v34  ;;  %v731_v42 = vpack.c.bf16 %v588_v38, %v588_v38  ;;  %v6143_v43 = vld [vmem:[#allocation2 + $0x30] sm:$0xff] }
 0x103   : > { %v1199_v44 = vld [vmem:[#allocation2 + $0x34] sm:$0xf]  ;;  %1108 = vst [vmem:[#allocation2 + $0x3c] sm:$0xf] %v1107_v41  ;;  %v1227_v46 = vld [vmem:[#allocation2 + $0x38] sm:$0x1]  ;;  %5800 = vmatmul.msk.bf16.gmra.mxu2 %vm1676_vm8, %v6143_v43 }
 0x104   : > { %v1348_v49 = vshll.u32 %v1199_v44, 16  ;;  %v1352_v50 = vshrl.u32 %v1199_v44, 16  ;;  %v833_v51 = vshrl.u32 %v731_v42, 16  ;;  %v1358_v55 = vshll.u32 %v1227_v46, 16 }
 0x105   : > { %v524_v52 = vpop.f32.mrf.mxu0  ;;  %v836_v58 = vshll.u32 %v731_v42, 16  ;;  %v696_v42 = vsel %vm6692_vm7, 0, %v695_v36 }
 0x106   : > { %v1350_v53 = vrot.slane %v1348_v49, 5  ;;  %v1354_v54 = vrot.slane %v1352_v50, 4  ;;  %v835_v56 = vrot.slane %v833_v51, 7  ;;  %v525_v59 = vadd.f32 %v6725_v47, %v524_v52  ;;  %697 = vst [vmem:[#allocation2 + $0x68] sm:$0x1] %v696_v42 }
 0x107   : > { %v1360_v10 = vrot.slane %v1358_v55, 5 }
 0x108   : > { %v1355_v0 = vor.u32 %v1354_v54, %v1350_v53  ;;  %v838_v3 = vor.u32 %v836_v58, %v835_v56  ;;  %v840_v4 = vrot.slane %v835_v56, 4  ;;  %v589_v6 = vmax.f32 %v525_v59, 0.0  ;;  %5909 = vmatmul.msk.bf16.gmra.mxu0 %vm1676_vm8, %v6156_v60  ;;  %v6157_v56 = vld [vmem:[#allocation2 + $0x24] sm:$0xff]  ;;  %v1117_v58 = vld [vmem:[#allocation2 + $0x50] sm:$0x1] }
 0x109   : > { %v1351_v7 = vsel %vm6713_vm11, %v1346_v63, %v1350_v53 }
 0x10a   : > { %v1356_v9 = vrot.slane %v1355_v0, 4  ;;  %v839_v12 = vsel %vm6763_vm5, %v831_v1, %v838_v3  ;;  %v1111_v13 = vsel %vm6680_vm3, %v840_v4, %v1110_v61  ;;  %v732_v16 = vpack.c.bf16 %v589_v6, %v589_v6  ;;  %v1200_v17 = vld [vmem:[#allocation2 + $0x3c] sm:$0xf] }
 0x10b   : > { %1109 = vst.msk [vmem:[#allocation2 + $0x40] sm:$0xf] %vm611_vm4, %v839_v12  ;;  %v1363_v22 = vshrl.u32 %v1200_v17, 16  ;;  %v1366_v23 = vshll.u32 %v1200_v17, 16  ;;  %v1636_v25 = vunpack.c.l.b16 %v1351_v7  ;;  %v648_v7 = vld [vmem:[#allocation2 + $0x6c] sm:$0x1] }
 0x10c   : > { %v1361_v19 = vsel %vm6713_vm11, %v1356_v9, %v1360_v10  ;;  %1112 = vst [vmem:[#allocation2 + $0x44] sm:$0x1] %v1111_v13  ;;  %v842_v24 = vshrl.u32 %v732_v16, 16  ;;  %v845_v29 = vshll.u32 %v732_v16, 16  ;;  %v649_v13 = vsel %vm6680_vm3, 0, %v648_v7 }
 0x10d   : > { %v1637_v26 = vunpack.c.l.b16 %v1361_v19  ;;  %v526_v27 = vpop.f32.mrf.mxu0  ;;  %v1365_v32 = vrot.slane %v1363_v22, 4  ;;  %v1368_v33 = vrot.slane %v1366_v23, 5  ;;  %650 = vst [vmem:[#allocation2 + $0x6c] sm:$0x1] %v649_v13 }
 0x10e   : > { %v844_v28 = vrot.slane %v842_v24, 7  ;;  %v527_v15 = vadd.f32 %v6725_v47, %v526_v27 }
 0x10f   : > { %v1664_v30 = vpack.c.b16 %v1637_v26, %v1636_v25  ;;  %v1369_v44 = vor.u32 %v1368_v33, %v1365_v32  ;;  %v698_v33 = vld [vmem:[#allocation2 + $0x74] sm:$0x1] }
 0x110   : > { %v847_v34 = vor.u32 %v845_v29, %v844_v28  ;;  %v590_v35 = vmax.f32 %v527_v15, 0.0  ;;  %v848_v61 = vrot.slane %v844_v28, 4  ;;  %v1120_v29 = vld [vmem:[#allocation2 + $0x54] sm:$0xf] }
 0x111   : > { %5720 = vmatmul.msk.bf16.gmra.mxu1 %vm1676_vm8, %v1664_v30  ;;  %v1370_v59 = vrot.slane %v1369_v44, 4 }
 0x112   : > { %v1114_v37 = vsel %vm6738_vm14, %v847_v34, %v1113_v31  ;;  %v733_v38 = vpack.c.bf16 %v590_v35, %v590_v35  ;;  %v6144_v40 = vld [vmem:[#allocation2 + $0x3c] sm:$0xff] }
 0x113   : > { %v1201_v41 = vld [vmem:[#allocation2 + $0x40] sm:$0xf]  ;;  %1115 = vst [vmem:[#allocation2 + $0x48] sm:$0xf] %v1114_v37  ;;  %v1228_v43 = vld [vmem:[#allocation2 + $0x44] sm:$0x1]  ;;  %5801 = vmatmul.msk.bf16.gmra.mxu2 %vm1676_vm8, %v6144_v40 }
 0x114   : > { %v1372_v45 = vshll.u32 %v1201_v41, 16  ;;  %v1376_v46 = vshrl.u32 %v1201_v41, 16  ;;  %v850_v48 = vshrl.u32 %v733_v38, 16  ;;  %v1382_v52 = vshll.u32 %v1228_v43, 16  ;;  %v7257_v14 = vld [vmem:[#allocation2 + $0x44] sm:$0x1] }
 0x115   : > { %v529_v49 = vpop.f32.mrf.mxu0  ;;  %v853_v54 = vshll.u32 %v733_v38, 16  ;;  %v699_v38 = vsel %vm6692_vm7, 0, %v698_v33  ;;  %v2873_v21 = vshll.u32 %v7257_v14, 16 }
 0x116   : > { %v1374_v50 = vrot.slane %v1372_v45, 5  ;;  %v1378_v51 = vrot.slane %v1376_v46, 4  ;;  %v852_v53 = vrot.slane %v850_v48, 7  ;;  %v530_v55 = vadd.f32 %v6725_v47, %v529_v49  ;;  %700 = vst [vmem:[#allocation2 + $0x74] sm:$0x1] %v699_v38 }
 0x117   : > { %v1384_v6 = vrot.slane %v1382_v52, 5 }
 0x118   : > { %v1379_v60 = vor.u32 %v1378_v51, %v1374_v50  ;;  %v855_v63 = vor.u32 %v853_v54, %v852_v53  ;;  %v857_v0 = vrot.slane %v852_v53, 4  ;;  %v591_v1 = vmax.f32 %v530_v55, 0.0  ;;  %5910 = vmatmul.msk.bf16.gmra.mxu0 %vm1676_vm8, %v6157_v56  ;;  %v6158_v54 = vld [vmem:[#allocation2 + $0x30] sm:$0xff]  ;;  %v1124_v55 = vld [vmem:[#allocation2 + $0x5c] sm:$0x1] }
 0x119   : > { %v1375_v3 = vsel %vm6713_vm11, %v1370_v59, %v1374_v50  ;;  %v6137_v50 = vld [vmem:[%s6651_s29 + $0x78] sm:$0xff] }
 0x11a   : > { %v1380_v4 = vrot.slane %v1379_v60, 4  ;;  %v856_v9 = vsel %vm6763_vm5, %v848_v61, %v855_v63  ;;  %v1118_v10 = vsel %vm6680_vm3, %v857_v0, %v1117_v58  ;;  %v734_v11 = vpack.c.bf16 %v591_v1, %v591_v1  ;;  %v1202_v12 = vld [vmem:[#allocation2 + $0x48] sm:$0xf]  ;;  %5715 = vmatmul.msk.bf16.gmra.mxu3 %vm441_vm0, %v6137_v50 }
 0x11b   : > { %1116 = vst.msk [vmem:[#allocation2 + $0x4c] sm:$0xf] %vm611_vm4, %v856_v9  ;;  %v1387_v17 = vshrl.u32 %v1202_v12, 16  ;;  %v1390_v18 = vshll.u32 %v1202_v12, 16  ;;  %v1638_v22 = vunpack.c.l.b16 %v1375_v3  ;;  %vm5489_vm0 = vcmask 125952  }
 0x11c   : > { %v1385_v16 = vsel %vm6713_vm11, %v1380_v4, %v1384_v6  ;;  %1119 = vst [vmem:[#allocation2 + $0x50] sm:$0x1] %v1118_v10  ;;  %v859_v19 = vshrl.u32 %v734_v11, 16  ;;  %v862_v26 = vshll.u32 %v734_v11, 16  ;;  %v651_v4 = vld [vmem:[#allocation2 + $0x78] sm:$0x1] }
 0x11d   : > { %v1639_v23 = vunpack.c.l.b16 %v1385_v16  ;;  %v531_v24 = vpop.f32.mrf.mxu0  ;;  %v1389_v15 = vrot.slane %v1387_v17, 4  ;;  %v1392_v30 = vrot.slane %v1390_v18, 5  ;;  %v652_v11 = vsel %vm6680_vm3, 0, %v651_v4 }
 0x11e   : > { %v861_v25 = vrot.slane %v859_v19, 7  ;;  %v532_v27 = vadd.f32 %v6725_v47, %v531_v24  ;;  %653 = vst [vmem:[#allocation2 + $0x78] sm:$0x1] %v652_v11  ;;  %v1738_v11 = vpop.f32.mrf.mxu1 }
 0x11f   : > { %v1665_v28 = vpack.c.b16 %v1639_v23, %v1638_v22  ;;  %v1393_v41 = vor.u32 %v1392_v30, %v1389_v15 }
 0x120   : > { %v864_v31 = vor.u32 %v862_v26, %v861_v25  ;;  %v592_v32 = vmax.f32 %v532_v27, 0.0  ;;  %v865_v59 = vrot.slane %v861_v25, 4  ;;  %v1127_v27 = vld [vmem:[#allocation2 + $0x60] sm:$0xf] }
 0x121   : > { %5721 = vmatmul.msk.bf16.gmra.mxu1 %vm1676_vm8, %v1665_v28  ;;  %v1394_v56 = vrot.slane %v1393_v41, 4 }
 0x122   : > { %v1121_v34 = vsel %vm6738_vm14, %v864_v31, %v1120_v29  ;;  %v735_v35 = vpack.c.bf16 %v592_v32, %v592_v32  ;;  %v6145_v36 = vld [vmem:[#allocation2 + $0x48] sm:$0xff]  ;;  %v701_v31 = vld [vmem:[#allocation2 + $0x80] sm:$0x1] }
 0x123   : > { %v1203_v37 = vld [vmem:[#allocation2 + $0x4c] sm:$0xf]  ;;  %1122 = vst [vmem:[#allocation2 + $0x54] sm:$0xf] %v1121_v34  ;;  %v1229_v40 = vld [vmem:[#allocation2 + $0x50] sm:$0x1]  ;;  %5802 = vmatmul.msk.bf16.gmra.mxu2 %vm1676_vm8, %v6145_v36 }
 0x124   : > { %v1396_v42 = vshll.u32 %v1203_v37, 16  ;;  %v1400_v43 = vshrl.u32 %v1203_v37, 16  ;;  %v867_v44 = vshrl.u32 %v735_v35, 16  ;;  %v1406_v49 = vshll.u32 %v1229_v40, 16 }
 0x125   : > { %v534_v45 = vpop.f32.mrf.mxu0  ;;  %v870_v52 = vshll.u32 %v735_v35, 16  ;;  %v702_v36 = vsel %vm6692_vm7, 0, %v701_v31  ;;  %v704_v31 = vld [vmem:[#allocation2 + $0x8c] sm:$0x1] }
 0x126   : > { %v1398_v46 = vrot.slane %v1396_v42, 5  ;;  %v1402_v48 = vrot.slane %v1400_v43, 4  ;;  %v869_v51 = vrot.slane %v867_v44, 7  ;;  %v535_v53 = vadd.f32 %v6725_v47, %v534_v45  ;;  %703 = vst [vmem:[#allocation2 + $0x80] sm:$0x1] %v702_v36 }
 0x127   : > { %v1408_v3 = vrot.slane %v1406_v49, 5  ;;  %v705_v36 = vsel %vm6692_vm7, 0, %v704_v31 }
 0x128   : > { %v1403_v58 = vor.u32 %v1402_v48, %v1398_v46  ;;  %v872_v60 = vor.u32 %v870_v52, %v869_v51  ;;  %v874_v61 = vrot.slane %v869_v51, 4  ;;  %v593_v63 = vmax.f32 %v535_v53, 0.0  ;;  %5911 = vmatmul.msk.bf16.gmra.mxu0 %vm1676_vm8, %v6158_v54  ;;  %v6159_v51 = vld [vmem:[#allocation2 + $0x3c] sm:$0xff]  ;;  %v1131_v52 = vld [vmem:[#allocation2 + $0x68] sm:$0x1] }
 0x129   : > { %v1399_v0 = vsel %vm6713_vm11, %v1394_v56, %v1398_v46  ;;  %706 = vst [vmem:[#allocation2 + $0x8c] sm:$0x1] %v705_v36  ;;  %v1141_v36 = vld [vmem:[#allocation2 + $0x78] sm:$0xf] }
 0x12a   : > { %v1404_v1 = vrot.slane %v1403_v58, 4  ;;  %v873_v6 = vsel %vm6763_vm5, %v865_v59, %v872_v60  ;;  %v1125_v7 = vsel %vm6680_vm3, %v874_v61, %v1124_v55  ;;  %v736_v9 = vpack.c.bf16 %v593_v63, %v593_v63  ;;  %v1204_v10 = vld [vmem:[#allocation2 + $0x54] sm:$0xf] }
 0x12b   : > { %1123 = vst.msk [vmem:[#allocation2 + $0x58] sm:$0xf] %vm611_vm4, %v873_v6  ;;  %v1411_v13 = vshrl.u32 %v1204_v10, 16  ;;  %v1414_v16 = vshll.u32 %v1204_v10, 16  ;;  %v1640_v18 = vunpack.c.l.b16 %v1399_v0  ;;  %v654_v0 = vld [vmem:[#allocation2 + $0x84] sm:$0x1]  ;;  %v1958_v10 = vpop.f32.mrf.mxu2 }
 0x12c   : > { %v1409_v12 = vsel %vm6713_vm11, %v1404_v1, %v1408_v3  ;;  %1126 = vst [vmem:[#allocation2 + $0x5c] sm:$0x1] %v1125_v7  ;;  %v876_v17 = vshrl.u32 %v736_v9, 16  ;;  %v879_v24 = vshll.u32 %v736_v9, 16  ;;  %v655_v7 = vsel %vm6680_vm3, 0, %v654_v0 }
 0x12d   : > { %v1641_v19 = vunpack.c.l.b16 %v1409_v12  ;;  %v536_v22 = vpop.f32.mrf.mxu0  ;;  %v1413_v28 = vrot.slane %v1411_v13, 4  ;;  %v1416_v29 = vrot.slane %v1414_v16, 5  ;;  %656 = vst [vmem:[#allocation2 + $0x84] sm:$0x1] %v655_v7 }
 0x12e   : > { %v878_v23 = vrot.slane %v876_v17, 7  ;;  %v537_v25 = vadd.f32 %v6725_v47, %v536_v22 }
 0x12f   : > { %v1666_v26 = vpack.c.b16 %v1641_v19, %v1640_v18  ;;  %v1417_v38 = vor.u32 %v1416_v29, %v1413_v28  ;;  %v6923_v19 = vadd.f32 %v1958_v10, %v1738_v11 }
 0x130   : > { %v881_v15 = vor.u32 %v879_v24, %v878_v23  ;;  %v594_v30 = vmax.f32 %v537_v25, 0.0  ;;  %v882_v55 = vrot.slane %v878_v23, 4 }
 0x131   : > { %5722 = vmatmul.msk.bf16.gmra.mxu1 %vm1676_vm8, %v1666_v26  ;;  %v1418_v53 = vrot.slane %v1417_v38, 4 }
 0x132   : > { %v1128_v32 = vsel %vm6738_vm14, %v881_v15, %v1127_v27  ;;  %v737_v33 = vpack.c.bf16 %v594_v30, %v594_v30  ;;  %v6146_v34 = vld [vmem:[#allocation2 + $0x54] sm:$0xff]  ;;  %v1134_v27 = vld [vmem:[#allocation2 + $0x6c] sm:$0xf] }
 0x133   : > { %v1205_v35 = vld [vmem:[#allocation2 + $0x58] sm:$0xf]  ;;  %1129 = vst [vmem:[#allocation2 + $0x60] sm:$0xf] %v1128_v32  ;;  %v1230_v37 = vld [vmem:[#allocation2 + $0x5c] sm:$0x1]  ;;  %5803 = vmatmul.msk.bf16.gmra.mxu2 %vm1676_vm8, %v6146_v34 }
 0x134   : > { %v1420_v40 = vshll.u32 %v1205_v35, 16  ;;  %v1424_v41 = vshrl.u32 %v1205_v35, 16  ;;  %v884_v42 = vshrl.u32 %v737_v33, 16  ;;  %v1430_v46 = vshll.u32 %v1230_v37, 16 }
 0x135   : > { %v539_v43 = vpop.f32.mrf.mxu0  ;;  %v887_v49 = vshll.u32 %v737_v33, 16 }
 0x136   : > { %v1422_v44 = vrot.slane %v1420_v40, 5  ;;  %v1426_v45 = vrot.slane %v1424_v41, 4  ;;  %v886_v48 = vrot.slane %v884_v42, 7  ;;  %v540_v50 = vadd.f32 %v6725_v47, %v539_v43 }
 0x137   : > { %v1432_v63 = vrot.slane %v1430_v46, 5  ;;  %v3142_v46 = vld [vmem:[#allocation6 + $0x8] sm:$0x3] }
 0x138   : > { %v1427_v54 = vor.u32 %v1426_v45, %v1422_v44  ;;  %v889_v56 = vor.u32 %v887_v49, %v886_v48  ;;  %v891_v58 = vrot.slane %v886_v48, 4  ;;  %v595_v59 = vmax.f32 %v540_v50, 0.0  ;;  %5912 = vmatmul.msk.bf16.gmra.mxu0 %vm1676_vm8, %v6159_v51  ;;  %v6935_v50 = vld [vmem:[%s8928_s2] ss:$0 sm:$0xff] }
 0x139   : > { %v1423_v60 = vsel %vm6713_vm11, %v1418_v53, %v1422_v44  ;;  %v3240_v53 = vsel %vm1725_vm6, %v3142_v46, 0 }
 0x13a   : > { %v1428_v61 = vrot.slane %v1427_v54, 4  ;;  %v890_v1 = vsel %vm6763_vm5, %v882_v55, %v889_v56  ;;  %v1132_v3 = vsel %vm6680_vm3, %v891_v58, %v1131_v52  ;;  %v738_v4 = vpack.c.bf16 %v595_v59, %v595_v59  ;;  %v1206_v6 = vld [vmem:[#allocation2 + $0x60] sm:$0xf]  ;;  %v6160_v52 = vld [vmem:[#allocation2 + $0x48] sm:$0xff]  ;;  %v1138_v54 = vld [vmem:[#allocation2 + $0x74] sm:$0x1]  ;;  %3249 = vmatpush.bf16.msrb.mxu1 %v3240_v53 }
 0x13b   : > { %1130 = vst.msk [vmem:[#allocation2 + $0x64] sm:$0xf] %vm611_vm4, %v890_v1  ;;  %v1435_v12 = vshrl.u32 %v1206_v6, 16  ;;  %v1438_v13 = vshll.u32 %v1206_v6, 16  ;;  %v1642_v17 = vunpack.c.l.b16 %v1423_v60  ;;  %v2709_v6 = vld [vmem:[#allocation2 + $0xc] sm:$0xf] }
 0x13c   : > { %v1433_v9 = vsel %vm6713_vm11, %v1428_v61, %v1432_v63  ;;  %1133 = vst [vmem:[#allocation2 + $0x68] sm:$0x1] %v1132_v3  ;;  %v893_v16 = vshrl.u32 %v738_v4, 16  ;;  %v896_v24 = vshll.u32 %v738_v4, 16  ;;  %v559_v63 = vpop.f32.mrf.mxu3  ;;  %v657_v4 = vld [vmem:[#allocation2 + $0x90] sm:$0x1] }
 0x13d   : > { %v1643_v18 = vunpack.c.l.b16 %v1433_v9  ;;  %v541_v22 = vpop.f32.mrf.mxu0  ;;  %v1437_v28 = vrot.slane %v1435_v12, 4  ;;  %v1440_v29 = vrot.slane %v1438_v13, 5  ;;  %v658_v12 = vsel %vm6680_vm3, 0, %v657_v4  ;;  %v6948_v13 = vld [vmem:[#allocation2 + $0x10] sm:$0xf] }
 0x13e   : > { %v895_v23 = vrot.slane %v893_v16, 7  ;;  %v542_v25 = vadd.f32 %v6725_v47, %v541_v22  ;;  %659 = vst [vmem:[#allocation2 + $0x90] sm:$0x1] %v658_v12  ;;  %v2761_v31 = vshll.u32 %v2709_v6, 16 }
 0x13f   : > { %v1667_v26 = vpack.c.b16 %v1643_v18, %v1642_v17  ;;  %v1441_v37 = vor.u32 %v1440_v29, %v1437_v28  ;;  %v6955_v28 = vpop.f32.mrf.mxu2 }
 0x140   : > { %v898_v15 = vor.u32 %v896_v24, %v895_v23  ;;  %v596_v30 = vmax.f32 %v542_v25, 0.0  ;;  %v899_v58 = vrot.slane %v895_v23, 4  ;;  %v6953_v25 = vld [vmem:[#allocation2 + $0xc] sm:$0xe]  ;;  %8958 = vst [vmem:[#allocation12_spill] sm:$0xff] %v6955_v28 }
 0x141   : > { %5723 = vmatmul.msk.bf16.gmra.mxu1 %vm1676_vm8, %v1667_v26  ;;  %v1442_v55 = vrot.slane %v1441_v37, 4  ;;  %v2758_v26 = vshrl.u32 %v2709_v6, 16 }
 0x142   : > { %v1135_v32 = vsel %vm6738_vm14, %v898_v15, %v1134_v27  ;;  %v739_v33 = vpack.c.bf16 %v596_v30, %v596_v30  ;;  %v6147_v34 = vld [vmem:[#allocation2 + $0x60] sm:$0xff]  ;;  %v3429_v30 = vrot.slane %v6948_v13, 5 }
 0x143   : > { %v1207_v35 = vld [vmem:[#allocation2 + $0x64] sm:$0xf]  ;;  %1136 = vst [vmem:[#allocation2 + $0x6c] sm:$0xf] %v1135_v32  ;;  %v1231_v47 = vld [vmem:[#allocation2 + $0x68] sm:$0x1]  ;;  %5804 = vmatmul.msk.bf16.gmra.mxu2 %vm1676_vm8, %v6147_v34 }
 0x144   : > { %v1444_v38 = vshll.u32 %v1207_v35, 16  ;;  %v1448_v40 = vshrl.u32 %v1207_v35, 16  ;;  %v901_v41 = vshrl.u32 %v739_v33, 16  ;;  %v1454_v42 = vshll.u32 %v1231_v47, 16 }
 0x145   : > { %v544_v43 = vpop.f32.mrf.mxu0  ;;  %v904_v49 = vshll.u32 %v739_v33, 16  ;;  %v5940_v47 = vrot.slane %v6953_v25, 9  ;;  %v6970_v46 = vrot.slane %v3429_v30, 4 }
 0x146   : > { %v1446_v44 = vrot.slane %v1444_v38, 5  ;;  %v1450_v45 = vrot.slane %v1448_v40, 4  ;;  %v903_v48 = vrot.slane %v901_v41, 7  ;;  %v545_v51 = vadd.f32 %v6935_v50, %v544_v43  ;;  %v561_v41 = vpop.f32.mrf.mxu3 }
 0x147   : > { %v1456_v3 = vrot.slane %v1454_v42, 5  ;;  %v6964_v42 = vrot.slane %v2758_v26, 4  ;;  %v560_v43 = vadd.f32 %v6935_v50, %v559_v63 }
 0x148   : > { %v1451_v56 = vor.u32 %v1450_v45, %v1446_v44  ;;  %v906_v59 = vor.u32 %v904_v49, %v903_v48  ;;  %v908_v60 = vrot.slane %v903_v48, 4  ;;  %v597_v61 = vmax.f32 %v545_v51, 0.0  ;;  %5913 = vmatmul.msk.bf16.gmra.mxu0 %vm1676_vm8, %v6160_v52 }
 0x149   : > { %v1447_v0 = vsel %vm6713_vm11, %v1442_v55, %v1446_v44  ;;  %v707_v44 = vld [vmem:[#allocation2 + $0x98] sm:$0x1]  ;;  %v562_v45 = vadd.f32 %v6935_v50, %v561_v41  ;;  %v6972_v48 = vrot.slane %v2761_v31, 5 }
 0x14a   : > { %v1452_v1 = vrot.slane %v1451_v56, 4  ;;  %v907_v7 = vsel %vm6763_vm5, %v899_v58, %v906_v59  ;;  %v1139_v9 = vsel %vm6680_vm3, %v908_v60, %v1138_v54  ;;  %v740_v10 = vpack.c.bf16 %v597_v61, %v597_v61  ;;  %v1208_v11 = vld [vmem:[#allocation2 + $0x6c] sm:$0xf]  ;;  %v6979_v56 = vpop.f32.mrf.mxu1 }
 0x14b   : > { %1137 = vst.msk [vmem:[#allocation2 + $0x70] sm:$0xf] %vm611_vm4, %v907_v7  ;;  %v1459_v17 = vshrl.u32 %v1208_v11, 16  ;;  %v1462_v18 = vshll.u32 %v1208_v11, 16  ;;  %v1644_v23 = vunpack.c.l.b16 %v1447_v0  ;;  %v708_v55 = vsel %vm6692_vm7, 0, %v707_v44 }
 0x14c   : > { %v1457_v16 = vsel %vm6713_vm11, %v1452_v1, %v1456_v3  ;;  %1140 = vst [vmem:[#allocation2 + $0x74] sm:$0x1] %v1139_v9  ;;  %v910_v22 = vshrl.u32 %v740_v10, 16  ;;  %v913_v33 = vshll.u32 %v740_v10, 16  ;;  %v603_v7 = vmax.f32 %v560_v43, 0.0 }
 0x14d   : > { %v1645_v24 = vunpack.c.l.b16 %v1457_v16  ;;  %v546_v27 = vpop.f32.mrf.mxu0  ;;  %v1461_v29 = vrot.slane %v1459_v17, 4  ;;  %v1464_v15 = vrot.slane %v1462_v18, 5  ;;  %8959 = vst [vmem:[#allocation13_spill] sm:$0xff] %v6979_v56  ;;  %v660_v9 = vld [vmem:[#allocation2 + $0x9c] sm:$0x1]  ;;  %v604_v10 = vmax.f32 %v562_v45, 0.0 }
 0x14e   : > { %v6958_v32 = vrot.slane %v910_v22, 7  ;;  %v547_v34 = vadd.f32 %v6935_v50, %v546_v27  ;;  %v6161_v16 = vld [vmem:[#allocation2 + $0x54] sm:$0xff]  ;;  %v661_v18 = vsel %vm6680_vm3, 0, %v660_v9  ;;  %709 = vst [vmem:[#allocation2 + $0x98] sm:$0x1] %v708_v55  ;;  %v746_v27 = vpack.c.bf16 %v603_v7, %v603_v7 }
 0x14f   : > { %v1668_v35 = vpack.c.b16 %v1645_v24, %v1644_v23  ;;  %v1465_v40 = vor.u32 %v1464_v15, %v1461_v29  ;;  %v1145_v22 = vld [vmem:[#allocation2 + $0x80] sm:$0x1]  ;;  %662 = vst [vmem:[#allocation2 + $0x9c] sm:$0x1] %v661_v18  ;;  %v710_v29 = vld [vmem:[#allocation2 + $0xa4] sm:$0x1]  ;;  %v747_v15 = vpack.c.bf16 %v604_v10, %v604_v10 }
 0x150   : > { %v915_v37 = vor.u32 %v913_v33, %v6958_v32  ;;  %v598_v38 = vmax.f32 %v547_v34, 0.0  ;;  %v916_v49 = vrot.slane %v6958_v32, 4 }
 0x151   : > { %5724 = vmatmul.msk.bf16.gmra.mxu1 %vm1676_vm8, %v1668_v35  ;;  %v1466_v0 = vrot.slane %v1465_v40, 4  ;;  %v969_v44 = vshrl.u32 %v747_v15, 16 }
 0x152   : > { %v1142_v51 = vsel %vm6738_vm14, %v915_v37, %v1141_v36  ;;  %v741_v52 = vpack.c.bf16 %v598_v38, %v598_v38  ;;  %v6148_v53 = vld [vmem:[#allocation2 + $0x6c] sm:$0xff]  ;;  %v961_v36 = vshrl.u32 %v746_v27, 16  ;;  %v964_v37 = vshll.u32 %v746_v27, 16 }
 0x153   : > { %v1209_v54 = vld [vmem:[#allocation2 + $0x70] sm:$0xf]  ;;  %1143 = vst [vmem:[#allocation2 + $0x78] sm:$0xf] %v1142_v51  ;;  %v1232_v58 = vld [vmem:[#allocation2 + $0x74] sm:$0x1]  ;;  %5805 = vmatmul.msk.bf16.gmra.mxu2 %vm1676_vm8, %v6148_v53  ;;  %v564_v51 = vpop.f32.mrf.mxu3 }
 0x154   : > { %v1468_v59 = vshll.u32 %v1209_v54, 16  ;;  %v1472_v60 = vshrl.u32 %v1209_v54, 16  ;;  %v918_v61 = vshrl.u32 %v741_v52, 16  ;;  %v921_v63 = vshll.u32 %v741_v52, 16 }
 0x155   : > { %v1478_v1 = vshll.u32 %v1232_v58, 16  ;;  %v549_v3 = vpop.f32.mrf.mxu0  ;;  %v711_v38 = vsel %vm6692_vm7, 0, %v710_v29  ;;  %v963_v53 = vrot.slane %v961_v36, 7  ;;  %v972_v54 = vshll.u32 %v747_v15, 16  ;;  %v713_v15 = vld [vmem:[#allocation2 + $0xb0] sm:$0x1] }
 0x156   : > { %v1470_v4 = vrot.slane %v1468_v59, 5  ;;  %v1474_v6 = vrot.slane %v1472_v60, 4  ;;  %v920_v11 = vrot.slane %v918_v61, 7  ;;  %v550_v12 = vadd.f32 %v6935_v50, %v549_v3  ;;  %v1963_v23 = vpop.f32.mrf.mxu2  ;;  %712 = vst [vmem:[#allocation2 + $0xa4] sm:$0x1] %v711_v38 }
 0x157   : > { %v1480_v17 = vrot.slane %v1478_v1, 5  ;;  %v971_v60 = vrot.slane %v969_v44, 7  ;;  %v967_v1 = vrot.slane %v963_v53, 4 }
 0x158   : > { %v1471_v24 = vsel %vm6713_vm11, %v1466_v0, %v1470_v4  ;;  %v1475_v26 = vor.u32 %v1474_v6, %v1470_v4  ;;  %v923_v31 = vor.u32 %v921_v63, %v920_v11  ;;  %v925_v32 = vrot.slane %v920_v11, 4  ;;  %5914 = vmatmul.msk.bf16.gmra.mxu0 %vm1676_vm8, %v6161_v16  ;;  %v1162_v11 = vld [vmem:[#allocation2 + $0x9c] sm:$0xf]  ;;  %v1148_v16 = vld [vmem:[#allocation2 + $0x84] sm:$0xf] }
 0x159   : > { %v599_v33 = vmax.f32 %v550_v12, 0.0  ;;  %v1646_v34 = vunpack.c.l.b16 %v1471_v24  ;;  %v966_v0 = vor.u32 %v964_v37, %v963_v53  ;;  %v663_v12 = vld [vmem:[#allocation2 + $0xa8] sm:$0x1]  ;;  %v976_v24 = vrot.slane %v971_v60, 4 }
 0x15a   : > { %v1476_v35 = vrot.slane %v1475_v26, 4  ;;  %v924_v40 = vsel %vm6763_vm5, %v916_v49, %v923_v31  ;;  %v1146_v41 = vsel %vm6680_vm3, %v925_v32, %v1145_v22  ;;  %v1210_v45 = vld [vmem:[#allocation2 + $0x78] sm:$0xf]  ;;  %v974_v22 = vor.u32 %v972_v54, %v971_v60 }
 0x15b   : > { %v742_v43 = vpack.c.bf16 %v599_v33, %v599_v33  ;;  %1144 = vst.msk [vmem:[#allocation2 + $0x7c] sm:$0xf] %vm611_vm4, %v924_v40  ;;  %v1483_v55 = vshrl.u32 %v1210_v45, 16  ;;  %v1486_v4 = vshll.u32 %v1210_v45, 16  ;;  %v1163_v18 = vsel %vm6738_vm14, %v966_v0, %v1162_v11  ;;  %v566_v45 = vpop.f32.mrf.mxu3 }
 0x15c   : > { %v1481_v52 = vsel %vm6713_vm11, %v1476_v35, %v1480_v17  ;;  %1147 = vst [vmem:[#allocation2 + $0x80] sm:$0x1] %v1146_v41  ;;  %v2767_v31 = vshll.u32 %v6948_v13, 16  ;;  %v975_v33 = vsel %vm6763_vm5, %v967_v1, %v974_v22  ;;  %v664_v36 = vsel %vm6680_vm3, 0, %v663_v12  ;;  %v6162_v1 = vld [vmem:[#allocation2 + $0x60] sm:$0xff] }
 0x15d   : > { %v927_v58 = vshrl.u32 %v742_v43, 16  ;;  %v930_v59 = vshll.u32 %v742_v43, 16  ;;  %v1647_v49 = vunpack.c.l.b16 %v1481_v52  ;;  %v551_v61 = vpop.f32.mrf.mxu0  ;;  %v1485_v3 = vrot.slane %v1483_v55, 4  ;;  %1164 = vst [vmem:[#allocation2 + $0x9c] sm:$0xf] %v1163_v18 }
 0x15e   : > { %v1743_v63 = vpop.f32.mrf.mxu1  ;;  %v552_v7 = vadd.f32 %v6935_v50, %v551_v61  ;;  %v1965_v17 = vpop.f32.mrf.mxu2  ;;  %v1488_v26 = vrot.slane %v1486_v4, 5  ;;  %1165 = vst.msk [vmem:[#allocation2 + $0xa0] sm:$0xf] %vm611_vm4, %v975_v33  ;;  %v567_v53 = vadd.f32 %v6935_v50, %v566_v45  ;;  %v714_v54 = vsel %vm6692_vm7, 0, %v713_v15  ;;  %v1152_v18 = vld [vmem:[#allocation2 + $0x8c] sm:$0x1] }
 0x15f   : > { %v6997_v6 = vrot.slane %v927_v58, 7  ;;  %v7000_v9 = vadd.f32 %v1963_v23, %v1743_v63  ;;  %v1669_v10 = vpack.c.b16 %v1647_v49, %v1646_v34  ;;  %v565_v23 = vadd.f32 %v6935_v50, %v564_v51  ;;  %v1166_v34 = vld [vmem:[#allocation2 + $0xa4] sm:$0x1]  ;;  %665 = vst [vmem:[#allocation2 + $0xa8] sm:$0x1] %v664_v36 }
 0x160   : > { %v600_v29 = vmax.f32 %v552_v7, 0.0  ;;  %v1489_v35 = vor.u32 %v1488_v26, %v1485_v3  ;;  %v1167_v41 = vsel %vm6680_vm3, %v976_v24, %v1166_v34  ;;  %v2764_v55 = vor.u32 %v6972_v48, %v6964_v42  ;;  %715 = vst [vmem:[#allocation2 + $0xb0] sm:$0x1] %v714_v54 }
 0x161   : > { %v932_v27 = vor.u32 %v930_v59, %v6997_v6  ;;  %5725 = vmatmul.msk.bf16.gmra.mxu1 %vm1676_vm8, %v1669_v10  ;;  %v933_v32 = vrot.slane %v6997_v6, 4  ;;  %v605_v44 = vmax.f32 %v565_v23, 0.0  ;;  %1168 = vst [vmem:[#allocation2 + $0xa4] sm:$0x1] %v1167_v41  ;;  %v606_v6 = vmax.f32 %v567_v53, 0.0 }
 0x162   : > { %v743_v38 = vpack.c.bf16 %v600_v29, %v600_v29  ;;  %v6149_v40 = vld [vmem:[#allocation2 + $0x78] sm:$0xff]  ;;  %v1490_v59 = vrot.slane %v1489_v35, 4 }
 0x163   : > { %v1149_v37 = vsel %vm6738_vm14, %v932_v27, %v1148_v16  ;;  %v1211_v43 = vld [vmem:[#allocation2 + $0x7c] sm:$0xf]  ;;  %v1233_v51 = vld [vmem:[#allocation2 + $0x80] sm:$0x1]  ;;  %5806 = vmatmul.msk.bf16.gmra.mxu2 %vm1676_vm8, %v6149_v40  ;;  %v748_v4 = vpack.c.bf16 %v605_v44, %v605_v44  ;;  %v3540_v16 = vld [vmem:[#allocation6 + $0xa] sm:$0x3]  ;;  %v749_v36 = vpack.c.bf16 %v606_v6, %v606_v6  ;;  %v569_v45 = vpop.f32.mrf.mxu3 }
 0x164   : > { %1150 = vst [vmem:[#allocation2 + $0x84] sm:$0xf] %v1149_v37  ;;  %v1492_v52 = vshll.u32 %v1211_v43, 16  ;;  %v935_v58 = vshrl.u32 %v743_v38, 16  ;;  %v1496_v49 = vshrl.u32 %v1211_v43, 16  ;;  %v1502_v60 = vshll.u32 %v1233_v51, 16 }
 0x165   : > { %v938_v61 = vshll.u32 %v743_v38, 16  ;;  %v554_v63 = vpop.f32.mrf.mxu0  ;;  %v978_v27 = vshrl.u32 %v748_v4, 16  ;;  %v981_v29 = vshll.u32 %v748_v4, 16  ;;  %v3638_v37 = vsel %vm1725_vm6, %v3540_v16, 0  ;;  %v666_v6 = vld [vmem:[#allocation2 + $0xb4] sm:$0x1] }
 0x166   : > { %v1745_v0 = vpop.f32.mrf.mxu1  ;;  %v1494_v3 = vrot.slane %v1492_v52, 5  ;;  %v937_v7 = vrot.slane %v935_v58, 7  ;;  %v555_v10 = vadd.f32 %v6935_v50, %v554_v63  ;;  %v1498_v12 = vrot.slane %v1496_v49, 4  ;;  %v1968_v22 = vpop.f32.mrf.mxu2  ;;  %3647 = vmatpush.bf16.msrb.mxu2 %v3638_v37  ;;  %v1169_v49 = vld [vmem:[#allocation2 + $0xa8] sm:$0xf] }
 0x167   : > { %v7025_v11 = vadd.f32 %v1965_v17, %v1745_v0  ;;  %v1504_v26 = vrot.slane %v1502_v60, 5  ;;  %v980_v17 = vrot.slane %v978_v27, 7  ;;  %v986_v53 = vshrl.u32 %v749_v36, 16  ;;  %v1173_v16 = vld [vmem:[#allocation2 + $0xb0] sm:$0x1] }
 0x168   : > { %v1495_v24 = vsel %vm6713_vm11, %v1490_v59, %v1494_v3  ;;  %v940_v23 = vor.u32 %v938_v61, %v937_v7  ;;  %v942_v15 = vrot.slane %v937_v7, 4  ;;  %v601_v33 = vmax.f32 %v555_v10, 0.0  ;;  %5915 = vmatmul.msk.bf16.gmra.mxu0 %vm1676_vm8, %v6162_v1  ;;  %v1217_v48 = vld [vmem:[#allocation2 + $0xa0] sm:$0xf] }
 0x169   : > { %v1499_v34 = vor.u32 %v1498_v12, %v1494_v3  ;;  %v1648_v35 = vunpack.c.l.b16 %v1495_v24  ;;  %v983_v51 = vor.u32 %v981_v29, %v980_v17  ;;  %v984_v52 = vrot.slane %v980_v17, 4  ;;  %v1155_v24 = vld [vmem:[#allocation2 + $0x90] sm:$0xf] }
 0x16a   : > { %v941_v38 = vsel %vm6763_vm5, %v933_v32, %v940_v23  ;;  %v1153_v40 = vsel %vm6680_vm3, %v942_v15, %v1152_v18  ;;  %v744_v41 = vpack.c.bf16 %v601_v33, %v601_v33  ;;  %v989_v54 = vshll.u32 %v749_v36, 16  ;;  %v716_v33 = vld [vmem:[#allocation2 + $0xbc] sm:$0x1] }
 0x16b   : > { %v1500_v43 = vrot.slane %v1499_v34, 4  ;;  %v1212_v44 = vld [vmem:[#allocation2 + $0x84] sm:$0xf]  ;;  %1151 = vst.msk [vmem:[#allocation2 + $0x88] sm:$0xf] %vm611_vm4, %v941_v38  ;;  %v570_v60 = vadd.f32 %v6935_v50, %v569_v45  ;;  %v1170_v1 = vsel %vm6738_vm14, %v983_v51, %v1169_v49  ;;  %v988_v3 = vrot.slane %v986_v53, 7 }
 0x16c   : > { %1154 = vst [vmem:[#allocation2 + $0x8c] sm:$0x1] %v1153_v40  ;;  %v944_v58 = vshrl.u32 %v744_v41, 16  ;;  %v947_v59 = vshll.u32 %v744_v41, 16  ;;  %v1507_v4 = vshrl.u32 %v1212_v44, 16  ;;  %v1510_v18 = vshll.u32 %v1212_v44, 16 }
 0x16d   : > { %v1505_v32 = vsel %vm6713_vm11, %v1500_v43, %v1504_v26  ;;  %v556_v61 = vpop.f32.mrf.mxu0  ;;  %1171 = vst [vmem:[#allocation2 + $0xa8] sm:$0xf] %v1170_v1  ;;  %v991_v29 = vor.u32 %v989_v54, %v988_v3  ;;  %v993_v23 = vrot.slane %v988_v3, 4  ;;  %v2771_v37 = vshrl.u32 %v6948_v13, 16  ;;  %v571_v54 = vpop.f32.mrf.mxu3 }
 0x16e   : > { %v1748_v63 = vpop.f32.mrf.mxu1  ;;  %v1649_v0 = vunpack.c.l.b16 %v1505_v32  ;;  %v7041_v7 = vrot.slane %v944_v58, 7  ;;  %v557_v10 = vadd.f32 %v6935_v50, %v556_v61  ;;  %v1970_v27 = vpop.f32.mrf.mxu2  ;;  %v1509_v15 = vrot.slane %v1507_v4, 4 }
 0x16f   : > { %v7044_v12 = vadd.f32 %v1968_v22, %v1748_v63  ;;  %v1512_v36 = vrot.slane %v1510_v18, 5  ;;  %v992_v22 = vsel %vm6763_vm5, %v984_v52, %v991_v29  ;;  %v1174_v38 = vsel %vm6680_vm3, %v993_v23, %v1173_v16  ;;  %v6163_v29 = vld [vmem:[#allocation2 + $0x6c] sm:$0xff] }
 0x170   : > { %v1670_v26 = vpack.c.b16 %v1649_v0, %v1648_v35  ;;  %v949_v34 = vor.u32 %v947_v59, %v7041_v7  ;;  %v602_v17 = vmax.f32 %v557_v10, 0.0  ;;  %v7053_v35 = vld [vmem:[#allocation2 + $0x14] sm:$0x1]  ;;  %v607_v40 = vmax.f32 %v570_v60, 0.0  ;;  %1172 = vst.msk [vmem:[#allocation2 + $0xac] sm:$0xf] %vm611_vm4, %v992_v22 }
 0x171   : > { %v667_v41 = vsel %vm6680_vm3, 0, %v666_v6  ;;  %v1513_v53 = vor.u32 %v1512_v36, %v1509_v15  ;;  %v717_v52 = vsel %vm6692_vm7, 0, %v716_v33  ;;  %v572_v60 = vadd.f32 %v6935_v50, %v571_v54  ;;  %1175 = vst [vmem:[#allocation2 + $0xb0] sm:$0x1] %v1174_v38  ;;  %v1159_v15 = vld [vmem:[#allocation2 + $0x98] sm:$0x1] }
 0x172   : > { %5726 = vmatmul.msk.bf16.gmra.mxu1 %vm1676_vm8, %v1670_v26  ;;  %v1156_v43 = vsel %vm6738_vm14, %v949_v34, %v1155_v24  ;;  %v745_v44 = vpack.c.bf16 %v602_v17, %v602_v17  ;;  %v6150_v45 = vld [vmem:[#allocation2 + $0x84] sm:$0xff]  ;;  %v750_v49 = vpack.c.bf16 %v607_v40, %v607_v40  ;;  %v3432_v0 = vrot.slane %v7053_v35, 5  ;;  %668 = vst [vmem:[#allocation2 + $0xb4] sm:$0x1] %v667_v41 }
 0x173   : > { %v1213_v51 = vld [vmem:[#allocation2 + $0x88] sm:$0xf]  ;;  %1157 = vst [vmem:[#allocation2 + $0x90] sm:$0xf] %v1156_v43  ;;  %v1234_v58 = vld [vmem:[#allocation2 + $0x8c] sm:$0x1]  ;;  %5807 = vmatmul.msk.bf16.gmra.mxu2 %vm1676_vm8, %v6150_v45 }
 0x174   : > { %v1516_v59 = vshll.u32 %v1213_v51, 16  ;;  %v1520_v32 = vshrl.u32 %v1213_v51, 16  ;;  %v952_v61 = vshrl.u32 %v745_v44, 16  ;;  %v1526_v63 = vshll.u32 %v1234_v58, 16  ;;  %718 = vst [vmem:[#allocation2 + $0xbc] sm:$0x1] %v717_v52 }
 0x175   : > { %v7067_v1 = vrot.slane %v2767_v31, 5  ;;  %v7069_v4 = vpop.f32.mrf.mxu0  ;;  %v995_v16 = vshrl.u32 %v750_v49, 16  ;;  %v2773_v18 = vrot.slane %v2771_v37, 4  ;;  %v955_v24 = vshll.u32 %v745_v44, 16 }
 0x176   : > { %v1750_v3 = vpop.f32.mrf.mxu1  ;;  %8960 = vst [vmem:[#allocation14_spill] sm:$0xff] %v7069_v4  ;;  %v1518_v6 = vrot.slane %v1516_v59, 5  ;;  %v1522_v10 = vrot.slane %v1520_v32, 4  ;;  %v954_v50 = vrot.slane %v952_v61, 7  ;;  %v998_v23 = vshll.u32 %v750_v49, 16  ;;  %v1973_v33 = vpop.f32.mrf.mxu2 }
 0x177   : > { %v7071_v26 = vadd.f32 %v1970_v27, %v1750_v3  ;;  %v1514_v34 = vrot.slane %v1513_v53, 4  ;;  %v997_v17 = vrot.slane %v995_v16, 7  ;;  %v608_v36 = vmax.f32 %v572_v60, 0.0 }
 0x178   : > { %v1523_v31 = vor.u32 %v1522_v10, %v1518_v6  ;;  %v950_v22 = vrot.slane %v7041_v7, 4  ;;  %v957_v38 = vor.u32 %v955_v24, %v954_v50  ;;  %v959_v40 = vrot.slane %v954_v50, 4  ;;  %5916 = vmatmul.msk.bf16.gmra.mxu0 %vm1676_vm8, %v6163_v29  ;;  %v7099_v50 = vld [vmem:[#allocation2 + $0x18] sm:$0xe] }
 0x179   : > { %v1528_v37 = vrot.slane %v1526_v63, 5  ;;  %v1519_v27 = vsel %vm6713_vm11, %v1514_v34, %v1518_v6  ;;  %v1000_v43 = vor.u32 %v998_v23, %v997_v17  ;;  %v751_v44 = vpack.c.bf16 %v608_v36, %v608_v36  ;;  %v1176_v61 = vld [vmem:[#allocation2 + $0xb4] sm:$0xf] }
 0x17a   : > { %v1524_v41 = vrot.slane %v1523_v31, 4  ;;  %v958_v45 = vsel %vm6763_vm5, %v950_v22, %v957_v38  ;;  %v1160_v51 = vsel %vm6680_vm3, %v959_v40, %v1159_v15  ;;  %v3433_v7 = vsel %vm6745_vm15, %v6970_v46, %v3432_v0  ;;  %v1214_v53 = vld [vmem:[#allocation2 + $0x90] sm:$0xf]  ;;  %v7103_v15 = vld [vmem:[#allocation2 + $0x1c] sm:$0xf] }
 0x17b   : > { %v2777_v54 = vshll.u32 %v7053_v35, 16  ;;  %1158 = vst.msk [vmem:[#allocation2 + $0x94] sm:$0xf] %vm611_vm4, %v958_v45  ;;  %v1003_v58 = vshrl.u32 %v751_v44, 16  ;;  %v1006_v59 = vshll.u32 %v751_v44, 16  ;;  %v1531_v32 = vshrl.u32 %v1214_v53, 16 }
 0x17c   : > { %v1529_v52 = vsel %vm6713_vm11, %v1524_v41, %v1528_v37  ;;  %1161 = vst [vmem:[#allocation2 + $0x98] sm:$0x1] %v1160_v51  ;;  %v1650_v49 = vunpack.c.l.b16 %v1519_v27  ;;  %v1534_v63 = vshll.u32 %v1214_v53, 16  ;;  %v2774_v3 = vor.u32 %v2773_v18, %v7067_v1  ;;  %v1180_v23 = vld [vmem:[#allocation2 + $0xbc] sm:$0x1] }
 0x17d   : > { %v1651_v60 = vunpack.c.l.b16 %v1529_v52  ;;  %v7089_v46 = vpop.f32.mrf.mxu0  ;;  %v3430_v35 = vsel %vm6745_vm15, %v5940_v47, %v3429_v30  ;;  %v1001_v0 = vrot.slane %v997_v17, 4  ;;  %v1177_v10 = vsel %vm6738_vm14, %v1000_v43, %v1176_v61  ;;  %v1216_v27 = vld [vmem:[#allocation2 + $0x9c] sm:$0xf]  ;;  %v7121_v53 = vld [vmem:[#allocation2 + $0x20] sm:$0x1] }
 0x17e   : > { %v1753_v6 = vpop.f32.mrf.mxu1  ;;  %8961 = vst [vmem:[#allocation15_spill] sm:$0xff] %v7089_v46  ;;  %v1005_v16 = vrot.slane %v1003_v58, 7  ;;  %v3542_v29 = vunpack.c.l.b16 %v3433_v7  ;;  %v1975_v13 = vpop.f32.mrf.mxu2  ;;  %v1533_v31 = vrot.slane %v1531_v32, 4  ;;  %v1536_v30 = vrot.slane %v1534_v63, 5  ;;  %v3370_v46 = vld [vmem:[#allocation2 + $0x60] sm:$0xe] }
 0x17f   : > { %v7101_v24 = vadd.f32 %v1973_v33, %v1753_v6  ;;  %v1671_v18 = vpack.c.b16 %v1651_v60, %v1650_v49  ;;  %1178 = vst [vmem:[#allocation2 + $0xb4] sm:$0xf] %v1177_v10  ;;  %v3541_v47 = vunpack.c.l.b16 %v3430_v35  ;;  %v7108_v17 = vrot.slane %v2764_v55, 4  ;;  %v2712_v55 = vld [vmem:[#allocation2 + $0x18] sm:$0xf] }
 0x180   : > { %v1008_v25 = vor.u32 %v1006_v59, %v1005_v16  ;;  %v1010_v34 = vrot.slane %v1005_v16, 4  ;;  %v2775_v36 = vrot.slane %v2774_v3, 4  ;;  %v2779_v33 = vrot.slane %v2777_v54, 5  ;;  %v6164_v6 = vld [vmem:[#allocation2 + $0x78] sm:$0xff] }
 0x181   : > { %v5941_v40 = vrot.slane %v7099_v50, 9  ;;  %v3436_v37 = vrot.slane %v7103_v15, 5  ;;  %v3573_v41 = vpack.c.b16 %v3542_v29, %v3541_v47  ;;  %v1537_v44 = vor.u32 %v1536_v30, %v1533_v31 }
 0x182   : > { %5727 = vmatmul.msk.bf16.gmra.mxu1 %vm1676_vm8, %v1671_v18  ;;  %v1009_v22 = vsel %vm6763_vm5, %v1001_v0, %v1008_v25  ;;  %v1181_v38 = vsel %vm6680_vm3, %v1010_v34, %v1180_v23  ;;  %v1215_v42 = vld [vmem:[#allocation2 + $0x94] sm:$0xf]  ;;  %v2780_v7 = vsel %vm6713_vm11, %v2775_v36, %v2779_v33  ;;  %v1555_v54 = vshrl.u32 %v1216_v27, 16 }
 0x183   : > { %1179 = vst.msk [vmem:[#allocation2 + $0xb8] sm:$0xf] %vm611_vm4, %v1009_v22  ;;  %v1235_v43 = vld [vmem:[#allocation2 + $0x98] sm:$0x1]  ;;  %v1540_v45 = vshll.u32 %v1215_v42, 16  ;;  %v1544_v51 = vshrl.u32 %v1215_v42, 16  ;;  %5956 = vmatmul.msk.bf16.vlgmr.msrb.gmra.mxu2 %vm1676_vm8, %v3573_v41  ;;  %v2770_v33 = vsel %vm6713_vm11, %v7108_v17, %v7067_v1  ;;  %v3144_v42 = vunpack.c.l.b16 %v2780_v7 }
 0x184   : > { %1182 = vst [vmem:[#allocation2 + $0xbc] sm:$0x1] %v1181_v38  ;;  %v2791_v52 = vshll.u32 %v7103_v15, 16  ;;  %v2795_v58 = vshrl.u32 %v7103_v15, 16  ;;  %v1550_v61 = vshll.u32 %v1235_v43, 16  ;;  %v1558_v63 = vshll.u32 %v1216_v27, 16 }
 0x185   : > { %v7125_v32 = vpop.f32.mrf.mxu0  ;;  %v1542_v49 = vrot.slane %v1540_v45, 5  ;;  %v1546_v60 = vrot.slane %v1544_v51, 4  ;;  %v3438_v35 = vrot.slane %v3436_v37, 4  ;;  %v1564_v0 = vshll.u32 %v1217_v48, 16 }
 0x186   : > { %v1755_v59 = vpop.f32.mrf.mxu1  ;;  %8962 = vst [vmem:[#allocation16_spill] sm:$0xff] %v7125_v32  ;;  %v1568_v10 = vshrl.u32 %v1217_v48, 16  ;;  %v1978_v16 = vpop.f32.mrf.mxu2  ;;  %v1538_v50 = vrot.slane %v1537_v44, 4  ;;  %v3439_v29 = vrot.slane %v7121_v53, 5  ;;  %v2782_v23 = vshrl.u32 %v2712_v55, 16 }
 0x187   : > { %v7127_v3 = vadd.f32 %v1975_v13, %v1755_v59  ;;  %v1547_v18 = vor.u32 %v1546_v60, %v1542_v49  ;;  %v1557_v15 = vrot.slane %v1555_v54, 4  ;;  %v2785_v25 = vshll.u32 %v2712_v55, 16  ;;  %v1236_v55 = vld [vmem:[#allocation2 + $0xa4] sm:$0x1]  ;;  %v7151_v60 = vld [vmem:[#allocation2 + $0x28] sm:$0xf] }
 0x188   : > { %5917 = vmatmul.msk.bf16.gmra.mxu0 %vm1676_vm8, %v6164_v6  ;;  %v7131_v34 = vrot.slane %v2791_v52, 5  ;;  %v2797_v31 = vrot.slane %v2795_v58, 4  ;;  %v1543_v13 = vsel %vm6713_vm11, %v1538_v50, %v1542_v49  ;;  %v1552_v47 = vrot.slane %v1550_v61, 5 }
 0x189   : > { %v1548_v30 = vrot.slane %v1547_v18, 4  ;;  %v1560_v36 = vrot.slane %v1558_v63, 5  ;;  %v3440_v22 = vsel %vm6745_vm15, %v3438_v35, %v3439_v29  ;;  %v7141_v38 = vrot.slane %v1564_v0, 5  ;;  %v2715_v18 = vld [vmem:[#allocation2 + $0x24] sm:$0xf] }
 0x18a   : > { %v1570_v27 = vrot.slane %v1568_v10, 4  ;;  %v3437_v48 = vsel %vm6745_vm15, %v5941_v40, %v3436_v37  ;;  %v2784_v43 = vrot.slane %v2782_v23, 4  ;;  %v1652_v44 = vunpack.c.l.b16 %v1543_v13 }
 0x18b   : > { %v1553_v41 = vsel %vm6713_vm11, %v1548_v30, %v1552_v47  ;;  %v2787_v51 = vrot.slane %v2785_v25, 5  ;;  %v2798_v1 = vor.u32 %v2797_v31, %v7131_v34  ;;  %v3143_v52 = vunpack.c.l.b16 %v2770_v33  ;;  %v7159_v25 = vld [vmem:[#allocation2 + $0x2c] sm:$0x1]  ;;  %v1218_v47 = vld [vmem:[#allocation2 + $0xa8] sm:$0xf] }
 0x18c   : > { %v1653_v45 = vunpack.c.l.b16 %v1553_v41  ;;  %v3544_v58 = vunpack.c.l.b16 %v3440_v22  ;;  %v1561_v59 = vor.u32 %v1560_v36, %v1557_v15  ;;  %v2801_v49 = vshll.u32 %v7121_v53, 16  ;;  %v1219_v36 = vld [vmem:[#allocation2 + $0xac] sm:$0xf] }
 0x18d   : > { %v7148_v54 = vpop.f32.mrf.mxu0  ;;  %v1571_v37 = vor.u32 %v1570_v27, %v7141_v38  ;;  %v1574_v61 = vshll.u32 %v1236_v55, 16  ;;  %v3175_v6 = vpack.c.b16 %v3144_v42, %v3143_v52  ;;  %v3543_v35 = vunpack.c.l.b16 %v3437_v48 }
 0x18e   : > { %v1758_v17 = vpop.f32.mrf.mxu1  ;;  %8963 = vst [vmem:[#allocation17_spill] sm:$0xff] %v7148_v54  ;;  %v1672_v40 = vpack.c.b16 %v1653_v45, %v1652_v44  ;;  %v1980_v63 = vpop.f32.mrf.mxu2  ;;  %v2788_v0 = vor.u32 %v2787_v51, %v2784_v43  ;;  %v2799_v10 = vrot.slane %v2798_v1, 4  ;;  %v3443_v50 = vrot.slane %v7151_v60, 5  ;;  %v6165_v43 = vld [vmem:[#allocation2 + $0x84] sm:$0xff] }
 0x18f   : > { %v7153_v7 = vadd.f32 %v1978_v16, %v1758_v17  ;;  %v3574_v53 = vpack.c.b16 %v3544_v58, %v3543_v35  ;;  %v1562_v29 = vrot.slane %v1561_v59, 4  ;;  %v1572_v16 = vrot.slane %v1571_v37, 4  ;;  %v3365_v51 = vld [vmem:[#allocation2 + $0x24] sm:$0xe] }
 0x190   : > { %5728 = vmatmul.msk.bf16.vlgmr.msrb.gmra.mxu3 %vm1676_vm8, %v1672_v40  ;;  %v1576_v23 = vrot.slane %v1574_v61, 5  ;;  %v2803_v15 = vrot.slane %v2801_v49, 5  ;;  %v2789_v31 = vrot.slane %v2788_v0, 4  ;;  %v3445_v30 = vrot.slane %v3443_v50, 4 }
 0x191   : > { %v3446_v27 = vrot.slane %v7159_v25, 5  ;;  %v2806_v41 = vshrl.u32 %v2715_v18, 16  ;;  %v2809_v42 = vshll.u32 %v2715_v18, 16  ;;  %v2815_v48 = vshll.u32 %v7151_v60, 16 }
 0x192   : > { %5924 = vmatmul.msk.bf16.vlgmr.msrb.gmra.mxu1 %vm1676_vm8, %v3175_v6  ;;  %v2804_v13 = vsel %vm6713_vm11, %v2799_v10, %v2803_v15  ;;  %v1567_v44 = vsel %vm6713_vm11, %v1562_v29, %v7141_v38  ;;  %v1577_v45 = vsel %vm6713_vm11, %v1572_v16, %v1576_v23  ;;  %v2819_v1 = vshrl.u32 %v7151_v60, 16  ;;  %v1237_v23 = vld [vmem:[#allocation2 + $0xb0] sm:$0x1] }
 0x193   : > { %5957 = vmatmul.msk.bf16.gmra.mxu2 %vm1676_vm8, %v3574_v53  ;;  %v1579_v52 = vshrl.u32 %v1218_v47, 16  ;;  %v1582_v58 = vshll.u32 %v1218_v47, 16  ;;  %v1588_v59 = vshll.u32 %v1219_v36, 16  ;;  %v1592_v49 = vshrl.u32 %v1219_v36, 16 }
 0x194   : > { %v2794_v40 = vsel %vm6713_vm11, %v2789_v31, %v7131_v34  ;;  %v3146_v37 = vunpack.c.l.b16 %v2804_v13  ;;  %v5942_v61 = vrot.slane %v3365_v51, 9  ;;  %v3447_v38 = vsel %vm6745_vm15, %v3445_v30, %v3446_v27 }
 0x195   : > { %v7164_v22 = vpop.f32.mrf.mxu0  ;;  %v2811_v6 = vrot.slane %v2809_v42, 5  ;;  %v1654_v35 = vunpack.c.l.b16 %v1567_v44  ;;  %v1655_v60 = vunpack.c.l.b16 %v1577_v45  ;;  %v7182_v0 = vrot.slane %v2815_v48, 5  ;;  %v2718_v42 = vld [vmem:[#allocation2 + $0x30] sm:$0xf] }
 0x196   : > { %v1760_v33 = vpop.f32.mrf.mxu1  ;;  %8964 = vst [vmem:[#allocation18_spill] sm:$0xff] %v7164_v22  ;;  %v1983_v17 = vpop.f32.mrf.mxu2  ;;  %v2821_v10 = vrot.slane %v2819_v1, 4  ;;  %v1581_v53 = vrot.slane %v1579_v52, 4  ;;  %v1584_v18 = vrot.slane %v1582_v58, 5  ;;  %v7184_v29 = vrot.slane %v1588_v59, 5 }
 0x197   : > { %v7168_v55 = vadd.f32 %v1980_v63, %v1760_v33  ;;  %v2808_v63 = vrot.slane %v2806_v41, 4  ;;  %v1594_v16 = vrot.slane %v1592_v49, 4  ;;  %v3145_v31 = vunpack.c.l.b16 %v2794_v40  ;;  %v2719_v41 = vld [vmem:[#allocation2 + $0x34] sm:$0xf]  ;;  %v3366_v52 = vld [vmem:[#allocation2 + $0x30] sm:$0xe] }
 0x198   : > { %5918 = vmatmul.msk.bf16.gmra.mxu0 %vm1676_vm8, %v6165_v43  ;;  %v3444_v13 = vsel %vm6745_vm15, %v5942_v61, %v3443_v50  ;;  %v3546_v30 = vunpack.c.l.b16 %v3447_v38  ;;  %v1673_v36 = vpack.c.b16 %v1655_v60, %v1654_v35  ;;  %v2822_v27 = vor.u32 %v2821_v10, %v7182_v0  ;;  %v1220_v58 = vld [vmem:[#allocation2 + $0xb4] sm:$0xf]  ;;  %v1221_v10 = vld [vmem:[#allocation2 + $0xb8] sm:$0xf] }
 0x199   : > { %v2812_v33 = vor.u32 %v2811_v6, %v2808_v63  ;;  %v3176_v43 = vpack.c.b16 %v3146_v37, %v3145_v31  ;;  %v1585_v44 = vor.u32 %v1584_v18, %v1581_v53  ;;  %v1595_v45 = vor.u32 %v1594_v16, %v7184_v29  ;;  %v2720_v37 = vld [vmem:[#allocation2 + $0x38] sm:$0x1] }
 0x19a   : > { %v1598_v51 = vshll.u32 %v1237_v23, 16  ;;  %v3545_v1 = vunpack.c.l.b16 %v3444_v13  ;;  %v2825_v50 = vshll.u32 %v7159_v25, 16  ;;  %v2830_v59 = vshrl.u32 %v2718_v42, 16 }
 0x19b   : > { %v2833_v49 = vshll.u32 %v2718_v42, 16  ;;  %v2813_v61 = vrot.slane %v2812_v33, 4  ;;  %v2823_v38 = vrot.slane %v2822_v27, 4  ;;  %v2839_v63 = vshll.u32 %v2719_v41, 16  ;;  %v6166_v42 = vld [vmem:[#allocation2 + $0x90] sm:$0xff] }
 0x19c   : > { %v3575_v40 = vpack.c.b16 %v3546_v30, %v3545_v1  ;;  %v1586_v6 = vrot.slane %v1585_v44, 4  ;;  %v1596_v35 = vrot.slane %v1595_v45, 4  ;;  %v1600_v60 = vrot.slane %v1598_v51, 5 }
 0x19d   : > { %v7186_v34 = vpop.f32.mrf.mxu0  ;;  %v2843_v53 = vshrl.u32 %v2719_v41, 16  ;;  %v2827_v25 = vrot.slane %v2825_v50, 5  ;;  %v5943_v18 = vrot.slane %v3366_v52, 9  ;;  %v1603_v16 = vshrl.u32 %v1220_v58, 16 }
 0x19e   : > { %v1763_v15 = vpop.f32.mrf.mxu1  ;;  %8965 = vst [vmem:[#allocation19_spill] sm:$0xff] %v7186_v34  ;;  %v1985_v48 = vpop.f32.mrf.mxu2  ;;  %v1606_v23 = vshll.u32 %v1220_v58, 16  ;;  %v3453_v30 = vrot.slane %v2720_v37, 5  ;;  %v2835_v33 = vrot.slane %v2833_v49, 5  ;;  %v1616_v44 = vshrl.u32 %v1221_v10, 16 }
 0x19f   : > { %v7190_v47 = vadd.f32 %v1983_v17, %v1763_v15  ;;  %v3450_v17 = vrot.slane %v2719_v41, 5  ;;  %v7202_v45 = vrot.slane %v2839_v63, 5  ;;  %v669_v41 = vld [vmem:[#allocation2 + $0xc0] sm:$0x1]  ;;  %v1591_v1 = vsel %vm6713_vm11, %v1586_v6, %v7184_v29 }
 0x1a0   : > { %5729 = vmatmul.msk.bf16.gmra.mxu3 %vm1676_vm8, %v1673_v36  ;;  %v2832_v36 = vrot.slane %v2830_v59, 4  ;;  %v1601_v50 = vsel %vm6713_vm11, %v1596_v35, %v1600_v60  ;;  %v2845_v52 = vrot.slane %v2843_v53, 4  ;;  %v670_v58 = vsel %vm6680_vm3, 0, %v669_v41  ;;  %v7221_v60 = vld [vmem:[#allocation2 + $0x3c] sm:$0xe] }
 0x1a1   : > { %8966 = vst [vmem:[#allocation20_spill] sm:$0xff] %v7190_v47  ;;  %v3452_v13 = vrot.slane %v3450_v17, 4  ;;  %v2828_v59 = vsel %vm6713_vm11, %v2823_v38, %v2827_v25  ;;  %v1605_v49 = vrot.slane %v1603_v16, 4  ;;  %v3451_v29 = vsel %vm6745_vm15, %v5943_v18, %v3450_v17  ;;  %v574_v38 = vpop.f32.mrf.mxu3  ;;  %v6338_v18 = vld [vmem:[%s8928_s2] ss:$0 sm:$0xff] }
 0x1a2   : > { %5925 = vmatmul.msk.bf16.gmra.mxu1 %vm1676_vm8, %v3176_v43  ;;  %v1612_v43 = vshll.u32 %v1221_v10, 16  ;;  %671 = vst [vmem:[#allocation2 + $0xc0] sm:$0x1] %v670_v58  ;;  %v2836_v6 = vor.u32 %v2835_v33, %v2832_v36  ;;  %v2849_v35 = vshll.u32 %v2720_v37, 16  ;;  %v1656_v10 = vunpack.c.l.b16 %v1591_v1  ;;  %v7246_v33 = vld [vmem:[#allocation2 + $0x20] sm:$0x1] }
 0x1a3   : > { %5958 = vmatmul.msk.bf16.gmra.mxu2 %vm1676_vm8, %v3575_v40  ;;  %v1608_v40 = vrot.slane %v1606_v23, 5  ;;  %v3454_v63 = vsel %vm6745_vm15, %v3452_v13, %v3453_v30  ;;  %v1657_v53 = vunpack.c.l.b16 %v1601_v50  ;;  %v3148_v16 = vunpack.c.l.b16 %v2828_v59  ;;  %v1238_v23 = vld [vmem:[#allocation2 + $0xbc] sm:$0x1]  ;;  %v7910_v47 = vld [vmem:[#allocation2 + $0x48] sm:$0xe] }
 0x1a4   : > { %v2846_v17 = vor.u32 %v2845_v52, %v7202_v45  ;;  %v575_v37 = vadd.f32 %v6338_v18, %v574_v38  ;;  %v3547_v13 = vunpack.c.l.b16 %v3451_v29  ;;  %v3548_v30 = vunpack.c.l.b16 %v3454_v63  ;;  %v7239_v52 = vld [vmem:[#allocation2 + $0x1c] sm:$0xf]  ;;  %v4702_v29 = vld [vmem:[#allocation2 + $0x18] sm:$0xe] }
 0x1a5   : > { %v7198_v31 = vpop.f32.mrf.mxu0  ;;  %v1609_v36 = vor.u32 %v1608_v40, %v1605_v49  ;;  %v7236_v41 = vrot.slane %v2849_v35, 5  ;;  %v1622_v49 = vshll.u32 %v1238_v23, 16  ;;  %v719_v40 = vld [vmem:[#allocation2 + $0xc8] sm:$0x1]  ;;  %v8975_v62 = vrot.slane %v7221_v60, 9 }
 0x1a6   : > { %v1765_v15 = vpop.f32.mrf.mxu1  ;;  %8967 = vst [vmem:[#allocation21_spill] sm:$0xff] %v7198_v31  ;;  %v1988_v51 = vpop.f32.mrf.mxu2  ;;  %v609_v50 = vmax.f32 %v575_v37, 0.0  ;;  %v2847_v57 = vrot.slane %v2846_v17, 4  ;;  %v720_v35 = vsel %vm6692_vm7, 0, %v719_v40  ;;  %v7248_v37 = vld [vmem:[#allocation2 + $0x28] sm:$0xf] }
 0x1a7   : > { %v7200_v27 = vadd.f32 %v1985_v48, %v1765_v15  ;;  %v2818_v48 = vsel %vm6713_vm11, %v2813_v61, %v7182_v0  ;;  %v7223_v15 = vrot.slane %v1612_v43, 5  ;;  %v1618_v0 = vrot.slane %v1616_v44, 4  ;;  %v7225_v61 = vld [vmem:[#allocation2 + $0x40] sm:$0xf]  ;;  %721 = vst [vmem:[#allocation2 + $0xc8] sm:$0x1] %v720_v35 }
 0x1a8   : > { %5919 = vmatmul.msk.bf16.gmra.mxu0 %vm1676_vm8, %v6166_v42  ;;  %v3147_v25 = vunpack.c.l.b16 %v2818_v48  ;;  %v7234_v44 = vrot.slane %v2836_v6, 4  ;;  %v1674_v48 = vpack.c.b16 %v1657_v53, %v1656_v10  ;;  %v752_v6 = vpack.c.bf16 %v609_v50, %v609_v50  ;;  %v4703_v53 = vld [vmem:[#allocation2 + $0x24] sm:$0xe] }
 0x1a9   : > { %8968 = vst [vmem:[#allocation22_spill] sm:$0xff] %v7200_v27  ;;  %v1619_v59 = vor.u32 %v1618_v0, %v7223_v15  ;;  %v1610_v10 = vrot.slane %v1609_v36, 4  ;;  %v2202_v0 = vld [vmem:[#allocation6 + $0x4] sm:$0x3]  ;;  %v576_v36 = vpop.f32.mrf.mxu3  ;;  %v4775_v1 = vrot.slane %v7248_v37, 5 }
 0x1aa   : > { %v3177_v38 = vpack.c.b16 %v3148_v16, %v3147_v25  ;;  %v4768_v25 = vrot.slane %v7239_v52, 5  ;;  %v1012_v16 = vshrl.u32 %v752_v6, 16  ;;  %v1015_v23 = vshll.u32 %v752_v6, 16 }
 0x1ab   : > { %v2300_v17 = vsel %vm1725_vm6, %v2202_v0, 0  ;;  %v577_v35 = vadd.f32 %v6338_v18, %v576_v36  ;;  %v3460_v6 = vrot.slane %v7257_v14, 5  ;;  %v1183_v0 = vld [vmem:[#allocation2 + $0xc0] sm:$0xf] }
 0x1ac   : > { %2309 = vmatpush.bf16.msrb.mxu3 %v2300_v17  ;;  %v4770_v50 = vrot.slane %v4768_v25, 4  ;;  %v7261_v40 = vrot.slane %v1012_v16, 7 }
 0x1ad   : > { %v7232_v43 = vpop.f32.mrf.mxu0 }
 0x1ae   : > { %v1768_v42 = vpop.f32.mrf.mxu1  ;;  %8969 = vst [vmem:[#allocation23_spill] sm:$0xff] %v7232_v43  ;;  %v1990_v63 = vpop.f32.mrf.mxu2  ;;  %v1017_v17 = vor.u32 %v1015_v23, %v7261_v40  ;;  %v4777_v23 = vrot.slane %v4775_v1, 4  ;;  %v1187_v60 = vld [vmem:[#allocation2 + $0xc8] sm:$0x1] }
 0x1af   : > { %v7241_v58 = vadd.f32 %v1988_v51, %v1768_v42  ;;  %v3576_v51 = vpack.c.b16 %v3548_v30, %v3547_v13  ;;  %v6068_v42 = vrot.slane %v4702_v29, 9  ;;  %v1620_v13 = vrot.slane %v1619_v59, 4 }
 0x1b0   : > { %5730 = vmatmul.msk.bf16.gmra.mxu3 %vm1676_vm8, %v1674_v48  ;;  %v1624_v30 = vrot.slane %v1622_v49, 5  ;;  %v4771_v48 = vrot.slane %v7246_v33, 5  ;;  %v2852_v59 = vsel %vm6713_vm11, %v2847_v57, %v7236_v41  ;;  %v8971_v49 = vrot.slane %v7225_v61, 5  ;;  %v7282_v41 = vld [vmem:[#allocation2 + $0x2c] sm:$0x1] }
 0x1b1   : > { %8970 = vst [vmem:[#allocation24_spill] sm:$0xff] %v7241_v58  ;;  %v2863_v57 = vshll.u32 %v7225_v61, 16  ;;  %v7688_v58 = vld [vmem:[#allocation2 + $0x70] sm:$0xf] }
 0x1b2   : > { %5926 = vmatmul.msk.bf16.gmra.mxu1 %vm1676_vm8, %v3177_v38  ;;  %v4769_v38 = vsel %vm6745_vm15, %v6068_v42, %v4768_v25  ;;  %v3459_v29 = vrot.slane %v8971_v49, 4  ;;  %v4772_v18 = vsel %vm6745_vm15, %v4770_v50, %v4771_v48  ;;  %v610_v42 = vmax.f32 %v577_v35, 0.0  ;;  %v6167_v49 = vld [vmem:[#allocation2 + $0x9c] sm:$0xff] }
 0x1b3   : > { %5959 = vmatmul.msk.bf16.gmra.mxu2 %vm1676_vm8, %v3576_v51  ;;  %v1615_v51 = vsel %vm6713_vm11, %v1610_v10, %v7223_v15  ;;  %v4880_v43 = vunpack.c.l.b16 %v4769_v38  ;;  %v4881_v31 = vunpack.c.l.b16 %v4772_v18  ;;  %v6069_v50 = vrot.slane %v4703_v53, 9 }
 0x1b4   : > { %v1184_v15 = vsel %vm6738_vm14, %v1017_v17, %v1183_v0  ;;  %v753_v10 = vpack.c.bf16 %v610_v42, %v610_v42  ;;  %v2867_v35 = vshrl.u32 %v7225_v61, 16  ;;  %v4778_v53 = vrot.slane %v7282_v41, 5  ;;  %v2721_v17 = vld [vmem:[#allocation2 + $0x3c] sm:$0xf] }
 0x1b5   : > { %v7275_v25 = vpop.f32.mrf.mxu0  ;;  %1185 = vst [vmem:[#allocation2 + $0xc0] sm:$0xf] %v1184_v15  ;;  %v4776_v38 = vsel %vm6745_vm15, %v6069_v50, %v4775_v1  ;;  %v3150_v18 = vunpack.c.l.b16 %v2852_v59  ;;  %v1658_v42 = vunpack.c.l.b16 %v1615_v51  ;;  %v1018_v1 = vrot.slane %v7261_v40, 4 }
 0x1b6   : > { %v1770_v16 = vpop.f32.mrf.mxu1  ;;  %8972 = vst [vmem:[#allocation25_spill] sm:$0xff] %v7275_v25  ;;  %v1993_v48 = vpop.f32.mrf.mxu2  ;;  %v1625_v25 = vsel %vm6713_vm11, %v1620_v13, %v1624_v30  ;;  %v8974_v13 = vrot.slane %v7225_v61, 5  ;;  %v1020_v0 = vshrl.u32 %v753_v10, 16  ;;  %v4882_v61 = vunpack.c.l.b16 %v4776_v38 }
 0x1b7   : > { %v7284_v36 = vadd.f32 %v1990_v63, %v1770_v16  ;;  %v7292_v63 = vpack.c.b16 %v4881_v31, %v4880_v43  ;;  %v1023_v16 = vshll.u32 %v753_v10, 16  ;;  %v3461_v31 = vsel %vm6745_vm15, %v3459_v29, %v3460_v6 }
 0x1b8   : > { %5920 = vmatmul.msk.bf16.gmra.mxu0 %vm1676_vm8, %v6167_v49  ;;  %v3458_v30 = vsel %vm6745_vm15, %v8975_v62, %v8974_v13  ;;  %v1659_v49 = vunpack.c.l.b16 %v1625_v25  ;;  %v4779_v43 = vsel %vm6745_vm15, %v4777_v23, %v4778_v53  ;;  %v1022_v59 = vrot.slane %v1020_v0, 7  ;;  %v7319_v0 = vld [vmem:[#allocation2 + $0x34] sm:$0xf] }
 0x1b9   : > { %8973 = vst [vmem:[#allocation26_spill] sm:$0xff] %v7284_v36  ;;  %v4883_v50 = vunpack.c.l.b16 %v4779_v43  ;;  %v2854_v15 = vshrl.u32 %v2721_v17, 16  ;;  %v2857_v34 = vshll.u32 %v2721_v17, 16  ;;  %v7308_v13 = vrot.slane %v2863_v57, 5  ;;  %v4704_v57 = vld [vmem:[#allocation2 + $0x30] sm:$0xe] }
 0x1ba   : > { %v2869_v10 = vrot.slane %v2867_v35, 4  ;;  %v8976_v29 = vsel %vm6713_vm11, %v7234_v44, %v7202_v45  ;;  %v1025_v25 = vor.u32 %v1023_v16, %v1022_v59  ;;  %v1027_v51 = vrot.slane %v1022_v59, 4  ;;  %v2725_v44 = vld [vmem:[#allocation2 + $0x4c] sm:$0xf]  ;;  %v7596_v36 = vld [vmem:[#allocation2 + $0x68] sm:$0x1] }
 0x1bb   : > { %v3149_v6 = vunpack.c.l.b16 %v8976_v29  ;;  %v7315_v23 = vpack.c.b16 %v4883_v50, %v4882_v61  ;;  %v1675_v38 = vpack.c.b16 %v1659_v49, %v1658_v42  ;;  %v3550_v53 = vunpack.c.l.b16 %v3461_v31  ;;  %v7330_v31 = vld [vmem:[#allocation2 + $0x38] sm:$0x1]  ;;  %v6168_v29 = vld [vmem:[#allocation2 + $0xa8] sm:$0xff] }
 0x1bc   : > { %v1026_v22 = vsel %vm6763_vm5, %v1018_v1, %v1025_v25  ;;  %v1188_v45 = vsel %vm6680_vm3, %v1027_v51, %v1187_v60  ;;  %v2856_v16 = vrot.slane %v2854_v15, 4  ;;  %v2859_v42 = vrot.slane %v2857_v34, 5  ;;  %v2724_v25 = vld [vmem:[#allocation2 + $0x48] sm:$0xf] }
 0x1bd   : > { %v7321_v17 = vpop.f32.mrf.mxu0  ;;  %v3178_v43 = vpack.c.b16 %v3150_v18, %v3149_v6  ;;  %1186 = vst.msk [vmem:[#allocation2 + $0xc4] sm:$0xf] %vm611_vm4, %v1026_v22  ;;  %v2870_v49 = vor.u32 %v2869_v10, %v7308_v13  ;;  %v6070_v18 = vrot.slane %v4704_v57, 9  ;;  %v4782_v8 = vrot.slane %v7319_v0, 5  ;;  %v2726_v6 = vld [vmem:[#allocation2 + $0x50] sm:$0x1] }
 0x1be   : > { %v1773_v62 = vpop.f32.mrf.mxu1  ;;  %8978 = vst [vmem:[#allocation28_spill] sm:$0xff] %v7321_v17  ;;  %v1995_v35 = vpop.f32.mrf.mxu2  ;;  %v3464_v59 = vrot.slane %v2725_v44, 5  ;;  %v4785_v34 = vrot.slane %v7330_v31, 5  ;;  %v2860_v61 = vor.u32 %v2859_v42, %v2856_v16  ;;  %v2875_v15 = vrot.slane %v2873_v21, 5  ;;  %v3368_v16 = vld [vmem:[#allocation2 + $0x48] sm:$0xe] }
 0x1bf   : > { %v7317_v40 = vadd.f32 %v1993_v48, %v1773_v62  ;;  %v3549_v48 = vunpack.c.l.b16 %v3458_v30  ;;  %1189 = vst [vmem:[#allocation2 + $0xc8] sm:$0x1] %v1188_v45  ;;  %v4783_v30 = vsel %vm6745_vm15, %v6070_v18, %v4782_v8  ;;  %v4784_v22 = vrot.slane %v4782_v8, 4 }
 0x1c0   : > { %5731 = vmatmul.msk.bf16.gmra.mxu3 %vm1676_vm8, %v1675_v38  ;;  %v2871_v50 = vrot.slane %v2870_v49, 4  ;;  %v2887_v10 = vshll.u32 %v2725_v44, 16  ;;  %v2891_v51 = vshrl.u32 %v2725_v44, 16  ;;  %v4884_v38 = vunpack.c.l.b16 %v4783_v30 }
 0x1c1   : > { %8977 = vst [vmem:[#allocation27_spill] sm:$0xff] %v7317_v40  ;;  %v3577_v1 = vpack.c.b16 %v3550_v53, %v3549_v48  ;;  %v4786_v14 = vsel %vm6745_vm15, %v4784_v22, %v4785_v34  ;;  %v2861_v45 = vrot.slane %v2860_v61, 4  ;;  %v2878_v21 = vshrl.u32 %v2724_v25, 16 }
 0x1c2   : > { %5927 = vmatmul.msk.bf16.gmra.mxu1 %vm1676_vm8, %v3178_v43  ;;  %v4885_v53 = vunpack.c.l.b16 %v4786_v14  ;;  %v3466_v43 = vrot.slane %v3464_v59, 4  ;;  %v2876_v48 = vsel %vm6713_vm11, %v2871_v50, %v2875_v15  ;;  %v2881_v18 = vshll.u32 %v2724_v25, 16 }
 0x1c3   : > { %5960 = vmatmul.msk.bf16.gmra.mxu2 %vm1676_vm8, %v3577_v1  ;;  %v2866_v44 = vsel %vm6713_vm11, %v2861_v45, %v7308_v13  ;;  %v7353_v8 = vrot.slane %v2887_v10, 5  ;;  %v2893_v1 = vrot.slane %v2891_v51, 4  ;;  %v3152_v30 = vunpack.c.l.b16 %v2876_v48  ;;  %v7363_v48 = vld [vmem:[#allocation2 + $0x40] sm:$0xf] }
 0x1c4   : > { %v7346_v42 = vpack.c.b16 %v4885_v53, %v4884_v38  ;;  %v5945_v22 = vrot.slane %v3368_v16, 9  ;;  %v3151_v50 = vunpack.c.l.b16 %v2866_v44  ;;  %v2880_v15 = vrot.slane %v2878_v21, 4  ;;  %v4705_v16 = vld [vmem:[#allocation2 + $0x3c] sm:$0xe]  ;;  %v7366_v21 = vld [vmem:[#allocation2 + $0x44] sm:$0x1] }
 0x1c5   : > { %v7348_v49 = vpop.f32.mrf.mxu0  ;;  %v2883_v13 = vrot.slane %v2881_v18, 5  ;;  %v2894_v10 = vor.u32 %v2893_v1, %v7353_v8  ;;  %v2897_v53 = vshll.u32 %v2726_v6, 16  ;;  %v4789_v44 = vrot.slane %v7363_v48, 5 }
 0x1c6   : > { %v1775_v60 = vpop.f32.mrf.mxu1  ;;  %v1998_v57 = vpop.f32.mrf.mxu2  ;;  %8980 = vst [vmem:[#allocation30_spill] sm:$0xff] %v7348_v49  ;;  %v3179_v51 = vpack.c.b16 %v3152_v30, %v3151_v50  ;;  %v6071_v30 = vrot.slane %v4705_v16, 9 }
 0x1c7   : > { %v7341_v62 = vadd.f32 %v1995_v35, %v1775_v60  ;;  %v3467_v35 = vrot.slane %v2726_v6, 5  ;;  %v3465_v60 = vsel %vm6745_vm15, %v5945_v22, %v3464_v59  ;;  %v2727_v6 = vld [vmem:[#allocation2 + $0x54] sm:$0xf]  ;;  %v2899_v22 = vrot.slane %v2897_v53, 5 }
 0x1c8   : > { %5921 = vmatmul.msk.bf16.gmra.mxu0 %vm1676_vm8, %v6168_v29  ;;  %v6151_v29 = vld [vmem:[#allocation2 + $0x90] sm:$0xff]  ;;  %v3551_v45 = vunpack.c.l.b16 %v3465_v60  ;;  %v4791_v50 = vrot.slane %v4789_v44, 4  ;;  %v4792_v60 = vrot.slane %v7366_v21, 5 }
 0x1c9   : > { %8979 = vst [vmem:[#allocation29_spill] sm:$0xff] %v7341_v62  ;;  %v3468_v34 = vsel %vm6745_vm15, %v3466_v43, %v3467_v35  ;;  %v2728_v43 = vld [vmem:[#allocation2 + $0x58] sm:$0xf]  ;;  %v2895_v35 = vrot.slane %v2894_v10, 4  ;;  %v2729_v10 = vld [vmem:[#allocation2 + $0x5c] sm:$0x1] }
 0x1ca   : > { %v3552_v38 = vunpack.c.l.b16 %v3468_v34  ;;  %v3471_v1 = vrot.slane %v2728_v43, 5  ;;  %v2915_v53 = vshrl.u32 %v2728_v43, 16  ;;  %v3474_v17 = vrot.slane %v2729_v10, 5 }
 0x1cc   : > { %v3578_v59 = vpack.c.b16 %v3552_v38, %v3551_v45  ;;  %v3473_v16 = vrot.slane %v3471_v1, 4 }
 0x1cd   : > { %v7369_v18 = vpop.f32.mrf.mxu0 }
 0x1ce   : > { %v1778_v61 = vpop.f32.mrf.mxu1  ;;  %v2000_v25 = vpop.f32.mrf.mxu2  ;;  %8982 = vst [vmem:[#allocation32_spill] sm:$0xff] %v7369_v18  ;;  %v4481_v18 = vld [vmem:[#allocation6 + $0xe] sm:$0x3] }
 0x1cf   : > { %v7359_v14 = vadd.f32 %v1998_v57, %v1778_v61  ;;  %v2884_v57 = vor.u32 %v2883_v13, %v2880_v15  ;;  %v4790_v61 = vsel %vm6745_vm15, %v6071_v30, %v4789_v44  ;;  %v2900_v13 = vsel %vm6713_vm11, %v2895_v35, %v2899_v22  ;;  %v3369_v44 = vld [vmem:[#allocation2 + $0x54] sm:$0xe] }
 0x1d0   : > { %5808 = vmatmul.msk.bf16.vlgmr.msra.gmra.mxu3 %vm1676_vm8, %v6151_v29  ;;  %v6169_v29 = vld [vmem:[#allocation2 + $0xb4] sm:$0xff]  ;;  %v4793_v30 = vsel %vm6745_vm15, %v4791_v50, %v4792_v60  ;;  %v3154_v22 = vunpack.c.l.b16 %v2900_v13  ;;  %v5946_v50 = vrot.slane %v3369_v44, 9  ;;  %v3475_v60 = vsel %vm6745_vm15, %v3473_v16, %v3474_v17  ;;  %v6152_v44 = vld [vmem:[#allocation2 + $0x9c] sm:$0xff] }
 0x1d1   : > { %8981 = vst [vmem:[#allocation31_spill] sm:$0xff] %v7359_v14  ;;  %v2885_v38 = vrot.slane %v2884_v57, 4  ;;  %v4886_v57 = vunpack.c.l.b16 %v4790_v61  ;;  %v4887_v49 = vunpack.c.l.b16 %v4793_v30  ;;  %v4106_v17 = vshll.u32 %v7239_v52, 16 }
 0x1d2   : > { %5928 = vmatmul.msk.bf16.gmra.mxu1 %vm1676_vm8, %v3179_v51  ;;  %v2902_v51 = vshrl.u32 %v2727_v6, 16  ;;  %v4110_v16 = vshrl.u32 %v7239_v52, 16 }
 0x1d3   : > { %5961 = vmatmul.msk.bf16.gmra.mxu2 %vm1676_vm8, %v3578_v59  ;;  %v2911_v59 = vshll.u32 %v2728_v43, 16  ;;  %v2890_v35 = vsel %vm6713_vm11, %v2885_v38, %v7353_v8  ;;  %v7386_v43 = vld [vmem:[#allocation2 + $0x64] sm:$0xf]  ;;  %v7388_v54 = vpack.c.b16 %v4887_v49, %v4886_v57  ;;  %v3472_v8 = vsel %vm6745_vm15, %v5946_v50, %v3471_v1  ;;  %v4048_v49 = vld [vmem:[#allocation2 + $0x18] sm:$0xf] }
 0x1d4   : > { %v2904_v61 = vrot.slane %v2902_v51, 4  ;;  %v3153_v32 = vunpack.c.l.b16 %v2890_v35  ;;  %v3478_v38 = vrot.slane %v7386_v43, 5  ;;  %v3554_v57 = vunpack.c.l.b16 %v3475_v60  ;;  %v7405_v1 = vld [vmem:[#allocation2 + $0x68] sm:$0x1] }
 0x1d5   : > { %v7394_v30 = vpop.f32.mrf.mxu0  ;;  %v4097_v50 = vshrl.u32 %v4048_v49, 16  ;;  %v4100_v60 = vshll.u32 %v4048_v49, 16  ;;  %v7408_v28 = vrot.slane %v4106_v17, 5  ;;  %v4112_v52 = vrot.slane %v4110_v16, 4  ;;  %v2730_v16 = vld [vmem:[#allocation2 + $0x60] sm:$0xf] }
 0x1d6   : > { %v1780_v34 = vpop.f32.mrf.mxu1  ;;  %v2003_v45 = vpop.f32.mrf.mxu2  ;;  %8984 = vst [vmem:[#allocation34_spill] sm:$0xff] %v7394_v30 }
 0x1d7   : > { %v7375_v15 = vadd.f32 %v2000_v25, %v1780_v34  ;;  %v2905_v25 = vshll.u32 %v2727_v6, 16  ;;  %v4579_v34 = vsel %vm1725_vm6, %v4481_v18, 0  ;;  %v7392_v6 = vrot.slane %v2911_v59, 5 }
 0x1d8   : > { %5922 = vmatmul.msk.bf16.gmra.mxu0 %vm1676_vm8, %v6169_v29  ;;  %v2917_v18 = vrot.slane %v2915_v53, 4  ;;  %v3180_v59 = vpack.c.b16 %v3154_v22, %v3153_v32  ;;  %v3481_v22 = vrot.slane %v7405_v1, 5  ;;  %v4102_v49 = vrot.slane %v4100_v60, 5 }
 0x1d9   : > { %8983 = vst [vmem:[#allocation33_spill] sm:$0xff] %v7375_v15  ;;  %4588 = vmatpush.bf16.msra.mxu0 %v4579_v34  ;;  %v2907_v29 = vrot.slane %v2905_v25, 5  ;;  %v3553_v25 = vunpack.c.l.b16 %v3472_v8  ;;  %v4051_v8 = vld [vmem:[#allocation2 + $0x24] sm:$0xf]  ;;  %v4113_v17 = vor.u32 %v4112_v52, %v7408_v28  ;;  %v4134_v52 = vshrl.u32 %v7248_v37, 16 }
 0x1da   : > { %v2918_v53 = vor.u32 %v2917_v18, %v7392_v6  ;;  %v6170_v18 = vld [vmem:[#allocation2 + $0xc0] sm:$0xff]  ;;  %v4124_v60 = vshll.u32 %v4051_v8, 16 }
 0x1db   : > { %v2908_v35 = vor.u32 %v2907_v29, %v2904_v61  ;;  %v3579_v30 = vpack.c.b16 %v3554_v57, %v3553_v25  ;;  %v4099_v29 = vrot.slane %v4097_v50, 4  ;;  %v4116_v50 = vshll.u32 %v7246_v33, 16 }
 0x1dc   : > { %v2919_v32 = vrot.slane %v2918_v53, 4  ;;  %v2935_v53 = vshll.u32 %v7386_v43, 16  ;;  %v4114_v33 = vrot.slane %v4113_v17, 4  ;;  %v4136_v15 = vrot.slane %v4134_v52, 4  ;;  %v6153_v17 = vld [vmem:[#allocation2 + $0xa8] sm:$0xff] }
 0x1dd   : > { %v2909_v61 = vrot.slane %v2908_v35, 4  ;;  %v7419_v25 = vpop.f32.mrf.mxu0 }
 0x1de   : > { %v1783_v34 = vpop.f32.mrf.mxu1  ;;  %v2005_v51 = vpop.f32.mrf.mxu2  ;;  %8987 = vst [vmem:[#allocation37_spill] sm:$0xff] %v7419_v25  ;;  %v7432_v25 = vld [vmem:[#allocation2 + $0x4c] sm:$0xf] }
 0x1df   : > { %v7399_v13 = vadd.f32 %v2003_v45, %v1783_v34  ;;  %v2921_v45 = vshll.u32 %v2729_v10, 16  ;;  %v3480_v34 = vrot.slane %v3478_v38, 4  ;;  %v2914_v35 = vsel %vm6713_vm11, %v2909_v61, %v7392_v6 }
 0x1e0   : > { %5809 = vmatmul.msk.bf16.gmra.mxu3 %vm1676_vm8, %v6152_v44  ;;  %v2926_v6 = vshrl.u32 %v2730_v16, 16  ;;  %v2929_v61 = vshll.u32 %v2730_v16, 16 }
 0x1e1   : > { %8985 = vst [vmem:[#allocation35_spill] sm:$0xff] %v7399_v13  ;;  %v2923_v56 = vrot.slane %v2921_v45, 5  ;;  %v3482_v10 = vsel %vm6745_vm15, %v3480_v34, %v3481_v22  ;;  %v4118_v13 = vrot.slane %v4116_v50, 5  ;;  %v2038_v50 = vld [vmem:[#allocation2] sm:$0xe] }
 0x1e2   : > { %5929 = vmatmul.msk.bf16.gmra.mxu1 %vm1676_vm8, %v3180_v59  ;;  %v5947_v59 = vrot.slane %v3370_v46, 9  ;;  %v3556_v22 = vunpack.c.l.b16 %v3482_v10  ;;  %v2931_v16 = vrot.slane %v2929_v61, 5  ;;  %v5812_v52 = vrot.slane %v2038_v50, 9  ;;  %v3795_v61 = vld [vmem:[#allocation6 + $0xc] sm:$0x3] }
 0x1e3   : > { %5962 = vmatmul.msk.bf16.gmra.mxu2 %vm1676_vm8, %v3579_v30  ;;  %v2939_v30 = vshrl.u32 %v7386_v43, 16  ;;  %v2924_v46 = vsel %vm6713_vm11, %v2919_v32, %v2923_v56  ;;  %v4130_v43 = vshll.u32 %v7248_v37, 16  ;;  %v7434_v32 = vrot.slane %v2935_v53, 5 }
 0x1e4   : > { %v3479_v34 = vsel %vm6745_vm15, %v5947_v59, %v3478_v38  ;;  %v3156_v56 = vunpack.c.l.b16 %v2924_v46  ;;  %v4796_v37 = vrot.slane %v7432_v25, 5 }
 0x1e5   : > { %v2941_v4 = vrot.slane %v2939_v30, 4  ;;  %v7436_v59 = vrot.slane %v4130_v43, 5  ;;  %v4119_v30 = vsel %vm6713_vm11, %v4114_v33, %v4118_v13  ;;  %v4140_v43 = vshll.u32 %v7282_v41, 16  ;;  %v9139_v39 = vld [vmem:[#allocation37_spill] sm:$0xff] }
 0x1e6   : > { %v1785_v44 = vpop.f32.mrf.mxu1  ;;  %v2008_v45 = vpop.f32.mrf.mxu2  ;;  %v2945_v13 = vshll.u32 %v7405_v1, 16 }
 0x1e7   : > { %v7414_v57 = vadd.f32 %v2005_v51, %v1785_v44  ;;  %v4121_v51 = vshrl.u32 %v4051_v8, 16  ;;  %v4103_v44 = vor.u32 %v4102_v49, %v4099_v29  ;;  %v4126_v8 = vrot.slane %v4124_v60, 5  ;;  %v7450_v60 = vld [vmem:[#allocation2 + $0x70] sm:$0xf] }
 0x1e8   : > { %5923 = vmatmul.msk.bf16.gmra.mxu0 %vm1676_vm8, %v6170_v18  ;;  %v3155_v18 = vunpack.c.l.b16 %v2914_v35  ;;  %v2204_v29 = vunpack.c.l.b16 %v6751_v5  ;;  %v2928_v49 = vrot.slane %v2926_v6, 4  ;;  %v2942_v35 = vor.u32 %v2941_v4, %v7434_v32 }
 0x1e9   : > { %8986 = vst [vmem:[#allocation36_spill] sm:$0xff] %v7414_v57  ;;  %v3555_v57 = vunpack.c.l.b16 %v3479_v34  ;;  %v4123_v38 = vrot.slane %v4121_v51, 4  ;;  %v4104_v10 = vrot.slane %v4103_v44, 4  ;;  %v7443_v51 = vld [vmem:[#allocation2 + $0x50] sm:$0x1]  ;;  %v4137_v4 = vor.u32 %v4136_v15, %v7436_v59  ;;  %v7456_v44 = vpop.f32.mrf.mxu0 }
 0x1ea   : > { %v3181_v53 = vpack.c.b16 %v3156_v56, %v3155_v18  ;;  %8989 = vst [vmem:[#allocation39_spill] sm:$0xff] %v7456_v44  ;;  %v2932_v6 = vor.u32 %v2931_v16, %v2928_v49  ;;  %v4054_v56 = vld [vmem:[#allocation2 + $0x30] sm:$0xf]  ;;  %v4799_v33 = vrot.slane %v7443_v51, 5  ;;  %v2943_v18 = vrot.slane %v2942_v35, 4 }
 0x1eb   : > { %v3580_v14 = vpack.c.b16 %v3556_v22, %v3555_v57  ;;  %v4109_v5 = vsel %vm6713_vm11, %v4104_v10, %v7408_v28  ;;  %v4127_v57 = vor.u32 %v4126_v8, %v4123_v38  ;;  %v4798_v22 = vrot.slane %v4796_v37, 4  ;;  %v4706_v10 = vld [vmem:[#allocation2 + $0x48] sm:$0xe] }
 0x1ec   : > { %v8990_v28 = vrot.slane %v6705_v20, 5  ;;  %v3485_v15 = vrot.slane %v7450_v60, 5  ;;  %v3925_v8 = vsel %vm1725_vm6, %v3795_v61, 0  ;;  %v2947_v49 = vrot.slane %v2945_v13, 5  ;;  %v7475_v61 = vld [vmem:[#allocation2 + $0x74] sm:$0x1] }
 0x1ed   : > { %3934 = vmatpush.bf16.msra.mxu3 %v3925_v8  ;;  %v4800_v20 = vsel %vm6745_vm15, %v4798_v22, %v4799_v33  ;;  %v7471_v35 = vrot.slane %v4127_v57, 4  ;;  %v4142_v50 = vrot.slane %v4140_v43, 5  ;;  %v4138_v33 = vrot.slane %v4137_v4, 4  ;;  %v3371_v57 = vld [vmem:[#allocation2 + $0x6c] sm:$0xe] }
 0x1ee   : > { %v2092_v41 = vsel %vm6745_vm15, %v5812_v52, %v8990_v28  ;;  %v2010_v1 = vpop.f32.mrf.mxu2  ;;  %v6072_v52 = vrot.slane %v4706_v10, 9  ;;  %v3487_v22 = vrot.slane %v3485_v15, 4  ;;  %v2959_v13 = vshll.u32 %v7450_v60, 16 }
 0x1ef   : > { %v1788_v46 = vpop.f32.mrf.mxu1  ;;  %v2203_v38 = vunpack.c.l.b16 %v2092_v41  ;;  %v2933_v41 = vrot.slane %v2932_v6, 4  ;;  %v4133_v6 = vsel %vm6713_vm11, %v7471_v35, %v7436_v59  ;;  %v4154_v4 = vshll.u32 %v7319_v0, 16  ;;  %v7497_v59 = vld [vmem:[#allocation2 + $0x58] sm:$0xf] }
 0x1f0   : > { %v7445_v34 = vadd.f32 %v2008_v45, %v1788_v46  ;;  %5810 = vmatmul.msk.bf16.gmra.mxu3 %vm1676_vm8, %v6153_v17  ;;  %v4483_v45 = vunpack.c.l.b16 %v4119_v30  ;;  %v4482_v46 = vunpack.c.l.b16 %v4109_v5  ;;  %v4145_v17 = vshrl.u32 %v4054_v56, 16 }
 0x1f1   : > { %v7469_v16 = vpack.c.b16 %v2204_v29, %v2203_v38  ;;  %v2948_v5 = vsel %vm6713_vm11, %v2943_v18, %v2947_v49  ;;  %v2733_v29 = vld [vmem:[#allocation2 + $0x6c] sm:$0xf]  ;;  %v4797_v43 = vsel %vm6745_vm15, %v6072_v52, %v4796_v37  ;;  %v4889_v18 = vunpack.c.l.b16 %v4800_v20 }
 0x1f2   : > { %8988 = vst [vmem:[#allocation38_spill] sm:$0xff] %v7445_v34  ;;  %5930 = vmatmul.msk.bf16.gmra.mxu1 %vm1676_vm8, %v3181_v53  ;;  %v4148_v53 = vshll.u32 %v4054_v56, 16  ;;  %v4514_v30 = vpack.c.b16 %v4483_v45, %v4482_v46  ;;  %v2963_v45 = vshrl.u32 %v7450_v60, 16  ;;  %v4158_v56 = vshrl.u32 %v7319_v0, 16  ;;  %v7499_v0 = vpop.f32.mrf.mxu0 }
 0x1f3   : > { %5963 = vmatmul.msk.bf16.gmra.mxu2 %vm1676_vm8, %v3580_v14  ;;  %v2938_v60 = vsel %vm6713_vm11, %v2933_v41, %v7434_v32  ;;  %v3488_v37 = vrot.slane %v7475_v61, 5  ;;  %v7494_v38 = vrot.slane %v4145_v17, 4  ;;  %v3158_v10 = vunpack.c.l.b16 %v2948_v5  ;;  %8992 = vst [vmem:[#allocation41_spill] sm:$0xff] %v7499_v0 }
 0x1f4   : > { %v2950_v46 = vshrl.u32 %v2733_v29, 16  ;;  %v2953_v49 = vshll.u32 %v2733_v29, 16  ;;  %v5948_v20 = vrot.slane %v3371_v57, 9  ;;  %v7503_v32 = vrot.slane %v2959_v13, 5 }
 0x1f5   : > { %v3489_v35 = vsel %vm6745_vm15, %v3487_v22, %v3488_v37  ;;  %v2965_v52 = vrot.slane %v2963_v45, 4  ;;  %v7505_v41 = vrot.slane %v4154_v4, 5  ;;  %v4160_v5 = vrot.slane %v4158_v56, 4  ;;  %v6154_v45 = vld [vmem:[#allocation2 + $0xb4] sm:$0xff] }
 0x1f6   : > { %v2013_v17 = vpop.f32.mrf.mxu2  ;;  %v4143_v57 = vsel %vm6713_vm11, %v4138_v33, %v4142_v50  ;;  %v8935_v22 = vrot.slane %v7497_v59, 5  ;;  %v2952_v4 = vrot.slane %v2950_v46, 4  ;;  %v2955_v0 = vrot.slane %v2953_v49, 5  ;;  %v7523_v33 = vld [vmem:[#allocation2 + $0x7c] sm:$0xf] }
 0x1f7   : > { %v1790_v28 = vpop.f32.mrf.mxu1  ;;  %v4485_v50 = vunpack.c.l.b16 %v4143_v57  ;;  %v4164_v46 = vshll.u32 %v7330_v31, 16  ;;  %v2969_v49 = vshll.u32 %v7475_v61, 16  ;;  %v7536_v57 = vld [vmem:[#allocation2 + $0x10] sm:$0xf]  ;;  %v7539_v31 = vld [vmem:[#allocation2 + $0x18] sm:$0xe] }
 0x1f8   : > { %v7477_v14 = vadd.f32 %v2010_v1, %v1790_v28  ;;  %6052 = vmatmul.msk.bf16.vlgmr.msra.gmra.mxu0 %vm1676_vm8, %v4514_v30  ;;  %v4879_v1 = vld [vmem:[#allocation6 + $0x10] sm:$0x3]  ;;  %v4888_v30 = vunpack.c.l.b16 %v4797_v43  ;;  %v3157_v28 = vunpack.c.l.b16 %v2938_v60  ;;  %v3486_v43 = vsel %vm6745_vm15, %v5948_v20, %v3485_v15 }
 0x1f9   : > { %v4977_v8 = vsel %vm1725_vm6, %v4879_v1, 0  ;;  %v7507_v1 = vld [vmem:[#allocation2 + $0x5c] sm:$0x1]  ;;  %v3558_v60 = vunpack.c.l.b16 %v3489_v35 }
 0x1fa   : > { %8991 = vst [vmem:[#allocation40_spill] sm:$0xff] %v7477_v14  ;;  %4986 = vmatpush.bf16.msra.mxu1 %v4977_v8  ;;  %v7509_v29 = vpack.c.b16 %v4889_v18, %v4888_v30  ;;  %v4150_v8 = vrot.slane %v4148_v53, 5  ;;  %v3182_v37 = vpack.c.b16 %v3158_v10, %v3157_v28  ;;  %v2966_v18 = vor.u32 %v2965_v52, %v7503_v32 }
 0x1fb   : > { %v4805_v30 = vrot.slane %v8935_v22, 4  ;;  %v4806_v15 = vrot.slane %v7507_v1, 5  ;;  %v3557_v53 = vunpack.c.l.b16 %v3486_v43  ;;  %v4161_v10 = vor.u32 %v4160_v5, %v7505_v41  ;;  %v7534_v43 = vld [vmem:[#allocation2 + $0xc] sm:$0xe] }
 0x1fc   : > { %v4151_v20 = vor.u32 %v4150_v8, %v7494_v38  ;;  %v2956_v28 = vor.u32 %v2955_v0, %v2952_v4  ;;  %v2967_v61 = vrot.slane %v2966_v18, 4  ;;  %v3492_v38 = vrot.slane %v7523_v33, 5  ;;  %v4057_v8 = vld [vmem:[#allocation2 + $0x3c] sm:$0xf] }
 0x1fd   : > { %v7532_v35 = vsel %vm6745_vm15, %v4805_v30, %v4806_v15  ;;  %v3581_v52 = vpack.c.b16 %v3558_v60, %v3557_v53  ;;  %v7546_v0 = vrot.slane %v4161_v10, 4  ;;  %v7548_v4 = vrot.slane %v4164_v46, 5  ;;  %v4707_v30 = vld [vmem:[#allocation2 + $0x54] sm:$0xe]  ;;  %v7550_v15 = vpop.f32.mrf.mxu0 }
 0x1fe   : > { %8994 = vst [vmem:[#allocation43_spill] sm:$0xff] %v7550_v15  ;;  %v2971_v53 = vrot.slane %v2969_v49, 5  ;;  %v5813_v18 = vrot.slane %v7534_v43, 9  ;;  %v2015_v5 = vpop.f32.mrf.mxu2  ;;  %v2957_v60 = vrot.slane %v2956_v28, 4  ;;  %v4169_v46 = vshrl.u32 %v4057_v8, 16 }
 0x1ff   : > { %v1793_v13 = vpop.f32.mrf.mxu1  ;;  %v3372_v43 = vld [vmem:[#allocation2 + $0x78] sm:$0xe]  ;;  %v3494_v22 = vrot.slane %v3492_v38, 4  ;;  %v6073_v15 = vrot.slane %v4707_v30, 9 }
 0x200   : > { %v7516_v56 = vadd.f32 %v2013_v17, %v1793_v13  ;;  %5811 = vmatmul.msk.bf16.gmra.mxu3 %vm1676_vm8, %v6154_v45  ;;  %v4484_v17 = vunpack.c.l.b16 %v4133_v6  ;;  %v6340_v13 = vld [vmem:[#allocation2 + $0x14] sm:$0x1] }
 0x201   : > { %v2101_v45 = vrot.slane %v6340_v13, 5  ;;  %v7552_v13 = vrot.slane %v4151_v20, 4  ;;  %v2972_v20 = vsel %vm6713_vm11, %v2967_v61, %v2971_v53  ;;  %v2987_v61 = vshrl.u32 %v7523_v33, 16  ;;  %v7578_v53 = vld [vmem:[#allocation2 + $0x64] sm:$0xf] }
 0x202   : > { %8993 = vst [vmem:[#allocation42_spill] sm:$0xff] %v7516_v56  ;;  %5931 = vmatmul.msk.bf16.gmra.mxu1 %vm1676_vm8, %v3182_v37  ;;  %v7542_v37 = vld [vmem:[#allocation2 + $0x20] sm:$0x1]  ;;  %v4515_v6 = vpack.c.b16 %v4485_v50, %v4484_v17  ;;  %v8995_v50 = vrot.slane %v7536_v57, 5  ;;  %v4172_v17 = vshll.u32 %v4057_v8, 16 }
 0x203   : > { %5964 = vmatmul.msk.bf16.gmra.mxu2 %vm1676_vm8, %v3581_v52  ;;  %v7556_v56 = vld [vmem:[#allocation2 + $0x80] sm:$0x1]  ;;  %v7560_v52 = vld [vmem:[#allocation2 + $0x1c] sm:$0xf]  ;;  %v4157_v28 = vsel %vm6713_vm11, %v7552_v13, %v7505_v41  ;;  %v8997_v41 = vrot.slane %v7497_v59, 5  ;;  %v2989_v40 = vrot.slane %v2987_v61, 4 }
 0x204   : > { %v2100_v10 = vrot.slane %v8995_v50, 4  ;;  %v4167_v50 = vsel %vm6713_vm11, %v7546_v0, %v7548_v4  ;;  %v3495_v30 = vrot.slane %v7556_v56, 5  ;;  %v3160_v0 = vunpack.c.l.b16 %v2972_v20 }
 0x205   : > { %v4804_v13 = vsel %vm6745_vm15, %v6073_v15, %v8997_v41  ;;  %v5949_v4 = vrot.slane %v3372_v43, 9 }
 0x206   : > { %v3496_v14 = vsel %vm6745_vm15, %v3494_v22, %v3495_v30  ;;  %v4890_v15 = vunpack.c.l.b16 %v4804_v13  ;;  %v4182_v30 = vshrl.u32 %v7363_v48, 16  ;;  %v4813_v13 = vrot.slane %v7596_v36, 5 }
 0x207   : > { %v1795_v44 = vpop.f32.mrf.mxu1  ;;  %v3493_v20 = vsel %vm6745_vm15, %v5949_v4, %v3492_v38  ;;  %v7609_v38 = vpop.f32.mrf.mxu0 }
 0x208   : > { %v7563_v49 = vadd.f32 %v2015_v5, %v1795_v44  ;;  %6053 = vmatmul.msk.bf16.gmra.mxu0 %vm1676_vm8, %v4515_v6  ;;  %v2736_v44 = vld [vmem:[#allocation2 + $0x78] sm:$0xf]  ;;  %v2983_v5 = vshll.u32 %v7523_v33, 16  ;;  %v2962_v6 = vsel %vm6713_vm11, %v2957_v60, %v7503_v32  ;;  %v4891_v33 = vunpack.c.l.b16 %v7532_v35  ;;  %9000 = vst [vmem:[#allocation47_spill] sm:$0xff] %v7609_v38 }
 0x209   : > { %v2974_v34 = vshrl.u32 %v2736_v44, 16  ;;  %v2977_v32 = vshll.u32 %v2736_v44, 16  ;;  %v8936_v60 = vrot.slane %v7578_v53, 5  ;;  %v3159_v8 = vunpack.c.l.b16 %v2962_v6 }
 0x20a   : > { %8996 = vst [vmem:[#allocation44_spill] sm:$0xff] %v7563_v49  ;;  %v2102_v49 = vsel %vm6745_vm15, %v2100_v10, %v2101_v45  ;;  %v7594_v62 = vrot.slane %v2983_v5, 5  ;;  %v4171_v45 = vrot.slane %v4169_v46, 4  ;;  %v4174_v10 = vrot.slane %v4172_v17, 5 }
 0x20b   : > { %v4178_v35 = vshll.u32 %v7363_v48, 16  ;;  %v3183_v22 = vpack.c.b16 %v3160_v0, %v3159_v8  ;;  %v3560_v44 = vunpack.c.l.b16 %v3496_v14  ;;  %v7604_v6 = vpack.c.b16 %v4891_v33, %v4890_v15 }
 0x20c   : > { %v2976_v5 = vrot.slane %v2974_v34, 4  ;;  %v2979_v61 = vrot.slane %v2977_v32, 5  ;;  %v4812_v41 = vrot.slane %v8936_v60, 4  ;;  %v3559_v46 = vunpack.c.l.b16 %v3493_v20  ;;  %v7618_v34 = vld [vmem:[#allocation2 + $0x88] sm:$0xf] }
 0x20d   : > { %8999 = vst [vmem:[#allocation46_spill] sm:$0xff] %v7604_v6  ;;  %v9001_v17 = vrot.slane %v7536_v57, 5  ;;  %v2990_v14 = vor.u32 %v2989_v40, %v7594_v62  ;;  %v9002_v0 = vrot.slane %v7560_v52, 5  ;;  %v4487_v33 = vunpack.c.l.b16 %v4167_v50 }
 0x20e   : > { %v2206_v32 = vunpack.c.l.b16 %v2102_v49  ;;  %v4175_v8 = vor.u32 %v4174_v10, %v4171_v45  ;;  %v3582_v57 = vpack.c.b16 %v3560_v44, %v3559_v46  ;;  %v2993_v15 = vshll.u32 %v7556_v56, 16  ;;  %v4708_v49 = vld [vmem:[#allocation2 + $0x60] sm:$0xe]  ;;  %v7634_v45 = vld [vmem:[#allocation2 + $0x2c] sm:$0x1] }
 0x20f   : > { %v7601_v43 = vpop.f32.mrf.mxu1  ;;  %v2099_v48 = vsel %vm6745_vm15, %v5813_v18, %v9001_v17  ;;  %v2107_v4 = vrot.slane %v9002_v0, 4  ;;  %v7628_v18 = vrot.slane %v4178_v35, 5  ;;  %v4184_v40 = vrot.slane %v4182_v30, 4  ;;  %v4060_v30 = vld [vmem:[#allocation2 + $0x48] sm:$0xf] }
 0x210   : > { %8998 = vst [vmem:[#allocation45_spill] sm:$0xff] %v7601_v43  ;;  %5828 = vmatmul.msk.bf16.vlgmr.msrb.gmra.mxu3 %vm1676_vm8, %v7469_v16  ;;  %v7625_v16 = vsel %vm6745_vm15, %v4812_v41, %v4813_v13  ;;  %v4486_v17 = vunpack.c.l.b16 %v4157_v28  ;;  %v2980_v60 = vor.u32 %v2979_v61, %v2976_v5  ;;  %v3499_v0 = vrot.slane %v7618_v34, 5  ;;  %v7654_v13 = vld [vmem:[#allocation2 + $0x28] sm:$0xf] }
 0x211   : > { %v4188_v50 = vshll.u32 %v7366_v21, 16  ;;  %v2991_v56 = vrot.slane %v2990_v14, 4  ;;  %v9003_v35 = vrot.slane %v7560_v52, 5  ;;  %v9004_v44 = vrot.slane %v7539_v31, 9  ;;  %v7659_v14 = vld [vmem:[#allocation2 + $0x8c] sm:$0x1] }
 0x212   : > { %5932 = vmatmul.msk.bf16.gmra.mxu1 %vm1676_vm8, %v3183_v22  ;;  %v2205_v22 = vunpack.c.l.b16 %v2099_v48  ;;  %v4516_v5 = vpack.c.b16 %v4487_v33, %v4486_v17  ;;  %v7646_v21 = vrot.slane %v4175_v8, 4  ;;  %v9005_v61 = vrot.slane %v7542_v37, 5 }
 0x213   : > { %v7630_v20 = vpop.f32.mrf.mxu3  ;;  %5965 = vmatmul.msk.bf16.gmra.mxu2 %vm1676_vm8, %v3582_v57  ;;  %v7644_v28 = vsel %vm6745_vm15, %v9004_v44, %v9003_v35  ;;  %v2995_v48 = vrot.slane %v2993_v15, 5  ;;  %v3373_v57 = vld [vmem:[#allocation2 + $0x84] sm:$0xe]  ;;  %v4185_v33 = vor.u32 %v4184_v40, %v7628_v18  ;;  %v6074_v8 = vrot.slane %v4708_v49, 9 }
 0x214   : > { %v7652_v41 = vsel %vm6745_vm15, %v2107_v4, %v9005_v61  ;;  %v2236_v31 = vpack.c.b16 %v2206_v32, %v2205_v22  ;;  %v2981_v17 = vrot.slane %v2980_v60, 4  ;;  %v3501_v37 = vrot.slane %v3499_v0, 4  ;;  %v2739_v49 = vld [vmem:[#allocation2 + $0x84] sm:$0xf] }
 0x215   : > { %v4190_v35 = vrot.slane %v4188_v50, 5  ;;  %v4193_v44 = vshrl.u32 %v4060_v30, 16  ;;  %v2996_v4 = vsel %vm6713_vm11, %v2991_v56, %v2995_v48  ;;  %v3007_v61 = vshll.u32 %v7618_v34, 16 }
 0x216   : > { %v3011_v32 = vshrl.u32 %v7618_v34, 16  ;;  %v9007_v15 = vrot.slane %v7578_v53, 5  ;;  %v5950_v40 = vrot.slane %v3373_v57, 9  ;;  %v3502_v60 = vrot.slane %v7659_v14, 5 }
 0x217   : > { %v7657_v46 = vpop.f32.mrf.mxu1  ;;  %v4196_v50 = vshll.u32 %v4060_v30, 16  ;;  %v4893_v10 = vunpack.c.l.b16 %v7625_v16  ;;  %v2986_v56 = vsel %vm6713_vm11, %v2981_v17, %v7594_v62  ;;  %v4186_v48 = vrot.slane %v4185_v33, 4 }
 0x218   : > { %9006 = vst [vmem:[#allocation48_spill] sm:$0xff] %v7657_v46  ;;  %6054 = vmatmul.msk.bf16.gmra.mxu0 %vm1676_vm8, %v4516_v5  ;;  %v4811_v22 = vsel %vm6745_vm15, %v6074_v8, %v9007_v15  ;;  %v7673_v5 = vpop.f32.mrf.mxu0  ;;  %v4202_v34 = vshll.u32 %v7432_v25, 16  ;;  %v4206_v52 = vshrl.u32 %v7432_v25, 16  ;;  %v3162_v57 = vunpack.c.l.b16 %v2996_v4 }
 0x219   : > { %9008 = vst [vmem:[#allocation49_spill] sm:$0xff] %v7673_v5  ;;  %v3500_v8 = vsel %vm6745_vm15, %v5950_v40, %v3499_v0  ;;  %v3503_v16 = vsel %vm6745_vm15, %v3501_v37, %v3502_v60  ;;  %v4892_v30 = vunpack.c.l.b16 %v4811_v22  ;;  %v2998_v15 = vshrl.u32 %v2739_v49, 16 }
 0x21a   : > { %v3001_v5 = vshll.u32 %v2739_v49, 16  ;;  %v7686_v46 = vrot.slane %v3007_v61, 5  ;;  %v3013_v62 = vrot.slane %v3011_v32, 4  ;;  %v3161_v33 = vunpack.c.l.b16 %v2986_v56  ;;  %v2041_v61 = vld [vmem:[#allocation2 + $0x24] sm:$0xe] }
 0x21b   : > { %v7680_v38 = vpop.f32.mrf.mxu3  ;;  %v4195_v17 = vrot.slane %v4193_v44, 4  ;;  %v4198_v43 = vrot.slane %v4196_v50, 5  ;;  %v7690_v25 = vpack.c.b16 %v4893_v10, %v4892_v30  ;;  %v3562_v27 = vunpack.c.l.b16 %v3503_v16  ;;  %v7706_v16 = vld [vmem:[#allocation2 + $0x94] sm:$0xf] }
 0x21c   : > { %v4181_v0 = vsel %vm6713_vm11, %v7646_v21, %v7628_v18  ;;  %v4191_v37 = vsel %vm6713_vm11, %v4186_v48, %v4190_v35  ;;  %v9011_v32 = vrot.slane %v7654_v13, 5  ;;  %v3184_v22 = vpack.c.b16 %v3162_v57, %v3161_v33  ;;  %v7712_v57 = vld [vmem:[#allocation2 + $0x74] sm:$0x1] }
 0x21d   : > { %9009 = vst [vmem:[#allocation50_spill] sm:$0xff] %v7690_v25  ;;  %v3561_v40 = vunpack.c.l.b16 %v3500_v8  ;;  %v7702_v60 = vrot.slane %v4202_v34, 5  ;;  %v4208_v10 = vrot.slane %v4206_v52, 4  ;;  %v3000_v49 = vrot.slane %v2998_v15, 4 }
 0x21e   : > { %v2114_v44 = vrot.slane %v9011_v32, 4  ;;  %v3003_v50 = vrot.slane %v3001_v5, 5  ;;  %v3014_v56 = vor.u32 %v3013_v62, %v7686_v46  ;;  %v4817_v18 = vrot.slane %v7688_v58, 5 }
 0x21f   : > { %v7692_v4 = vpop.f32.mrf.mxu1  ;;  %v2208_v21 = vunpack.c.l.b16 %v7652_v41  ;;  %v3017_v35 = vshll.u32 %v7659_v14, 16  ;;  %v4199_v48 = vor.u32 %v4198_v43, %v4195_v17  ;;  %v5815_v34 = vrot.slane %v2041_v61, 9 }
 0x220   : > { %9010 = vst [vmem:[#allocation51_spill] sm:$0xff] %v7692_v4  ;;  %5829 = vmatmul.msk.bf16.gmra.mxu3 %vm1676_vm8, %v2236_v31  ;;  %v3583_v52 = vpack.c.b16 %v3562_v27, %v3561_v40  ;;  %v4489_v31 = vunpack.c.l.b16 %v4191_v37  ;;  %v2207_v5 = vunpack.c.l.b16 %v7644_v28  ;;  %v9012_v8 = vrot.slane %v7634_v45, 5  ;;  %v7726_v33 = vpop.f32.mrf.mxu0 }
 0x221   : > { %v4488_v62 = vunpack.c.l.b16 %v4181_v0  ;;  %v3506_v41 = vrot.slane %v7706_v16, 5  ;;  %v4209_v43 = vor.u32 %v4208_v10, %v7702_v60  ;;  %v4212_v14 = vshll.u32 %v7443_v51, 16  ;;  %9013 = vst [vmem:[#allocation52_spill] sm:$0xff] %v7726_v33  ;;  %v4063_v51 = vld [vmem:[#allocation2 + $0x54] sm:$0xf] }
 0x222   : > { %5933 = vmatmul.msk.bf16.gmra.mxu1 %vm1676_vm8, %v3184_v22  ;;  %v7719_v30 = vsel %vm6745_vm15, %v2114_v44, %v9012_v8  ;;  %v3004_v27 = vor.u32 %v3003_v50, %v3000_v49  ;;  %v3015_v28 = vrot.slane %v3014_v56, 4  ;;  %v4819_v45 = vrot.slane %v4817_v18, 4  ;;  %v7740_v10 = vld [vmem:[#allocation2 + $0x98] sm:$0x1]  ;;  %v2742_v49 = vld [vmem:[#allocation2 + $0x90] sm:$0xf] }
 0x223   : > { %v7721_v15 = vpop.f32.mrf.mxu3  ;;  %5966 = vmatmul.msk.bf16.gmra.mxu2 %vm1676_vm8, %v3583_v52  ;;  %v4820_v17 = vrot.slane %v7712_v57, 5  ;;  %v2237_v37 = vpack.c.b16 %v2208_v21, %v2207_v5  ;;  %v3019_v61 = vrot.slane %v3017_v35, 5  ;;  %v7730_v32 = vrot.slane %v4199_v48, 4  ;;  %v4709_v52 = vld [vmem:[#allocation2 + $0x6c] sm:$0xe] }
 0x224   : > { %v9014_v0 = vrot.slane %v7654_v13, 5  ;;  %v4517_v40 = vpack.c.b16 %v4489_v31, %v4488_v62  ;;  %v3031_v50 = vshll.u32 %v7706_v16, 16  ;;  %v3035_v56 = vshrl.u32 %v7706_v16, 16  ;;  %v3374_v16 = vld [vmem:[#allocation2 + $0x90] sm:$0xe] }
 0x225   : > { %v4821_v21 = vsel %vm6745_vm15, %v4819_v45, %v4820_v17  ;;  %v3508_v35 = vrot.slane %v3506_v41, 4  ;;  %v4205_v13 = vsel %vm6713_vm11, %v7730_v32, %v7702_v60  ;;  %v4214_v48 = vrot.slane %v4212_v14, 5 }
 0x226   : > { %v7736_v44 = vsel %vm6745_vm15, %v5815_v34, %v9014_v0  ;;  %v2210_v34 = vunpack.c.l.b16 %v7719_v30  ;;  %v3005_v31 = vrot.slane %v3004_v27, 4  ;;  %v3020_v5 = vsel %vm6713_vm11, %v3015_v28, %v3019_v61 }
 0x227   : > { %v7738_v22 = vpop.f32.mrf.mxu1  ;;  %v4210_v8 = vrot.slane %v4209_v43, 4  ;;  %v4217_v62 = vshrl.u32 %v4063_v51, 16  ;;  %v3509_v45 = vrot.slane %v7740_v10, 5  ;;  %v3022_v17 = vshrl.u32 %v2742_v49, 16 }
 0x228   : > { %9015 = vst [vmem:[#allocation53_spill] sm:$0xff] %v7738_v22  ;;  %6055 = vmatmul.msk.bf16.gmra.mxu0 %vm1676_vm8, %v4517_v40  ;;  %v3025_v0 = vshll.u32 %v2742_v49, 16  ;;  %v4220_v33 = vshll.u32 %v4063_v51, 16  ;;  %v7755_v22 = vld [vmem:[#allocation2 + $0x7c] sm:$0xf]  ;;  %v3010_v60 = vsel %vm6713_vm11, %v3005_v31, %v7686_v46  ;;  %v7760_v30 = vrot.slane %v3031_v50, 5 }
 0x229   : > { %v3037_v14 = vrot.slane %v3035_v56, 4  ;;  %v6075_v27 = vrot.slane %v4709_v52, 9  ;;  %v3164_v28 = vunpack.c.l.b16 %v3020_v5  ;;  %v5951_v43 = vrot.slane %v3374_v16, 9  ;;  %v7773_v56 = vpop.f32.mrf.mxu2  ;;  %v7777_v16 = vpop.f32.mrf.mxu0 }
 0x22a   : > { %v3510_v61 = vsel %vm6745_vm15, %v3508_v35, %v3509_v45  ;;  %v4226_v40 = vshll.u32 %v7497_v59, 16  ;;  %v4215_v51 = vsel %vm6713_vm11, %v4210_v8, %v4214_v48  ;;  %v4230_v49 = vshrl.u32 %v7497_v59, 16  ;;  %9016 = vst [vmem:[#allocation54_spill] sm:$0xff] %v7773_v56  ;;  %v7784_v56 = vld [vmem:[#allocation2 + $0x80] sm:$0x1] }
 0x22b   : > { %v7762_v32 = vpop.f32.mrf.mxu3  ;;  %v4818_v46 = vsel %vm6745_vm15, %v6075_v27, %v4817_v18  ;;  %v3163_v52 = vunpack.c.l.b16 %v3010_v60  ;;  %v3507_v31 = vsel %vm6745_vm15, %v5951_v43, %v3506_v41  ;;  %v3024_v5 = vrot.slane %v3022_v17, 4  ;;  %9017 = vst [vmem:[#allocation55_spill] sm:$0xff] %v7777_v16 }
 0x22c   : > { %v3027_v35 = vrot.slane %v3025_v0, 5  ;;  %v3564_v48 = vunpack.c.l.b16 %v3510_v61  ;;  %v3038_v59 = vor.u32 %v3037_v14, %v7760_v30  ;;  %v4219_v8 = vrot.slane %v4217_v62, 4  ;;  %v2746_v14 = vld [vmem:[#allocation2 + $0xa0] sm:$0xf] }
 0x22d   : > { %v4895_v4 = vunpack.c.l.b16 %v4821_v21  ;;  %v3185_v18 = vpack.c.b16 %v3164_v28, %v3163_v52  ;;  %v4222_v27 = vrot.slane %v4220_v33, 5  ;;  %v7782_v50 = vrot.slane %v4226_v40, 5 }
 0x22e   : > { %v4894_v60 = vunpack.c.l.b16 %v4818_v46  ;;  %v3563_v41 = vunpack.c.l.b16 %v3507_v31  ;;  %v3041_v17 = vshll.u32 %v7740_v10, 16  ;;  %v4232_v0 = vrot.slane %v4230_v49, 4 }
 0x22f   : > { %v7779_v45 = vpop.f32.mrf.mxu1  ;;  %v9019_v43 = vrot.slane %v7755_v22, 5  ;;  %v4491_v62 = vunpack.c.l.b16 %v4215_v51  ;;  %v2209_v21 = vunpack.c.l.b16 %v7736_v44  ;;  %v3028_v33 = vor.u32 %v3027_v35, %v3024_v5  ;;  %v3375_v51 = vld [vmem:[#allocation2 + $0x9c] sm:$0xe] }
 0x230   : > { %9018 = vst [vmem:[#allocation56_spill] sm:$0xff] %v7779_v45  ;;  %5830 = vmatmul.msk.bf16.gmra.mxu3 %vm1676_vm8, %v2237_v37  ;;  %v7792_v28 = vpack.c.b16 %v4895_v4, %v4894_v60  ;;  %v3584_v40 = vpack.c.b16 %v3564_v48, %v3563_v41  ;;  %v3039_v46 = vrot.slane %v3038_v59, 4  ;;  %v3513_v52 = vrot.slane %v2746_v14, 5  ;;  %v7794_v37 = vld [vmem:[#allocation2 + $0x30] sm:$0xe] }
 0x231   : > { %v4826_v61 = vrot.slane %v9019_v43, 4  ;;  %v4827_v10 = vrot.slane %v7784_v56, 5  ;;  %v4490_v31 = vunpack.c.l.b16 %v4205_v13  ;;  %v7799_v43 = vpack.c.b16 %v2210_v34, %v2209_v21  ;;  %v2745_v35 = vld [vmem:[#allocation2 + $0x9c] sm:$0xf]  ;;  %v4710_v34 = vld [vmem:[#allocation2 + $0x78] sm:$0xe] }
 0x232   : > { %5934 = vmatmul.msk.bf16.gmra.mxu1 %vm1676_vm8, %v3185_v18  ;;  %9020 = vst [vmem:[#allocation57_spill] sm:$0xff] %v7792_v28  ;;  %v7801_v18 = vld [vmem:[#allocation2 + $0xa4] sm:$0x1]  ;;  %v3043_v44 = vrot.slane %v3041_v17, 5  ;;  %v4223_v4 = vor.u32 %v4222_v27, %v4219_v8  ;;  %v4233_v5 = vor.u32 %v4232_v0, %v7782_v50  ;;  %v3029_v60 = vrot.slane %v3028_v33, 4  ;;  %v7816_v33 = vpop.f32.mrf.mxu0 }
 0x233   : > { %v7797_v49 = vpop.f32.mrf.mxu3  ;;  %5967 = vmatmul.msk.bf16.gmra.mxu2 %vm1676_vm8, %v3584_v40  ;;  %v4828_v48 = vsel %vm6745_vm15, %v4826_v61, %v4827_v10  ;;  %v4518_v59 = vpack.c.b16 %v4491_v62, %v4490_v31  ;;  %v4236_v41 = vshll.u32 %v7507_v1, 16  ;;  %v5816_v13 = vrot.slane %v7794_v37, 9  ;;  %v7814_v62 = vpop.f32.mrf.mxu2  ;;  %9023 = vst [vmem:[#allocation60_spill] sm:$0xff] %v7816_v33  ;;  %v6345_v10 = vld [vmem:[#allocation2 + $0x34] sm:$0xf] }
 0x234   : > { %v3044_v40 = vsel %vm6713_vm11, %v3039_v46, %v3043_v44  ;;  %v5952_v17 = vrot.slane %v3375_v51, 9  ;;  %v3515_v8 = vrot.slane %v3513_v52, 4  ;;  %v3516_v27 = vrot.slane %v7801_v18, 5  ;;  %9022 = vst [vmem:[#allocation59_spill] sm:$0xff] %v7814_v62  ;;  %v4066_v44 = vld [vmem:[#allocation2 + $0x60] sm:$0xf] }
 0x235   : > { %v3046_v0 = vshrl.u32 %v2745_v35, 16  ;;  %v3049_v16 = vshll.u32 %v2745_v35, 16  ;;  %v3055_v45 = vshll.u32 %v2746_v14, 16  ;;  %v3059_v61 = vshrl.u32 %v2746_v14, 16 }
 0x236   : > { %v4224_v1 = vrot.slane %v4223_v4, 4  ;;  %v4234_v37 = vrot.slane %v4233_v5, 4  ;;  %v2119_v31 = vrot.slane %v6345_v10, 5  ;;  %v3034_v46 = vsel %vm6713_vm11, %v3029_v60, %v7760_v30 }
 0x237   : > { %v7809_v21 = vpop.f32.mrf.mxu1  ;;  %v4238_v51 = vrot.slane %v4236_v41, 5  ;;  %v4250_v35 = vshll.u32 %v7578_v53, 16  ;;  %v4254_v14 = vshrl.u32 %v7578_v53, 16  ;;  %v3166_v62 = vunpack.c.l.b16 %v3044_v40 }
 0x238   : > { %9021 = vst [vmem:[#allocation58_spill] sm:$0xff] %v7809_v21  ;;  %6056 = vmatmul.msk.bf16.gmra.mxu0 %vm1676_vm8, %v4518_v59  ;;  %v6076_v21 = vrot.slane %v4710_v34, 9  ;;  %v3514_v33 = vsel %vm6745_vm15, %v5952_v17, %v3513_v52  ;;  %v3517_v4 = vsel %vm6745_vm15, %v3515_v8, %v3516_v27  ;;  %v9024_v5 = vrot.slane %v7755_v22, 5 }
 0x239   : > { %v3048_v30 = vrot.slane %v3046_v0, 4  ;;  %v3051_v60 = vrot.slane %v3049_v16, 5  ;;  %v7834_v41 = vrot.slane %v3055_v45, 5  ;;  %v3061_v10 = vrot.slane %v3059_v61, 4 }
 0x23a   : > { %v4825_v59 = vsel %vm6745_vm15, %v6076_v21, %v9024_v5  ;;  %v3165_v53 = vunpack.c.l.b16 %v3034_v46  ;;  %v4229_v52 = vsel %vm6713_vm11, %v4224_v1, %v7782_v50  ;;  %v4239_v40 = vsel %vm6713_vm11, %v4234_v37, %v4238_v51  ;;  %v6346_v37 = vld [vmem:[#allocation2 + $0x38] sm:$0x1] }
 0x23b   : > { %v7832_v34 = vpop.f32.mrf.mxu3  ;;  %v4241_v17 = vshrl.u32 %v4066_v44, 16  ;;  %v4244_v8 = vshll.u32 %v4066_v44, 16  ;;  %v7841_v27 = vrot.slane %v4250_v35, 5  ;;  %v4896_v21 = vunpack.c.l.b16 %v4825_v59  ;;  %v7858_v59 = vpop.f32.mrf.mxu0 }
 0x23c   : > { %v4897_v5 = vunpack.c.l.b16 %v4828_v48  ;;  %v3186_v16 = vpack.c.b16 %v3166_v62, %v3165_v53  ;;  %v3565_v45 = vunpack.c.l.b16 %v3514_v33  ;;  %v3566_v0 = vunpack.c.l.b16 %v3517_v4  ;;  %9028 = vst [vmem:[#allocation64_spill] sm:$0xff] %v7858_v59  ;;  %v2043_v53 = vld [vmem:[#allocation2 + $0x3c] sm:$0xe] }
 0x23d   : > { %v4256_v61 = vrot.slane %v4254_v14, 4  ;;  %v3052_v46 = vor.u32 %v3051_v60, %v3048_v30  ;;  %v3062_v25 = vor.u32 %v3061_v10, %v7834_v41  ;;  %v3065_v50 = vshll.u32 %v7801_v18, 16  ;;  %v6347_v14 = vld [vmem:[#allocation2 + $0x40] sm:$0xf]  ;;  %v7856_v18 = vpop.f32.mrf.mxu2  ;;  %v2749_v60 = vld [vmem:[#allocation2 + $0xac] sm:$0xf] }
 0x23e   : > { %v7847_v1 = vpack.c.b16 %v4897_v5, %v4896_v21  ;;  %v2122_v51 = vrot.slane %v6346_v37, 5  ;;  %v7853_v48 = vsel %vm6745_vm15, %v5816_v13, %v2119_v31  ;;  %v2121_v62 = vrot.slane %v2119_v31, 4  ;;  %9027 = vst [vmem:[#allocation63_spill] sm:$0xff] %v7856_v18 }
 0x23f   : > { %v7843_v28 = vpop.f32.mrf.mxu1  ;;  %v4492_v33 = vunpack.c.l.b16 %v4229_v52  ;;  %v4493_v44 = vunpack.c.l.b16 %v4239_v40  ;;  %v4243_v35 = vrot.slane %v4241_v17, 4  ;;  %v2126_v4 = vrot.slane %v6347_v14, 5  ;;  %v7864_v17 = vld [vmem:[#allocation2 + $0xb0] sm:$0x1] }
 0x240   : > { %9025 = vst [vmem:[#allocation61_spill] sm:$0xff] %v7843_v28  ;;  %5831 = vmatmul.msk.bf16.gmra.mxu3 %vm1676_vm8, %v7799_v43  ;;  %v3585_v30 = vpack.c.b16 %v3566_v0, %v3565_v45  ;;  %v4246_v10 = vrot.slane %v4244_v8, 5  ;;  %v4257_v43 = vor.u32 %v4256_v61, %v7841_v27  ;;  %v4260_v13 = vshll.u32 %v7596_v36, 16  ;;  %v7866_v14 = vld [vmem:[#allocation2 + $0x50] sm:$0x1] }
 0x241   : > { %9026 = vst [vmem:[#allocation62_spill] sm:$0xff] %v7847_v1  ;;  %v3053_v21 = vrot.slane %v3052_v46, 4  ;;  %v3063_v52 = vrot.slane %v3062_v25, 4  ;;  %v3067_v40 = vrot.slane %v3065_v50, 5  ;;  %v3520_v5 = vrot.slane %v2749_v60, 5 }
 0x242   : > { %5935 = vmatmul.msk.bf16.gmra.mxu1 %vm1676_vm8, %v3186_v16  ;;  %v6348_v16 = vld [vmem:[#allocation2 + $0x44] sm:$0x1]  ;;  %v2211_v8 = vunpack.c.l.b16 %v7853_v48  ;;  %v3376_v36 = vld [vmem:[#allocation2 + $0xa8] sm:$0xe]  ;;  %v4519_v0 = vpack.c.b16 %v4493_v44, %v4492_v33  ;;  %v2123_v61 = vsel %vm6745_vm15, %v2121_v62, %v2122_v51  ;;  %v5817_v25 = vrot.slane %v2043_v53, 9 }
 0x243   : > { %v7862_v31 = vpop.f32.mrf.mxu3  ;;  %v2129_v37 = vrot.slane %v6348_v16, 5  ;;  %5968 = vmatmul.msk.bf16.gmra.mxu2 %vm1676_vm8, %v3585_v30  ;;  %v2128_v46 = vrot.slane %v2126_v4, 4  ;;  %v2748_v50 = vld [vmem:[#allocation2 + $0xa8] sm:$0xf]  ;;  %v3523_v16 = vrot.slane %v7864_v17, 5  ;;  %v4247_v28 = vor.u32 %v4246_v10, %v4243_v35 }
 0x244   : > { %v4258_v18 = vrot.slane %v4257_v43, 4  ;;  %v4262_v1 = vrot.slane %v4260_v13, 5  ;;  %v3058_v30 = vsel %vm6713_vm11, %v3053_v21, %v7834_v41  ;;  %v3068_v48 = vsel %vm6713_vm11, %v3063_v52, %v3067_v40  ;;  %v7886_v43 = vld [vmem:[#allocation2 + $0x4c] sm:$0xf] }
 0x245   : > { %v5953_v33 = vrot.slane %v3376_v36, 9  ;;  %v3522_v44 = vrot.slane %v3520_v5, 4  ;;  %v3070_v51 = vshrl.u32 %v2748_v50, 16  ;;  %v3073_v62 = vshll.u32 %v2748_v50, 16 }
 0x246   : > { %v3079_v53 = vshll.u32 %v2749_v60, 16  ;;  %v3083_v45 = vshrl.u32 %v2749_v60, 16  ;;  %v2127_v35 = vsel %vm6745_vm15, %v5817_v25, %v2126_v4  ;;  %v2130_v10 = vsel %vm6745_vm15, %v2128_v46, %v2129_v37  ;;  %v7899_v25 = vpop.f32.mrf.mxu2 }
 0x247   : > { %v7873_v59 = vpop.f32.mrf.mxu1  ;;  %v8937_v41 = vrot.slane %v7886_v43, 5  ;;  %v4248_v13 = vrot.slane %v4247_v28, 4  ;;  %v4263_v21 = vsel %vm6713_vm11, %v4258_v18, %v4262_v1  ;;  %v4274_v52 = vshll.u32 %v7688_v58, 16  ;;  %9030 = vst [vmem:[#allocation66_spill] sm:$0xff] %v7899_v25  ;;  %v7901_v28 = vpop.f32.mrf.mxu0 }
 0x248   : > { %9029 = vst [vmem:[#allocation65_spill] sm:$0xff] %v7873_v59  ;;  %6057 = vmatmul.msk.bf16.gmra.mxu0 %vm1676_vm8, %v4519_v0  ;;  %v2212_v59 = vunpack.c.l.b16 %v2123_v61  ;;  %v4278_v40 = vshrl.u32 %v7688_v58, 16  ;;  %v3167_v36 = vunpack.c.l.b16 %v3058_v30  ;;  %v3168_v0 = vunpack.c.l.b16 %v3068_v48  ;;  %v4069_v61 = vld [vmem:[#allocation2 + $0x6c] sm:$0xf] }
 0x249   : > { %v3521_v4 = vsel %vm6745_vm15, %v5953_v33, %v3520_v5  ;;  %v3524_v37 = vsel %vm6745_vm15, %v3522_v44, %v3523_v16  ;;  %9031 = vst [vmem:[#allocation67_spill] sm:$0xff] %v7901_v28  ;;  %v3072_v1 = vrot.slane %v3070_v51, 4  ;;  %v3075_v18 = vrot.slane %v3073_v62, 5 }
 0x24a   : > { %v7903_v46 = vrot.slane %v3079_v53, 5  ;;  %v3085_v58 = vrot.slane %v3083_v45, 4  ;;  %v2239_v50 = vpack.c.b16 %v2212_v59, %v2211_v8  ;;  %v4253_v30 = vsel %vm6713_vm11, %v4248_v13, %v7841_v27 }
 0x24b   : > { %v7893_v60 = vpop.f32.mrf.mxu3  ;;  %v2214_v48 = vunpack.c.l.b16 %v2130_v10  ;;  %v2135_v5 = vrot.slane %v8937_v41, 4  ;;  %v3567_v16 = vunpack.c.l.b16 %v3521_v4  ;;  %v3568_v33 = vunpack.c.l.b16 %v3524_v37 }
 0x24c   : > { %v4265_v44 = vshrl.u32 %v4069_v61, 16  ;;  %v4268_v25 = vshll.u32 %v4069_v61, 16  ;;  %v3187_v62 = vpack.c.b16 %v3168_v0, %v3167_v36  ;;  %v4495_v53 = vunpack.c.l.b16 %v4263_v21  ;;  %v2752_v21 = vld [vmem:[#allocation2 + $0xb8] sm:$0xf] }
 0x24d   : > { %v2213_v45 = vunpack.c.l.b16 %v2127_v35  ;;  %v3089_v59 = vshll.u32 %v7864_v17, 16  ;;  %v3076_v27 = vor.u32 %v3075_v18, %v3072_v1  ;;  %v3086_v8 = vor.u32 %v3085_v58, %v7903_v46 }
 0x24e   : > { %v7917_v10 = vrot.slane %v4274_v52, 5  ;;  %v4280_v13 = vrot.slane %v4278_v40, 4  ;;  %v4494_v4 = vunpack.c.l.b16 %v4253_v30  ;;  %v5818_v61 = vrot.slane %v7910_v47, 9  ;;  %v2751_v52 = vld [vmem:[#allocation2 + $0xb4] sm:$0xf] }
 0x24f   : > { %v7912_v51 = vpop.f32.mrf.mxu1  ;;  %v7920_v37 = vpack.c.b16 %v2214_v48, %v2213_v45  ;;  %v3586_v36 = vpack.c.b16 %v3568_v33, %v3567_v16  ;;  %v4267_v35 = vrot.slane %v4265_v44, 4  ;;  %v4270_v0 = vrot.slane %v4268_v25, 5  ;;  %v4072_v48 = vld [vmem:[#allocation2 + $0x78] sm:$0xf]  ;;  %v3377_v33 = vld [vmem:[#allocation2 + $0xb4] sm:$0xe] }
 0x250   : > { %9032 = vst [vmem:[#allocation68_spill] sm:$0xff] %v7912_v51  ;;  %5832 = vmatmul.msk.bf16.gmra.mxu3 %vm1676_vm8, %v2239_v50  ;;  %v9033_v17 = vrot.slane %v7866_v14, 5  ;;  %v4520_v40 = vpack.c.b16 %v4495_v53, %v4494_v4  ;;  %v3091_v58 = vrot.slane %v3089_v59, 5  ;;  %v3527_v50 = vrot.slane %v2752_v21, 5  ;;  %v2753_v14 = vld [vmem:[#allocation2 + $0xbc] sm:$0x1]  ;;  %v7935_v59 = vpop.f32.mrf.mxu2  ;;  %v7937_v4 = vpop.f32.mrf.mxu0 }
 0x251   : > { %v4284_v30 = vshll.u32 %v7712_v57, 16  ;;  %v3077_v25 = vrot.slane %v3076_v27, 4  ;;  %v3087_v16 = vrot.slane %v3086_v8, 4  ;;  %v3094_v44 = vshrl.u32 %v2751_v52, 16  ;;  %9035 = vst [vmem:[#allocation70_spill] sm:$0xff] %v7935_v59 }
 0x252   : > { %5936 = vmatmul.msk.bf16.gmra.mxu1 %vm1676_vm8, %v3187_v62  ;;  %v7927_v1 = vsel %vm6745_vm15, %v2135_v5, %v9033_v17  ;;  %v4281_v5 = vor.u32 %v4280_v13, %v7917_v10  ;;  %v3097_v62 = vshll.u32 %v2751_v52, 16  ;;  %v3103_v45 = vshll.u32 %v2752_v21, 16  ;;  %9036 = vst [vmem:[#allocation71_spill] sm:$0xff] %v7937_v4 }
 0x253   : > { %v2018_v18 = vpop.f32.mrf.mxu3  ;;  %5969 = vmatmul.msk.bf16.gmra.mxu2 %vm1676_vm8, %v3586_v36  ;;  %v3107_v53 = vshrl.u32 %v2752_v21, 16  ;;  %v4289_v57 = vshrl.u32 %v4072_v48, 16  ;;  %v4292_v17 = vshll.u32 %v4072_v48, 16  ;;  %v4302_v36 = vshrl.u32 %v7755_v22, 16 }
 0x254   : > { %v7931_v47 = vadd.f32 %v2018_v18, %v7630_v20  ;;  %v4298_v20 = vshll.u32 %v7755_v22, 16  ;;  %v5954_v27 = vrot.slane %v3377_v33, 9  ;;  %v3529_v8 = vrot.slane %v3527_v50, 4 }
 0x255   : > { %v3530_v18 = vrot.slane %v2753_v14, 5  ;;  %v4271_v41 = vor.u32 %v4270_v0, %v4267_v35  ;;  %v3082_v13 = vsel %vm6713_vm11, %v3077_v25, %v7903_v46  ;;  %v3092_v21 = vsel %vm6713_vm11, %v3087_v16, %v3091_v58 }
 0x256   : > { %9034 = vst [vmem:[#allocation69_spill] sm:$0xff] %v7931_v47  ;;  %v4282_v52 = vrot.slane %v4281_v5, 4  ;;  %v4286_v4 = vrot.slane %v4284_v30, 5  ;;  %v3096_v28 = vrot.slane %v3094_v44, 4  ;;  %v3099_v51 = vrot.slane %v3097_v62, 5 }
 0x257   : > { %v7947_v48 = vpop.f32.mrf.mxu1  ;;  %v7949_v22 = vrot.slane %v3103_v45, 5  ;;  %v3109_v33 = vrot.slane %v3107_v53, 4  ;;  %v4291_v59 = vrot.slane %v4289_v57, 4  ;;  %v4294_v35 = vrot.slane %v4292_v17, 5 }
 0x258   : > { %6058 = vmatmul.msk.bf16.gmra.mxu0 %vm1676_vm8, %v4520_v40  ;;  %9037 = vst [vmem:[#allocation72_spill] sm:$0xff] %v7947_v48  ;;  %v7951_v0 = vrot.slane %v4298_v20, 5  ;;  %v4304_v40 = vrot.slane %v4302_v36, 4  ;;  %v3169_v6 = vunpack.c.l.b16 %v3082_v13  ;;  %v3170_v46 = vunpack.c.l.b16 %v3092_v21  ;;  %v2755_v36 = vld [vmem:[#allocation2 + $0xc4] sm:$0xf] }
 0x259   : > { %v3528_v58 = vsel %vm6745_vm15, %v5954_v27, %v3527_v50  ;;  %v3531_v30 = vsel %vm6745_vm15, %v3529_v8, %v3530_v18  ;;  %v4272_v16 = vrot.slane %v4271_v41, 4  ;;  %v4287_v5 = vsel %vm6713_vm11, %v4282_v52, %v4286_v4  ;;  %v7967_v50 = vld [vmem:[#allocation2 + $0x58] sm:$0xf]  ;;  %v7985_v21 = vld [vmem:[#allocation2 + $0xc8] sm:$0x1] }
 0x25a   : > { %v3113_v44 = vshll.u32 %v2753_v14, 16  ;;  %v9038_v62 = vrot.slane %v7886_v43, 5  ;;  %v3100_v53 = vor.u32 %v3099_v51, %v3096_v28  ;;  %v3110_v57 = vor.u32 %v3109_v33, %v7949_v22  ;;  %v7975_v51 = vpop.f32.mrf.mxu2  ;;  %v3378_v52 = vld [vmem:[#allocation2 + $0xc0] sm:$0xe]  ;;  %v7987_v33 = vld [vmem:[#allocation2 + $0x5c] sm:$0x1] }
 0x25b   : > { %v2020_v47 = vpop.f32.mrf.mxu3  ;;  %v8938_v17 = vrot.slane %v7967_v50, 5  ;;  %v3569_v20 = vunpack.c.l.b16 %v3528_v58  ;;  %v4277_v41 = vsel %vm6713_vm11, %v4272_v16, %v7917_v10  ;;  %v3188_v14 = vpack.c.b16 %v3170_v46, %v3169_v6  ;;  %9039 = vst [vmem:[#allocation73_spill] sm:$0xff] %v7975_v51  ;;  %v7982_v10 = vld [vmem:[#allocation2 + $0x88] sm:$0xf] }
 0x25c   : > { %v7958_v25 = vadd.f32 %v2020_v47, %v7680_v38  ;;  %v2134_v45 = vsel %vm6745_vm15, %v5818_v61, %v9038_v62  ;;  %v3570_v38 = vunpack.c.l.b16 %v3531_v30  ;;  %v4295_v47 = vor.u32 %v4294_v35, %v4291_v59  ;;  %v7977_v61 = vpop.f32.mrf.mxu0  ;;  %v7998_v62 = vld [vmem:[#allocation2 + $0x84] sm:$0xf] }
 0x25d   : > { %v4497_v4 = vunpack.c.l.b16 %v4287_v5  ;;  %v2216_v43 = vunpack.c.l.b16 %v7927_v1  ;;  %v4305_v28 = vor.u32 %v4304_v40, %v7951_v0  ;;  %9040 = vst [vmem:[#allocation74_spill] sm:$0xff] %v7977_v61  ;;  %v3115_v27 = vrot.slane %v3113_v44, 5  ;;  %v2754_v44 = vld [vmem:[#allocation2 + $0xc0] sm:$0xf] }
 0x25e   : > { %v3534_v8 = vrot.slane %v2755_v36, 5  ;;  %v4308_v18 = vshll.u32 %v7784_v56, 16  ;;  %v4496_v6 = vunpack.c.l.b16 %v4277_v41  ;;  %v2215_v1 = vunpack.c.l.b16 %v2134_v45  ;;  %v4711_v41 = vld [vmem:[#allocation2 + $0x84] sm:$0xe] }
 0x25f   : > { %v3101_v59 = vrot.slane %v3100_v53, 4  ;;  %v3111_v13 = vrot.slane %v3110_v57, 4  ;;  %v4296_v40 = vrot.slane %v4295_v47, 4  ;;  %v7992_v56 = vrot.slane %v8938_v17, 4  ;;  %v7994_v46 = vpop.f32.mrf.mxu1 }
 0x260   : > { %5833 = vmatmul.msk.bf16.gmra.mxu3 %vm1676_vm8, %v7920_v37  ;;  %v3587_v37 = vpack.c.b16 %v3570_v38, %v3569_v20  ;;  %9041 = vst [vmem:[#allocation75_spill] sm:$0xff] %v7994_v46  ;;  %v4521_v30 = vpack.c.b16 %v4497_v4, %v4496_v6  ;;  %v7996_v16 = vpack.c.b16 %v2216_v43, %v2215_v1  ;;  %v4306_v5 = vrot.slane %v4305_v28, 4 }
 0x261   : > { %v4831_v45 = vrot.slane %v7982_v10, 5  ;;  %v5955_v57 = vrot.slane %v3378_v52, 9  ;;  %v3536_v20 = vrot.slane %v3534_v8, 4  ;;  %v3537_v38 = vrot.slane %v7985_v21, 5  ;;  %v8014_v52 = vld [vmem:[#allocation2 + $0x8c] sm:$0x1] }
 0x262   : > { %5937 = vmatmul.msk.bf16.gmra.mxu1 %vm1676_vm8, %v3188_v14  ;;  %v3106_v47 = vsel %vm6713_vm11, %v3101_v59, %v7949_v22  ;;  %v3116_v14 = vsel %vm6713_vm11, %v3111_v13, %v3115_v27  ;;  %v4301_v4 = vsel %vm6713_vm11, %v4296_v40, %v7951_v0  ;;  %v3118_v43 = vshrl.u32 %v2754_v44, 16 }
 0x263   : > { %v2023_v58 = vpop.f32.mrf.mxu3  ;;  %5970 = vmatmul.msk.bf16.gmra.mxu2 %vm1676_vm8, %v3587_v37  ;;  %v3121_v28 = vshll.u32 %v2754_v44, 16  ;;  %v3127_v6 = vshll.u32 %v2755_v36, 16  ;;  %v3131_v1 = vshrl.u32 %v2755_v36, 16  ;;  %v6077_v22 = vrot.slane %v4711_v41, 9  ;;  %v8029_v41 = vpop.f32.mrf.mxu2 }
 0x264   : > { %v8002_v53 = vadd.f32 %v2023_v58, %v7721_v15  ;;  %v4310_v15 = vrot.slane %v4308_v18, 5  ;;  %v4313_v58 = vshrl.u32 %v7998_v62, 16  ;;  %v4833_v59 = vrot.slane %v4831_v45, 4  ;;  %9042 = vst [vmem:[#allocation76_spill] sm:$0xff] %v8029_v41 }
 0x265   : > { %v3535_v27 = vsel %vm6745_vm15, %v5955_v57, %v3534_v8  ;;  %v3538_v0 = vsel %vm6745_vm15, %v3536_v20, %v3537_v38  ;;  %v4322_v18 = vshll.u32 %v7982_v10, 16  ;;  %v4326_v36 = vshrl.u32 %v7982_v10, 16 }
 0x266   : > { %v4311_v37 = vsel %vm6713_vm11, %v4306_v5, %v4310_v15  ;;  %v3171_v13 = vunpack.c.l.b16 %v3106_v47  ;;  %v3172_v40 = vunpack.c.l.b16 %v3116_v14  ;;  %v4832_v5 = vsel %vm6745_vm15, %v6077_v22, %v4831_v45 }
 0x267   : > { %v4834_v44 = vrot.slane %v8014_v52, 5  ;;  %v3120_v15 = vrot.slane %v3118_v43, 4  ;;  %v3123_v8 = vrot.slane %v3121_v28, 5  ;;  %v8033_v57 = vrot.slane %v3127_v6, 5  ;;  %v8046_v28 = vld [vmem:[#allocation2 + $0x94] sm:$0xf] }
 0x268   : > { %6059 = vmatmul.msk.bf16.gmra.mxu0 %vm1676_vm8, %v4521_v30  ;;  %v8031_v30 = vpop.f32.mrf.mxu0  ;;  %v3133_v20 = vrot.slane %v3131_v1, 4  ;;  %v3571_v17 = vunpack.c.l.b16 %v3535_v27  ;;  %v3572_v35 = vunpack.c.l.b16 %v3538_v0  ;;  %v3137_v10 = vshll.u32 %v7985_v21, 16  ;;  %v4712_v6 = vld [vmem:[#allocation2 + $0x90] sm:$0xe]  ;;  %v8048_v1 = vpop.f32.mrf.mxu1 }
 0x269   : > { %9043 = vst [vmem:[#allocation77_spill] sm:$0xff] %v8031_v30  ;;  %v4835_v47 = vsel %vm6745_vm15, %v4833_v59, %v4834_v44  ;;  %v8041_v14 = vunpack.c.l.b16 %v4301_v4  ;;  %v8043_v22 = vrot.slane %v4313_v58, 4  ;;  %v4316_v43 = vshll.u32 %v7998_v62, 16  ;;  %v8054_v59 = vld [vmem:[#allocation2 + $0x98] sm:$0x1] }
 0x26a   : > { %9045 = vst [vmem:[#allocation79_spill] sm:$0xff] %v8048_v1  ;;  %v3189_v27 = vpack.c.b16 %v3172_v40, %v3171_v13  ;;  %v4499_v0 = vunpack.c.l.b16 %v4311_v37  ;;  %v8050_v21 = vrot.slane %v4322_v18, 5  ;;  %v8052_v30 = vrot.slane %v4326_v36, 4  ;;  %v8057_v44 = vld [vmem:[#allocation2 + $0xa0] sm:$0xf] }
 0x26b   : > { %v2025_v38 = vpop.f32.mrf.mxu3  ;;  %v3124_v4 = vor.u32 %v3123_v8, %v3120_v15  ;;  %v3134_v58 = vor.u32 %v3133_v20, %v8033_v57  ;;  %v8059_v62 = vld [vmem:[#allocation2 + $0xa4] sm:$0x1]  ;;  %v4899_v61 = vunpack.c.l.b16 %v4835_v47  ;;  %v3588_v46 = vpack.c.b16 %v3572_v35, %v3571_v17  ;;  %v8061_v13 = vld [vmem:[#allocation2 + $0xb0] sm:$0x1]  ;;  %v4714_v20 = vld [vmem:[#allocation2 + $0xa8] sm:$0xe] }
 0x26c   : > { %v8039_v45 = vadd.f32 %v2025_v38, %v7762_v32  ;;  %v4713_v32 = vld [vmem:[#allocation2 + $0x9c] sm:$0xe]  ;;  %v4898_v38 = vunpack.c.l.b16 %v4832_v5  ;;  %v3139_v1 = vrot.slane %v3137_v10, 5  ;;  %v6078_v37 = vrot.slane %v4712_v6, 9 }
 0x26d   : > { %v4838_v18 = vrot.slane %v8046_v28, 5  ;;  %v4841_v40 = vrot.slane %v8054_v59, 5  ;;  %v6079_v15 = vrot.slane %v4713_v32, 9  ;;  %v4845_v8 = vrot.slane %v8057_v44, 5 }
 0x26e   : > { %9044 = vst [vmem:[#allocation78_spill] sm:$0xff] %v8039_v45  ;;  %v8066_v36 = vpack.c.b16 %v4899_v61, %v4898_v38  ;;  %v4848_v5 = vrot.slane %v8059_v62, 5  ;;  %v6080_v10 = vrot.slane %v4714_v20, 9  ;;  %v3125_v47 = vrot.slane %v3124_v4, 4 }
 0x26f   : > { %v4839_v17 = vsel %vm6745_vm15, %v6078_v37, %v4838_v18  ;;  %v4840_v35 = vrot.slane %v4838_v18, 4  ;;  %v3135_v6 = vrot.slane %v3134_v58, 4  ;;  %v4846_v61 = vsel %vm6745_vm15, %v6079_v15, %v4845_v8  ;;  %v8082_v18 = vpop.f32.mrf.mxu2  ;;  %v2045_v58 = vld [vmem:[#allocation2 + $0x54] sm:$0xe] }
 0x270   : > { %5834 = vmatmul.msk.bf16.gmra.mxu3 %vm1676_vm8, %v7996_v16  ;;  %v8074_v16 = vld [vmem:[#allocation2 + $0xac] sm:$0xf]  ;;  %v4847_v32 = vrot.slane %v4845_v8, 4  ;;  %v4855_v37 = vrot.slane %v8061_v13, 5  ;;  %9046 = vst [vmem:[#allocation80_spill] sm:$0xff] %v8082_v18  ;;  %v8084_v20 = vpop.f32.mrf.mxu0  ;;  %v4900_v15 = vunpack.c.l.b16 %v4839_v17  ;;  %v4522_v18 = vpack.c.b16 %v4499_v0, %v8041_v14 }
 0x271   : > { %v4842_v48 = vsel %vm6745_vm15, %v4840_v35, %v4841_v40  ;;  %v4852_v41 = vrot.slane %v8074_v16, 5  ;;  %9047 = vst [vmem:[#allocation81_spill] sm:$0xff] %v8084_v20  ;;  %v4318_v35 = vrot.slane %v4316_v43, 5  ;;  %v8099_v20 = vpop.f32.mrf.mxu1  ;;  %v9048_v17 = vrot.slane %v7987_v33, 5 }
 0x272   : > { %5938 = vmatmul.msk.bf16.gmra.mxu1 %vm1676_vm8, %v3189_v27  ;;  %v4902_v27 = vunpack.c.l.b16 %v4846_v61  ;;  %v4901_v8 = vunpack.c.l.b16 %v4842_v48  ;;  %v4849_v40 = vsel %vm6745_vm15, %v4847_v32, %v4848_v5  ;;  %v5819_v48 = vrot.slane %v2045_v58, 9 }
 0x273   : > { %v2028_v38 = vpop.f32.mrf.mxu3  ;;  %5971 = vmatmul.msk.bf16.gmra.mxu2 %vm1676_vm8, %v3588_v46  ;;  %v4903_v61 = vunpack.c.l.b16 %v4849_v40  ;;  %v4853_v51 = vsel %vm6745_vm15, %v6080_v10, %v4852_v41  ;;  %v4854_v45 = vrot.slane %v4852_v41, 4  ;;  %v2144_v43 = vsel %vm6745_vm15, %v7992_v56, %v9048_v17  ;;  %v8131_v40 = vld [vmem:[#allocation2 + $0xb8] sm:$0xf]  ;;  %v4715_v17 = vld [vmem:[#allocation2 + $0xb4] sm:$0xe] }
 0x274   : > { %v8087_v4 = vadd.f32 %v2028_v38, %v7797_v49  ;;  %v4329_v49 = vor.u32 %v8052_v30, %v8050_v21  ;;  %v8097_v38 = vpack.c.b16 %v4901_v8, %v4900_v15  ;;  %v4904_v46 = vunpack.c.l.b16 %v4853_v51  ;;  %v6353_v8 = vld [vmem:[#allocation2 + $0x64] sm:$0xf] }
 0x275   : > { %v8106_v5 = vpack.c.b16 %v4903_v61, %v4902_v27  ;;  %v4856_v41 = vsel %vm6745_vm15, %v4854_v45, %v4855_v37  ;;  %v3130_v51 = vsel %vm6713_vm11, %v3125_v47, %v8033_v57  ;;  %v3140_v30 = vsel %vm6713_vm11, %v3135_v6, %v3139_v1 }
 0x276   : > { %v4332_v33 = vshll.u32 %v8014_v52, 16  ;;  %v4905_v14 = vunpack.c.l.b16 %v4856_v41  ;;  %v9049_v0 = vrot.slane %v7967_v50, 5  ;;  %v2218_v10 = vunpack.c.l.b16 %v2144_v43 }
 0x277   : > { %v4319_v45 = vor.u32 %v4318_v35, %v8043_v22  ;;  %v4330_v32 = vrot.slane %v4329_v49, 4  ;;  %v3174_v57 = vunpack.c.l.b16 %v3140_v30  ;;  %v2147_v22 = vrot.slane %v6353_v8, 5  ;;  %v8133_v35 = vld [vmem:[#allocation2 + $0xbc] sm:$0x1]  ;;  %v4078_v49 = vld [vmem:[#allocation2 + $0x90] sm:$0xf] }
 0x278   : > { %6060 = vmatmul.msk.bf16.gmra.mxu0 %vm1676_vm8, %v4522_v18  ;;  %v2141_v56 = vsel %vm6745_vm15, %v5819_v48, %v9049_v0  ;;  %v8122_v27 = vpack.c.b16 %v4905_v14, %v4904_v46  ;;  %v3173_v18 = vunpack.c.l.b16 %v3130_v51  ;;  %v4334_v52 = vrot.slane %v4332_v33, 5  ;;  %v8127_v6 = vpop.f32.mrf.mxu0 }
 0x279   : > { %v2217_v1 = vunpack.c.l.b16 %v2141_v56  ;;  %9050 = vst [vmem:[#allocation82_spill] sm:$0xff] %v8127_v6  ;;  %v4320_v58 = vrot.slane %v4319_v45, 4  ;;  %v4350_v46 = vshrl.u32 %v8046_v28, 16  ;;  %v4859_v48 = vrot.slane %v8131_v40, 5  ;;  %v8139_v43 = vpop.f32.mrf.mxu1 }
 0x27a   : > { %v4335_v15 = vsel %vm6713_vm11, %v4330_v32, %v4334_v52  ;;  %v3190_v61 = vpack.c.b16 %v3174_v57, %v3173_v18  ;;  %v6081_v51 = vrot.slane %v4715_v17, 9  ;;  %v4862_v33 = vrot.slane %v8133_v35, 5 }
 0x27b   : > { %v2030_v37 = vpop.f32.mrf.mxu3  ;;  %v2242_v50 = vpack.c.b16 %v2218_v10, %v2217_v1  ;;  %v4325_v41 = vsel %vm6713_vm11, %v4320_v58, %v8050_v21  ;;  %v4861_v30 = vrot.slane %v4859_v48, 4  ;;  %v4501_v14 = vunpack.c.l.b16 %v4335_v15  ;;  %v2046_v1 = vld [vmem:[#allocation2 + $0x60] sm:$0xe]  ;;  %v6354_v58 = vld [vmem:[#allocation2 + $0x68] sm:$0x1] }
 0x27c   : > { %v8125_v47 = vadd.f32 %v2030_v37, %v7832_v34  ;;  %v4346_v34 = vshll.u32 %v8046_v28, 16  ;;  %v2149_v0 = vrot.slane %v2147_v22, 4  ;;  %v4337_v28 = vshrl.u32 %v4078_v49, 16 }
 0x27d   : > { %v4340_v56 = vshll.u32 %v4078_v49, 16  ;;  %v4352_v32 = vrot.slane %v4350_v46, 4  ;;  %v4860_v37 = vsel %vm6745_vm15, %v6081_v51, %v4859_v48  ;;  %v4863_v18 = vsel %vm6745_vm15, %v4861_v30, %v4862_v33 }
 0x27e   : > { %v4348_v45 = vrot.slane %v4346_v34, 5  ;;  %v4500_v21 = vunpack.c.l.b16 %v4325_v41  ;;  %v4906_v52 = vunpack.c.l.b16 %v4860_v37  ;;  %v2150_v15 = vrot.slane %v6354_v58, 5 }
 0x27f   : > { %v4342_v49 = vrot.slane %v4340_v56, 5  ;;  %v5820_v46 = vrot.slane %v2046_v1, 9  ;;  %v4356_v30 = vshll.u32 %v8054_v59, 16 }
 0x280   : > { %5835 = vmatmul.msk.bf16.gmra.mxu3 %vm1676_vm8, %v2242_v50  ;;  %v4907_v50 = vunpack.c.l.b16 %v4863_v18  ;;  %v4523_v8 = vpack.c.b16 %v4501_v14, %v4500_v21  ;;  %v2151_v48 = vsel %vm6745_vm15, %v2149_v0, %v2150_v15  ;;  %v4353_v17 = vor.u32 %v4352_v32, %v4348_v45  ;;  %v8157_v51 = vpop.f32.mrf.mxu0  ;;  %v4081_v32 = vld [vmem:[#allocation2 + $0x9c] sm:$0xf] }
 0x281   : > { %9051 = vst [vmem:[#allocation83_spill] sm:$0xff] %v8157_v51  ;;  %v2148_v41 = vsel %vm6745_vm15, %v5820_v46, %v2147_v22  ;;  %v2220_v14 = vunpack.c.l.b16 %v2151_v48  ;;  %v8167_v0 = vpop.f32.mrf.mxu1  ;;  %v4358_v21 = vrot.slane %v4356_v30, 5  ;;  %v6355_v22 = vld [vmem:[#allocation2 + $0x70] sm:$0xf]  ;;  %v4361_v59 = vshrl.u32 %v4081_v32, 16 }
 0x282   : > { %5939 = vmatmul.msk.bf16.gmra.mxu1 %vm1676_vm8, %v3190_v61  ;;  %v4339_v61 = vrot.slane %v4337_v28, 4  ;;  %v8153_v34 = vpack.c.b16 %v4907_v50, %v4906_v52  ;;  %v2219_v18 = vunpack.c.l.b16 %v2148_v41  ;;  %v2154_v50 = vrot.slane %v6355_v22, 5 }
 0x283   : > { %v2033_v10 = vpop.f32.mrf.mxu3  ;;  %v4364_v15 = vshll.u32 %v4081_v32, 16  ;;  %v4363_v41 = vrot.slane %v4361_v59, 4  ;;  %v4084_v59 = vld [vmem:[#allocation2 + $0xa8] sm:$0xf] }
 0x284   : > { %v8151_v57 = vadd.f32 %v2033_v10, %v7862_v31  ;;  %v5184_v31 = vld [vmem:[%s8931_s5] sm:$0x3]  ;;  %v4343_v28 = vor.u32 %v4342_v49, %v4339_v61  ;;  %v4354_v10 = vrot.slane %v4353_v17, 4  ;;  %v2243_v1 = vpack.c.b16 %v2220_v14, %v2219_v18 }
 0x285   : > { %v5238_v33 = vsel %vm1725_vm6, %v5184_v31, 0  ;;  %v4374_v61 = vshrl.u32 %v8057_v44, 16  ;;  %v2156_v48 = vrot.slane %v2154_v50, 4  ;;  %v2047_v31 = vld [vmem:[#allocation2 + $0x6c] sm:$0xe]  ;;  %v4366_v30 = vrot.slane %v4364_v15, 5 }
 0x286   : > { %5247 = vmatpush.bf16.msra.mxu2 %v5238_v33  ;;  %v4344_v52 = vrot.slane %v4343_v28, 4  ;;  %v4359_v58 = vsel %vm6713_vm11, %v4354_v10, %v4358_v21 }
 0x287   : > { %v4503_v46 = vunpack.c.l.b16 %v4359_v58  ;;  %v4376_v14 = vrot.slane %v4374_v61, 4  ;;  %v4367_v21 = vor.u32 %v4366_v30, %v4363_v41  ;;  %v6357_v30 = vld [vmem:[#allocation2 + $0x7c] sm:$0xf] }
 0x288   : > { %6061 = vmatmul.msk.bf16.gmra.mxu0 %vm1676_vm8, %v4523_v8  ;;  %v4370_v8 = vshll.u32 %v8057_v44, 16  ;;  %v8181_v49 = vpop.f32.mrf.mxu0 }
 0x289   : > { %9052 = vst [vmem:[#allocation84_spill] sm:$0xff] %v8181_v49  ;;  %v4368_v15 = vrot.slane %v4367_v21, 4 }
 0x28a   : > { %v4372_v33 = vrot.slane %v4370_v8, 5 }
 0x28b   : > { %v2035_v56 = vpop.f32.mrf.mxu3 }
 0x28c   : > { %v8170_v37 = vadd.f32 %v2035_v56, %v7893_v60  ;;  %v4349_v60 = vsel %vm6713_vm11, %v4344_v52, %v4348_v45  ;;  %v6356_v56 = vld [vmem:[#allocation2 + $0x74] sm:$0x1]  ;;  %v5821_v45 = vrot.slane %v2047_v31, 9  ;;  %v4380_v52 = vshll.u32 %v8059_v62, 16 }
 0x28d   : > { %v4502_v28 = vunpack.c.l.b16 %v4349_v60  ;;  %v2157_v10 = vrot.slane %v6356_v56, 5  ;;  %v4394_v31 = vshll.u32 %v8074_v16, 16  ;;  %v4398_v62 = vshrl.u32 %v8074_v16, 16 }
 0x28e   : > { %v4382_v61 = vrot.slane %v4380_v52, 5 }
 0x28f   : > { %v4524_v32 = vpack.c.b16 %v4503_v46, %v4502_v28  ;;  %v2158_v18 = vsel %vm6745_vm15, %v2156_v48, %v2157_v10  ;;  %v4385_v48 = vshrl.u32 %v4084_v59, 16  ;;  %v4373_v28 = vsel %vm6713_vm11, %v4368_v15, %v4372_v33 }
 0x290   : > { %5836 = vmatmul.msk.bf16.gmra.mxu3 %vm1676_vm8, %v2243_v1  ;;  %v4377_v1 = vor.u32 %v4376_v14, %v4372_v33  ;;  %v2222_v22 = vunpack.c.l.b16 %v2158_v18  ;;  %v8196_v60 = vpop.f32.mrf.mxu0  ;;  %v2161_v14 = vrot.slane %v6357_v30, 5  ;;  %v4400_v16 = vrot.slane %v4398_v62, 4 }
 0x291   : > { %9053 = vst [vmem:[#allocation85_spill] sm:$0xff] %v8196_v60  ;;  %v4387_v10 = vrot.slane %v4385_v48, 4  ;;  %v4504_v18 = vunpack.c.l.b16 %v4373_v28 }
 0x292   : > { %6084 = vmatmul.msk.bf16.vlgmr.msra.gmra.mxu1 %vm1676_vm8, %v7292_v63  ;;  %v8186_v63 = vpop.f32.mrf.mxu1  ;;  %v4378_v8 = vrot.slane %v4377_v1, 4  ;;  %v2163_v1 = vrot.slane %v2161_v14, 4 }
 0x293   : > { %v2311_v17 = vpop.f32.mrf.mxu3 }
 0x294   : > { %v8184_v44 = vadd.f32 %v2311_v17, %v6923_v19  ;;  %v2155_v19 = vsel %vm6745_vm15, %v5821_v45, %v2154_v50  ;;  %v4388_v17 = vshll.u32 %v4084_v59, 16  ;;  %v4383_v56 = vsel %vm6713_vm11, %v4378_v8, %v4382_v61 }
 0x295   : > { %v2221_v46 = vunpack.c.l.b16 %v2155_v19  ;;  %v4396_v45 = vrot.slane %v4394_v31, 5  ;;  %v4505_v21 = vunpack.c.l.b16 %v4383_v56  ;;  %v2048_v19 = vld [vmem:[#allocation2 + $0x78] sm:$0xe]  ;;  %v4404_v61 = vshll.u32 %v8061_v13, 16 }
 0x296   : > { %v5822_v48 = vrot.slane %v2048_v19, 9  ;;  %v4422_v19 = vshrl.u32 %v8131_v40, 16 }
 0x297   : > { %v2244_v41 = vpack.c.b16 %v2222_v22, %v2221_v46  ;;  %v6358_v22 = vld [vmem:[#allocation2 + $0x80] sm:$0x1]  ;;  %v4401_v8 = vor.u32 %v4400_v16, %v4396_v45  ;;  %v4406_v28 = vrot.slane %v4404_v61, 5 }
 0x298   : > { %6062 = vmatmul.msk.bf16.gmra.mxu0 %vm1676_vm8, %v4524_v32  ;;  %v4390_v32 = vrot.slane %v4388_v17, 5  ;;  %v2164_v59 = vrot.slane %v6358_v22, 5  ;;  %v8213_v46 = vpop.f32.mrf.mxu0  ;;  %v2162_v31 = vsel %vm6745_vm15, %v5822_v48, %v2161_v14  ;;  %v6359_v22 = vld [vmem:[#allocation2 + $0x88] sm:$0xf]  ;;  %v4424_v48 = vrot.slane %v4422_v19, 4 }
 0x299   : > { %v4402_v30 = vrot.slane %v4401_v8, 4  ;;  %v2223_v13 = vunpack.c.l.b16 %v2162_v31 }
 0x29a   : > { %v8200_v50 = vpop.f32.mrf.mxu1  ;;  %v4391_v15 = vor.u32 %v4390_v32, %v4387_v10  ;;  %v2165_v17 = vsel %vm6745_vm15, %v2163_v1, %v2164_v59  ;;  %v4087_v10 = vld [vmem:[#allocation2 + $0xb4] sm:$0xf]  ;;  %v2168_v59 = vrot.slane %v6359_v22, 5 }
 0x29b   : > { %v8194_v58 = vpop.f32.mrf.mxu3  ;;  %v4409_v14 = vshrl.u32 %v4087_v10, 16  ;;  %v4412_v1 = vshll.u32 %v4087_v10, 16 }
 0x29d   : > { %v4411_v8 = vrot.slane %v4409_v14, 4  ;;  %v4414_v61 = vrot.slane %v4412_v1, 5 }
 0x2a0   : > { %5837 = vmatmul.msk.bf16.gmra.mxu3 %vm1676_vm8, %v2244_v41  ;;  %v4392_v41 = vrot.slane %v4391_v15, 4  ;;  %v8231_v15 = vpop.f32.mrf.mxu0 }
 0x2a2   : > { %6085 = vmatmul.msk.bf16.gmra.mxu1 %vm1676_vm8, %v7315_v23  ;;  %v4525_v23 = vpack.c.b16 %v4505_v21, %v4504_v18  ;;  %v8220_v62 = vpop.f32.mrf.mxu1  ;;  %v4397_v18 = vsel %vm6713_vm11, %v4392_v41, %v4396_v45  ;;  %v4407_v21 = vsel %vm6713_vm11, %v4402_v30, %v4406_v28  ;;  %v2049_v41 = vld [vmem:[#allocation2 + $0x84] sm:$0xe]  ;;  %v6360_v30 = vld [vmem:[#allocation2 + $0x8c] sm:$0x1] }
 0x2a3   : > { %v2316_v52 = vpop.f32.mrf.mxu3  ;;  %9054 = vst [vmem:[#allocation86_spill] sm:$0xff] %v8220_v62  ;;  %v4507_v45 = vunpack.c.l.b16 %v4407_v21  ;;  %v2171_v28 = vrot.slane %v6360_v30, 5 }
 0x2a4   : > { %v8210_v33 = vadd.f32 %v2316_v52, %v7000_v9  ;;  %v2224_v9 = vunpack.c.l.b16 %v2165_v17  ;;  %v4418_v52 = vshll.u32 %v8131_v40, 16 }
 0x2a6   : > { %v2245_v16 = vpack.c.b16 %v2224_v9, %v2223_v13  ;;  %v2170_v9 = vrot.slane %v2168_v59, 4  ;;  %v4415_v13 = vor.u32 %v4414_v61, %v4411_v8  ;;  %v8252_v8 = vld [vmem:[#allocation2 + $0xc4] sm:$0xf] }
 0x2a8   : > { %6063 = vmatmul.msk.bf16.gmra.mxu0 %vm1676_vm8, %v4525_v23  ;;  %v4420_v23 = vrot.slane %v4418_v52, 5  ;;  %v8247_v14 = vpop.f32.mrf.mxu0  ;;  %v4416_v1 = vrot.slane %v4415_v13, 4 }
 0x2aa   : > { %v8236_v17 = vpop.f32.mrf.mxu1  ;;  %v4425_v10 = vor.u32 %v4424_v48, %v4420_v23 }
 0x2ab   : > { %v2318_v56 = vpop.f32.mrf.mxu3  ;;  %9055 = vst [vmem:[#allocation87_spill] sm:$0xff] %v8236_v17 }
 0x2ac   : > { %v8223_v32 = vadd.f32 %v2318_v56, %v7025_v11  ;;  %v4506_v11 = vunpack.c.l.b16 %v4397_v18  ;;  %v2172_v18 = vsel %vm6745_vm15, %v2170_v9, %v2171_v28  ;;  %v4426_v52 = vrot.slane %v4425_v10, 4  ;;  %v6361_v9 = vld [vmem:[#allocation2 + $0x94] sm:$0xf] }
 0x2ae   : > { %v4526_v56 = vpack.c.b16 %v4507_v45, %v4506_v11  ;;  %v4090_v45 = vld [vmem:[#allocation2 + $0xc0] sm:$0xf] }
 0x2af   : > { %v4433_v30 = vshrl.u32 %v4090_v45, 16  ;;  %v4436_v28 = vshll.u32 %v4090_v45, 16 }
 0x2b0   : > { %5838 = vmatmul.msk.bf16.gmra.mxu3 %vm1676_vm8, %v2245_v16  ;;  %v5823_v16 = vrot.slane %v2049_v41, 9  ;;  %v2175_v41 = vrot.slane %v6361_v9, 5 }
 0x2b2   : > { %6086 = vmatmul.msk.bf16.gmra.mxu1 %vm1676_vm8, %v7346_v42  ;;  %v4428_v42 = vshll.u32 %v8133_v35, 16  ;;  %v2169_v21 = vsel %vm6745_vm15, %v5823_v16, %v2168_v59  ;;  %v8254_v61 = vpop.f32.mrf.mxu1  ;;  %v4421_v59 = vsel %vm6713_vm11, %v4416_v1, %v4420_v23  ;;  %v2050_v16 = vld [vmem:[#allocation2 + $0x90] sm:$0xe] }
 0x2b3   : > { %v2321_v31 = vpop.f32.mrf.mxu3  ;;  %v2225_v35 = vunpack.c.l.b16 %v2169_v21  ;;  %9056 = vst [vmem:[#allocation88_spill] sm:$0xff] %v8254_v61  ;;  %v4508_v13 = vunpack.c.l.b16 %v4421_v59  ;;  %v4438_v21 = vrot.slane %v4436_v28, 5 }
 0x2b4   : > { %v8239_v40 = vadd.f32 %v2321_v31, %v7044_v12  ;;  %v2226_v12 = vunpack.c.l.b16 %v2172_v18  ;;  %v4430_v19 = vrot.slane %v4428_v42, 5  ;;  %v2177_v42 = vrot.slane %v2175_v41, 4 }
 0x2b5   : > { %v4435_v18 = vrot.slane %v4433_v30, 4 }
 0x2b6   : > { %v2246_v48 = vpack.c.b16 %v2226_v12, %v2225_v35  ;;  %v4431_v31 = vsel %vm6713_vm11, %v4426_v52, %v4430_v19  ;;  %v8265_v52 = vpop.f32.mrf.mxu0  ;;  %v6362_v35 = vld [vmem:[#allocation2 + $0x98] sm:$0x1] }
 0x2b7   : > { %v4509_v10 = vunpack.c.l.b16 %v4431_v31  ;;  %v2178_v45 = vrot.slane %v6362_v35, 5  ;;  %v4439_v9 = vor.u32 %v4438_v21, %v4435_v18 }
 0x2b8   : > { %6064 = vmatmul.msk.bf16.gmra.mxu0 %vm1676_vm8, %v4526_v56  ;;  %v4446_v56 = vshrl.u32 %v8252_v8, 16 }
 0x2b9   : > { %v2179_v31 = vsel %vm6745_vm15, %v2177_v42, %v2178_v45  ;;  %v2051_v45 = vld [vmem:[#allocation2 + $0x9c] sm:$0xe] }
 0x2ba   : > { %v4448_v1 = vrot.slane %v4446_v56, 4  ;;  %v8272_v59 = vpop.f32.mrf.mxu1 }
 0x2bb   : > { %v2323_v22 = vpop.f32.mrf.mxu3  ;;  %9057 = vst [vmem:[#allocation89_spill] sm:$0xff] %v8272_v59 }
 0x2bc   : > { %v8250_v11 = vadd.f32 %v2323_v22, %v7071_v26  ;;  %v4442_v26 = vshll.u32 %v8252_v8, 16  ;;  %v8270_v22 = vld [vmem:[#allocation2 + $0xc8] sm:$0x1] }
 0x2bd   : > { %v4452_v28 = vshll.u32 %v8270_v22, 16 }
 0x2be   : > { %v4444_v12 = vrot.slane %v4442_v26, 5  ;;  %v2228_v26 = vunpack.c.l.b16 %v2179_v31  ;;  %v8283_v49 = vpop.f32.mrf.mxu0  ;;  %v6364_v31 = vld [vmem:[#allocation2 + $0xa4] sm:$0x1] }
 0x2c0   : > { %5839 = vmatmul.msk.bf16.gmra.mxu3 %vm1676_vm8, %v2246_v48  ;;  %v4527_v48 = vpack.c.b16 %v4509_v10, %v4508_v13  ;;  %v4449_v30 = vor.u32 %v4448_v1, %v4444_v12  ;;  %v4454_v13 = vrot.slane %v4452_v28, 5  ;;  %v6363_v1 = vld [vmem:[#allocation2 + $0xa0] sm:$0xf]  ;;  %v5825_v28 = vrot.slane %v2051_v45, 9 }
 0x2c1   : > { %v9060_v45 = vld [vmem:[#allocation46_spill] sm:$0xff] }
 0x2c2   : > { %6087 = vmatmul.msk.bf16.gmra.mxu1 %vm1676_vm8, %v7388_v54  ;;  %v5824_v54 = vrot.slane %v2050_v16, 9  ;;  %v4450_v35 = vrot.slane %v4449_v30, 4 }
 0x2c3   : > { %v2326_v23 = vpop.f32.mrf.mxu3 }
 0x2c4   : > { %v8268_v19 = vadd.f32 %v2326_v23, %v7101_v24  ;;  %v2176_v24 = vsel %vm6745_vm15, %v5824_v54, %v2175_v41  ;;  %v4440_v23 = vrot.slane %v4439_v9, 4  ;;  %v4455_v21 = vsel %vm6713_vm11, %v4450_v35, %v4454_v13 }
 0x2c5   : > { %v2227_v16 = vunpack.c.l.b16 %v2176_v24  ;;  %v2182_v41 = vrot.slane %v6363_v1, 5  ;;  %v4511_v54 = vunpack.c.l.b16 %v4455_v21  ;;  %v2185_v9 = vrot.slane %v6364_v31, 5  ;;  %v6365_v21 = vld [vmem:[#allocation2 + $0xac] sm:$0xf] }
 0x2c6   : > { %v4445_v18 = vsel %vm6713_vm11, %v4440_v23, %v4444_v12  ;;  %v8301_v35 = vpop.f32.mrf.mxu0  ;;  %v2189_v1 = vrot.slane %v6365_v21, 5  ;;  %v4866_v21 = vrot.slane %v8252_v8, 5 }
 0x2c7   : > { %v2247_v42 = vpack.c.b16 %v2228_v26, %v2227_v16  ;;  %v2184_v12 = vrot.slane %v2182_v41, 4 }
 0x2c8   : > { %6065 = vmatmul.msk.bf16.gmra.mxu0 %vm1676_vm8, %v4527_v48  ;;  %v8290_v48 = vpop.f32.mrf.mxu1  ;;  %v4868_v6 = vrot.slane %v4866_v21, 4 }
 0x2c9   : > { %9058 = vst [vmem:[#allocation90_spill] sm:$0xff] %v8290_v48  ;;  %v2186_v23 = vsel %vm6745_vm15, %v2184_v12, %v2185_v9  ;;  %v9097_v48 = vld [vmem:[#allocation78_spill] sm:$0xff] }
 0x2ca   : > { %v2230_v13 = vunpack.c.l.b16 %v2186_v23 }
 0x2cb   : > { %v2328_v56 = vpop.f32.mrf.mxu3 }
 0x2cc   : > { %v8281_v10 = vadd.f32 %v2328_v56, %v7127_v3  ;;  %v4510_v3 = vunpack.c.l.b16 %v4445_v18  ;;  %v2183_v56 = vsel %vm6745_vm15, %v5825_v28, %v2182_v41  ;;  %v2052_v41 = vld [vmem:[#allocation2 + $0xa8] sm:$0xe] }
 0x2cd   : > { %v5826_v9 = vrot.slane %v2052_v41, 9  ;;  %v9061_v28 = vld [vmem:[#allocation20_spill] sm:$0xff] }
 0x2ce   : > { %v4528_v26 = vpack.c.b16 %v4511_v54, %v4510_v3  ;;  %v6366_v3 = vld [vmem:[#allocation2 + $0xb0] sm:$0x1]  ;;  %v8479_v17 = vpop.f32.mrf.mxu0 }
 0x2cf   : > { %v2192_v54 = vrot.slane %v6366_v3, 5 }
 0x2d0   : > { %5840 = vmatmul.msk.bf16.gmra.mxu3 %vm1676_vm8, %v2247_v42  ;;  %v8304_v16 = vpop.f32.mrf.mxu1 }
 0x2d1   : > { %9059 = vst [vmem:[#allocation91_spill] sm:$0xff] %v8304_v16 }
 0x2d2   : > { %6088 = vmatmul.msk.bf16.gmra.mxu1 %vm1676_vm8, %v7509_v29  ;;  %v2229_v29 = vunpack.c.l.b16 %v2183_v56 }
 0x2d3   : > { %v2331_v30 = vpop.f32.mrf.mxu3 }
 0x2d4   : > { %v8295_v24 = vadd.f32 %v2331_v30, %v7153_v7  ;;  %v2248_v7 = vpack.c.b16 %v2230_v13, %v2229_v29  ;;  %v2191_v30 = vrot.slane %v2189_v1, 4 }
 0x2d6   : > { %v2193_v56 = vsel %vm6745_vm15, %v2191_v30, %v2192_v54  ;;  %v2053_v54 = vld [vmem:[#allocation2 + $0xb4] sm:$0xe] }
 0x2d7   : > { %v2232_v29 = vunpack.c.l.b16 %v2193_v56 }
 0x2d8   : > { %6066 = vmatmul.msk.bf16.gmra.mxu0 %vm1676_vm8, %v4528_v26  ;;  %v8315_v26 = vpop.f32.mrf.mxu1 }
 0x2d9   : > { %9062 = vst [vmem:[#allocation46_spill] sm:$0xff] %v8315_v26 }
 0x2db   : > { %v2333_v42 = vpop.f32.mrf.mxu3 }
 0x2dc   : > { %v8307_v18 = vadd.f32 %v2333_v42, %v7168_v55  ;;  %v2190_v55 = vsel %vm6745_vm15, %v5826_v9, %v2189_v1  ;;  %v9063_v42 = vld [vmem:[#allocation22_spill] sm:$0xff]  ;;  %v4869_v1 = vrot.slane %v8270_v22, 5  ;;  %v9066_v22 = vld [vmem:[#allocation24_spill] sm:$0xff] }
 0x2dd   : > { %v2231_v23 = vunpack.c.l.b16 %v2190_v55  ;;  %v9065_v9 = vld [vmem:[#allocation50_spill] sm:$0xff] }
 0x2de   : > { %v4870_v8 = vsel %vm6745_vm15, %v4868_v6, %v4869_v1 }
 0x2df   : > { %v2249_v41 = vpack.c.b16 %v2232_v29, %v2231_v23  ;;  %v4909_v56 = vunpack.c.l.b16 %v4870_v8  ;;  %v6368_v23 = vld [vmem:[#allocation2 + $0xbc] sm:$0x1] }
 0x2e0   : > { %5841 = vmatmul.msk.bf16.gmra.mxu3 %vm1676_vm8, %v2248_v7  ;;  %v8325_v3 = vpop.f32.mrf.mxu1  ;;  %v2199_v29 = vrot.slane %v6368_v23, 5  ;;  %v9068_v8 = vld [vmem:[#allocation26_spill] sm:$0xff] }
 0x2e1   : > { %9064 = vst [vmem:[#allocation20_spill] sm:$0xff] %v8325_v3  ;;  %v6175_v3 = vld [vmem:[#allocation2 + $0x48] sm:$0xff] }
 0x2e2   : > { %6089 = vmatmul.msk.bf16.gmra.mxu1 %vm1676_vm8, %v9060_v45  ;;  %v4716_v45 = vld [vmem:[#allocation2 + $0xc0] sm:$0xe] }
 0x2e3   : > { %v2336_v31 = vpop.f32.mrf.mxu3  ;;  %v6082_v51 = vrot.slane %v4716_v45, 9 }
 0x2e4   : > { %v8313_v12 = vadd.f32 %v2336_v31, %v9061_v28  ;;  %v6367_v31 = vld [vmem:[#allocation2 + $0xb8] sm:$0xf] }
 0x2e5   : > { %v2196_v28 = vrot.slane %v6367_v31, 5  ;;  %v4867_v30 = vsel %vm6745_vm15, %v6082_v51, %v4866_v21 }
 0x2e6   : > { %v4908_v55 = vunpack.c.l.b16 %v4867_v30 }
 0x2e7   : > { %v2198_v45 = vrot.slane %v2196_v28, 4 }
 0x2e8   : > { %v8344_v21 = vpop.f32.mrf.mxu1 }
 0x2e9   : > { %v2200_v51 = vsel %vm6745_vm15, %v2198_v45, %v2199_v29  ;;  %9067 = vst [vmem:[#allocation22_spill] sm:$0xff] %v8344_v21  ;;  %v9072_v45 = vld [vmem:[#allocation29_spill] sm:$0xff] }
 0x2ea   : > { %v2234_v1 = vunpack.c.l.b16 %v2200_v51  ;;  %v6171_v51 = vld [vmem:[#allocation2 + $0x18] sm:$0xff] }
 0x2eb   : > { %v2338_v13 = vpop.f32.mrf.mxu3 }
 0x2ec   : > { %v8322_v7 = vadd.f32 %v2338_v13, %v9063_v42  ;;  %v5827_v42 = vrot.slane %v2053_v54, 9 }
 0x2f0   : > { %5842 = vmatmul.msk.bf16.gmra.mxu3 %vm1676_vm8, %v2249_v41  ;;  %v8338_v41 = vpack.c.b16 %v4909_v56, %v4908_v55  ;;  %v8352_v55 = vpop.f32.mrf.mxu1  ;;  %v9071_v56 = vld [vmem:[#allocation27_spill] sm:$0xff] }
 0x2f1   : > { %9070 = vst [vmem:[#allocation50_spill] sm:$0xff] %v8352_v55 }
 0x2f2   : > { %6090 = vmatmul.msk.bf16.gmra.mxu1 %vm1676_vm8, %v9065_v9  ;;  %v2197_v9 = vsel %vm6745_vm15, %v5827_v42, %v2196_v28 }
 0x2f3   : > { %v2341_v13 = vpop.f32.mrf.mxu3  ;;  %v2233_v6 = vunpack.c.l.b16 %v2197_v9 }
 0x2f4   : > { %v8336_v31 = vadd.f32 %v2341_v13, %v9066_v22  ;;  %v9069_v13 = vld [vmem:[#allocation57_spill] sm:$0xff] }
 0x2f5   : > { %v2250_v54 = vpack.c.b16 %v2234_v1, %v2233_v6  ;;  %v9074_v6 = vld [vmem:[#allocation62_spill] sm:$0xff] }
 0x2f8   : > { %v8360_v9 = vpop.f32.mrf.mxu1 }
 0x2f9   : > { %9073 = vst [vmem:[#allocation24_spill] sm:$0xff] %v8360_v9 }
 0x2fb   : > { %v2343_v30 = vpop.f32.mrf.mxu3 }
 0x2fc   : > { %v8347_v23 = vadd.f32 %v2343_v30, %v9068_v8  ;;  %v9075_v30 = vld [vmem:[#allocation31_spill] sm:$0xff] }
 0x300   : > { %5843 = vmatmul.msk.bf16.gmra.mxu3 %vm1676_vm8, %v2250_v54  ;;  %v8368_v54 = vpop.f32.mrf.mxu1 }
 0x301   : > { %9076 = vst [vmem:[#allocation26_spill] sm:$0xff] %v8368_v54  ;;  %v9082_v54 = vld [vmem:[#allocation36_spill] sm:$0xff] }
 0x302   : > { %6091 = vmatmul.msk.bf16.gmra.mxu1 %vm1676_vm8, %v9069_v13 }
 0x303   : > { %v2346_v28 = vpop.f32.mrf.mxu3 }
 0x304   : > { %v8355_v42 = vadd.f32 %v2346_v28, %v9071_v56  ;;  %v9077_v28 = vld [vmem:[#allocation33_spill] sm:$0xff] }
 0x30b   : > { %v2348_v29 = vpop.f32.mrf.mxu3 }
 0x30c   : > { %v8358_v22 = vadd.f32 %v2348_v29, %v9072_v45  ;;  %v6172_v29 = vld [vmem:[#allocation2 + $0x24] sm:$0xff]  ;;  %v8374_v45 = vpop.f32.mrf.mxu1 }
 0x30d   : > { %9078 = vst [vmem:[#allocation57_spill] sm:$0xff] %v8374_v45 }
 0x310   : > { %6036 = vmatmul.msk.bf16.vlgmr.msra.gmra.mxu3 %vm1676_vm8, %v6171_v51 }
 0x312   : > { %6092 = vmatmul.msk.bf16.gmra.mxu1 %vm1676_vm8, %v9074_v6  ;;  %v9079_v6 = vld [vmem:[#allocation35_spill] sm:$0xff] }
 0x313   : > { %v2351_v1 = vpop.f32.mrf.mxu3 }
 0x314   : > { %v8366_v8 = vadd.f32 %v2351_v1, %v9075_v30  ;;  %v8381_v1 = vpop.f32.mrf.mxu1 }
 0x315   : > { %9081 = vst [vmem:[#allocation29_spill] sm:$0xff] %v8381_v1  ;;  %v8397_v1 = vpop.f32.mrf.mxu2 }
 0x31b   : > { %v2353_v13 = vpop.f32.mrf.mxu3 }
 0x31c   : > { %v8371_v56 = vadd.f32 %v2353_v13, %v9077_v28  ;;  %v6173_v13 = vld [vmem:[#allocation2 + $0x30] sm:$0xff] }
 0x320   : > { %6037 = vmatmul.msk.bf16.gmra.mxu3 %vm1676_vm8, %v6172_v29  ;;  %v9084_v29 = vld [vmem:[#allocation38_spill] sm:$0xff] }
 0x322   : > { %6093 = vmatmul.msk.bf16.gmra.mxu1 %vm1676_vm8, %v8066_v36  ;;  %v8392_v36 = vpop.f32.mrf.mxu1 }
 0x323   : > { %v2356_v51 = vpop.f32.mrf.mxu3  ;;  %9086 = vst [vmem:[#allocation33_spill] sm:$0xff] %v8392_v36 }
 0x324   : > { %v8379_v9 = vadd.f32 %v2356_v51, %v9079_v6  ;;  %v9087_v6 = vld [vmem:[#allocation40_spill] sm:$0xff] }
 0x326   : > { %9080 = vst [vmem:[#allocation27_spill] sm:$0xff] %v8379_v9  ;;  %v9116_v9 = vld [vmem:[#allocation53_spill] sm:$0xff] }
 0x32b   : > { %v2358_v30 = vpop.f32.mrf.mxu3 }
 0x32c   : > { %v8384_v60 = vadd.f32 %v2358_v30, %v9082_v54  ;;  %v6174_v54 = vld [vmem:[#allocation2 + $0x3c] sm:$0xff]  ;;  %v8399_v30 = vpop.f32.mrf.mxu1 }
 0x32e   : > { %9083 = vst [vmem:[#allocation62_spill] sm:$0xff] %v8384_v60 }
 0x330   : > { %6038 = vmatmul.msk.bf16.gmra.mxu3 %vm1676_vm8, %v6173_v13  ;;  %v9089_v13 = vld [vmem:[#allocation42_spill] sm:$0xff] }
 0x332   : > { %6094 = vmatmul.msk.bf16.gmra.mxu1 %vm1676_vm8, %v8097_v38 }
 0x333   : > { %v2361_v28 = vpop.f32.mrf.mxu3 }
 0x334   : > { %v8390_v45 = vadd.f32 %v2361_v28, %v9084_v29  ;;  %v8407_v29 = vpop.f32.mrf.mxu2  ;;  %v8409_v36 = vpop.f32.mrf.mxu1 }
 0x336   : > { %9085 = vst [vmem:[#allocation31_spill] sm:$0xff] %v8390_v45 }
 0x33b   : > { %v2363_v51 = vpop.f32.mrf.mxu3 }
 0x33c   : > { %v8395_v55 = vadd.f32 %v2363_v51, %v9087_v6  ;;  %v9091_v6 = vld [vmem:[#allocation44_spill] sm:$0xff]  ;;  %v8415_v26 = vpop.f32.mrf.mxu2 }
 0x33e   : > { %9088 = vst [vmem:[#allocation35_spill] sm:$0xff] %v8395_v55 }
 0x340   : > { %6039 = vmatmul.msk.bf16.gmra.mxu3 %vm1676_vm8, %v6174_v54 }
 0x342   : > { %6095 = vmatmul.msk.bf16.gmra.mxu1 %vm1676_vm8, %v8106_v5  ;;  %v8419_v5 = vpop.f32.mrf.mxu1 }
 0x343   : > { %v2366_v38 = vpop.f32.mrf.mxu3 }
 0x344   : > { %v8405_v28 = vadd.f32 %v2366_v38, %v9089_v13  ;;  %v9093_v38 = vld [vmem:[#allocation69_spill] sm:$0xff]  ;;  %v8424_v16 = vpop.f32.mrf.mxu2 }
 0x346   : > { %9090 = vst [vmem:[#allocation36_spill] sm:$0xff] %v8405_v28 }
 0x34b   : > { %v2368_v51 = vpop.f32.mrf.mxu3 }
 0x34c   : > { %v8412_v21 = vadd.f32 %v2368_v51, %v9091_v6  ;;  %v8429_v6 = vpop.f32.mrf.mxu1 }
 0x34e   : > { %9092 = vst [vmem:[#allocation38_spill] sm:$0xff] %v8412_v21 }
 0x350   : > { %6040 = vmatmul.msk.bf16.gmra.mxu3 %vm1676_vm8, %v6175_v3  ;;  %v6176_v3 = vld [vmem:[#allocation2 + $0x54] sm:$0xff] }
 0x352   : > { %6096 = vmatmul.msk.bf16.gmra.mxu1 %vm1676_vm8, %v8122_v27 }
 0x353   : > { %v2371_v54 = vpop.f32.mrf.mxu3 }
 0x354   : > { %v8422_v13 = vadd.f32 %v2371_v54, %v9093_v38  ;;  %v8437_v54 = vpop.f32.mrf.mxu2  ;;  %v8439_v38 = vpop.f32.mrf.mxu1 }
 0x356   : > { %9094 = vst [vmem:[#allocation40_spill] sm:$0xff] %v8422_v13 }
 0x35b   : > { %v2373_v28 = vpop.f32.mrf.mxu3 }
 0x35c   : > { %v8427_v51 = vadd.f32 %v2373_v28, %v7958_v25  ;;  %v6177_v28 = vld [vmem:[#allocation2 + $0x60] sm:$0xff] }
 0x35e   : > { %9095 = vst [vmem:[#allocation42_spill] sm:$0xff] %v8427_v51  ;;  %v8444_v51 = vpop.f32.mrf.mxu2 }
 0x360   : > { %6041 = vmatmul.msk.bf16.gmra.mxu3 %vm1676_vm8, %v6176_v3  ;;  %v8447_v3 = vpop.f32.mrf.mxu1 }
 0x362   : > { %6097 = vmatmul.msk.bf16.gmra.mxu1 %vm1676_vm8, %v8153_v34 }
 0x363   : > { %v2376_v27 = vpop.f32.mrf.mxu3 }
 0x364   : > { %v8435_v21 = vadd.f32 %v2376_v27, %v8002_v53 }
 0x366   : > { %9096 = vst [vmem:[#allocation44_spill] sm:$0xff] %v8435_v21  ;;  %v8454_v27 = vpop.f32.mrf.mxu2 }
 0x36b   : > { %v2378_v13 = vpop.f32.mrf.mxu3 }
 0x36c   : > { %v8442_v25 = vadd.f32 %v2378_v13, %v9097_v48  ;;  %v6178_v13 = vld [vmem:[#allocation2 + $0x6c] sm:$0xff] }
 0x36e   : > { %9098 = vst [vmem:[#allocation69_spill] sm:$0xff] %v8442_v25  ;;  %v8460_v25 = vpop.f32.mrf.mxu2 }
 0x370   : > { %6042 = vmatmul.msk.bf16.gmra.mxu3 %vm1676_vm8, %v6177_v28 }
 0x372   : > { %6098 = vmatmul.msk.bf16.gmra.mxu1 %vm1676_vm8, %v8338_v41  ;;  %v9102_v41 = vld [vmem:[#allocation14_spill] sm:$0xff] }
 0x373   : > { %v2381_v53 = vpop.f32.mrf.mxu3  ;;  %v2677_v59 = vadd.f32 %v9102_v41, %v8184_v44 }
 0x374   : > { %v8452_v34 = vadd.f32 %v2381_v53, %v8087_v4  ;;  %v9103_v53 = vld [vmem:[#allocation13_spill] sm:$0xff] }
 0x376   : > { %9099 = vst [vmem:[#allocation78_spill] sm:$0xff] %v8452_v34  ;;  %v9104_v34 = vld [vmem:[#allocation12_spill] sm:$0xff] }
 0x377   : > { %v1961_v45 = vadd.f32 %v9104_v34, %v9103_v53  ;;  %v8481_v53 = vpop.f32.mrf.mxu1 }
 0x37b   : > { %v2383_v21 = vpop.f32.mrf.mxu3 }
 0x37c   : > { %v8457_v48 = vadd.f32 %v2383_v21, %v8125_v47  ;;  %v8472_v47 = vpop.f32.mrf.mxu2  ;;  %v2392_v21 = vadd.f32 %v8194_v58, %v1961_v45 }
 0x37e   : > { %9100 = vst [vmem:[#allocation92_spill] sm:$0xff] %v8457_v48  ;;  %v9106_v48 = vld [vmem:[#allocation45_spill] sm:$0xff] }
 0x37f   : > { %v3331_v60 = vadd.f32 %v9106_v48, %v2677_v59  ;;  %v9111_v59 = vld [vmem:[#allocation16_spill] sm:$0xff]  ;;  %v9112_v48 = vld [vmem:[#allocation59_spill] sm:$0xff] }
 0x380   : > { %6043 = vmatmul.msk.bf16.gmra.mxu3 %vm1676_vm8, %v6178_v13  ;;  %v6179_v13 = vld [vmem:[#allocation2 + $0x78] sm:$0xff]  ;;  %v2679_v45 = vadd.f32 %v9111_v59, %v8210_v33 }
 0x383   : > { %v2386_v28 = vpop.f32.mrf.mxu3 }
 0x384   : > { %v8463_v55 = vadd.f32 %v2386_v28, %v8151_v57  ;;  %v9107_v57 = vld [vmem:[#allocation15_spill] sm:$0xff] }
 0x385   : > { %v2678_v28 = vadd.f32 %v9107_v57, %v2392_v21 }
 0x386   : > { %9101 = vst [vmem:[#allocation93_spill] sm:$0xff] %v8463_v55  ;;  %v9108_v55 = vld [vmem:[#allocation54_spill] sm:$0xff] }
 0x387   : > { %v3729_v44 = vadd.f32 %v9108_v55, %v3331_v60  ;;  %v8494_v55 = vld [vmem:[%s8930_s4] ss:$0 sm:$0xff] }
 0x38b   : > { %v2388_v4 = vpop.f32.mrf.mxu3 }
 0x38c   : > { %v8470_v61 = vadd.f32 %v2388_v4, %v8170_v37  ;;  %v9109_v37 = vld [vmem:[#allocation48_spill] sm:$0xff] }
 0x38d   : > { %v3332_v4 = vadd.f32 %v9109_v37, %v2678_v28  ;;  %v8500_v37 = vpop.f32.mrf.mxu1 }
 0x38e   : > { %9105 = vst [vmem:[#allocation14_spill] sm:$0xff] %v8470_v61  ;;  %v8484_v61 = vpop.f32.mrf.mxu2 }
 0x38f   : > { %9110 = vst [vmem:[#allocation13_spill] sm:$0xff] %v8484_v61 }
 0x390   : > { %6044 = vmatmul.msk.bf16.gmra.mxu3 %vm1676_vm8, %v6179_v13  ;;  %v3730_v13 = vadd.f32 %v9112_v48, %v3332_v4 }
 0x393   : > { %v3936_v41 = vpop.f32.mrf.mxu3 }
 0x394   : > { %v4016_v34 = vadd.f32 %v3936_v41, %v3729_v44  ;;  %v8496_v44 = vpop.f32.mrf.mxu0  ;;  %v6180_v41 = vld [vmem:[#allocation2 + $0x84] sm:$0xff] }
 0x396   : > { %v4670_v58 = vadd.f32 %v8213_v46, %v4016_v34  ;;  %v9113_v46 = vld [vmem:[#allocation51_spill] sm:$0xff] }
 0x397   : > { %v3333_v34 = vadd.f32 %v9113_v46, %v2679_v45 }
 0x398   : > { %v5068_v60 = vadd.f32 %v8399_v30, %v4670_v58  ;;  %v8505_v30 = vpop.f32.mrf.mxu2  ;;  %v9114_v58 = vld [vmem:[#allocation17_spill] sm:$0xff] }
 0x399   : > { %v2680_v59 = vadd.f32 %v9114_v58, %v8223_v32 }
 0x39a   : > { %v5104_v33 = vadd.f32 %v8494_v55, %v5068_v60 }
 0x39b   : > { %v3938_v21 = vpop.f32.mrf.mxu3  ;;  %v3334_v60 = vadd.f32 %v9116_v9, %v2680_v59  ;;  %v6181_v59 = vld [vmem:[#allocation2 + $0x90] sm:$0xff] }
 0x39c   : > { %v4017_v57 = vadd.f32 %v3938_v21, %v3730_v13  ;;  %v9115_v13 = vld [vmem:[#allocation63_spill] sm:$0xff]  ;;  %v8512_v62 = vpop.f32.mrf.mxu0 }
 0x39e   : > { %v4671_v28 = vadd.f32 %v8231_v15, %v4017_v57  ;;  %v3731_v15 = vadd.f32 %v9115_v13, %v3333_v34  ;;  %v5136_v57 = vmax.f32 %v5104_v33, 0.0 }
 0x3a0   : > { %v5069_v4 = vadd.f32 %v8409_v36, %v4671_v28  ;;  %6045 = vmatmul.msk.bf16.gmra.mxu3 %vm1676_vm8, %v6180_v41  ;;  %v9117_v28 = vld [vmem:[#allocation18_spill] sm:$0xff]  ;;  %v8518_v41 = vpop.f32.mrf.mxu1  ;;  %v8521_v58 = vpop.f32.mrf.mxu2 }
 0x3a1   : > { %v2681_v32 = vadd.f32 %v9117_v28, %v8239_v40  ;;  %v9120_v40 = vld [vmem:[#allocation19_spill] sm:$0xff] }
 0x3a2   : > { %v5105_v48 = vadd.f32 %v8494_v55, %v5069_v4  ;;  %v9118_v4 = vld [vmem:[#allocation66_spill] sm:$0xff] }
 0x3a3   : > { %v3941_v21 = vpop.f32.mrf.mxu3  ;;  %v3732_v34 = vadd.f32 %v9118_v4, %v3334_v60 }
 0x3a4   : > { %v5137_v45 = vmax.f32 %v5105_v48, 0.0  ;;  %v4018_v46 = vadd.f32 %v3941_v21, %v3731_v15  ;;  %v9119_v15 = vld [vmem:[#allocation56_spill] sm:$0xff] }
 0x3a6   : > { %v5168_v61 = vpack.c.bf16 %v5137_v45, %v5136_v57  ;;  %v4672_v36 = vadd.f32 %v8247_v14, %v4018_v46  ;;  %v3335_v14 = vadd.f32 %v9119_v15, %v2681_v32  ;;  %v2682_v57 = vadd.f32 %v9120_v40, %v8250_v11  ;;  %v8531_v45 = vpop.f32.mrf.mxu0  ;;  %v9123_v11 = vld [vmem:[#allocation21_spill] sm:$0xff] }
 0x3a8   : > { %6100 = vmatmul.msk.bf16.vlgmr.msra.gmra.mxu2 %vm1676_vm8, %v5168_v61  ;;  %v5070_v48 = vadd.f32 %v8419_v5, %v4672_v36  ;;  %v9121_v5 = vld [vmem:[#allocation70_spill] sm:$0xff] }
 0x3a9   : > { %v3733_v60 = vadd.f32 %v9121_v5, %v3335_v14 }
 0x3aa   : > { %v5106_v61 = vadd.f32 %v8494_v55, %v5070_v48 }
 0x3ab   : > { %v3943_v33 = vpop.f32.mrf.mxu3 }
 0x3ac   : > { %v4019_v13 = vadd.f32 %v3943_v33, %v3732_v34  ;;  %v5138_v28 = vmax.f32 %v5106_v61, 0.0  ;;  %v8537_v34 = vpop.f32.mrf.mxu2  ;;  %v9122_v33 = vld [vmem:[#allocation58_spill] sm:$0xff] }
 0x3ad   : > { %v3336_v48 = vadd.f32 %v9122_v33, %v2682_v57  ;;  %v6182_v57 = vld [vmem:[#allocation2 + $0x9c] sm:$0xff] }
 0x3ae   : > { %v4673_v9 = vadd.f32 %v8265_v52, %v4019_v13  ;;  %v8535_v52 = vpop.f32.mrf.mxu1 }
 0x3b0   : > { %v5071_v21 = vadd.f32 %v8429_v6, %v4673_v9  ;;  %6046 = vmatmul.msk.bf16.gmra.mxu3 %vm1676_vm8, %v6181_v59  ;;  %v2683_v9 = vadd.f32 %v9123_v11, %v8268_v19  ;;  %v9124_v59 = vld [vmem:[#allocation73_spill] sm:$0xff] }
 0x3b1   : > { %v3734_v15 = vadd.f32 %v9124_v59, %v3336_v48 }
 0x3b2   : > { %v5107_v46 = vadd.f32 %v8494_v55, %v5071_v21  ;;  %v8545_v21 = vpop.f32.mrf.mxu0 }
 0x3b3   : > { %v3946_v36 = vpop.f32.mrf.mxu3 }
 0x3b4   : > { %v5139_v32 = vmax.f32 %v5107_v46, 0.0  ;;  %v4020_v4 = vadd.f32 %v3946_v36, %v3733_v60  ;;  %v9125_v60 = vld [vmem:[#allocation61_spill] sm:$0xff]  ;;  %v8552_v36 = vpop.f32.mrf.mxu2 }
 0x3b6   : > { %v5169_v6 = vpack.c.bf16 %v5139_v32, %v5138_v28  ;;  %v4674_v13 = vadd.f32 %v8283_v49, %v4020_v4  ;;  %v8548_v46 = vpop.f32.mrf.mxu1  ;;  %v3337_v49 = vadd.f32 %v9125_v60, %v2683_v9  ;;  %v9126_v32 = vld [vmem:[#allocation23_spill] sm:$0xff] }
 0x3b7   : > { %v2684_v4 = vadd.f32 %v9126_v32, %v8281_v10 }
 0x3b8   : > { %6101 = vmatmul.msk.bf16.gmra.mxu2 %vm1676_vm8, %v5169_v6  ;;  %v5072_v61 = vadd.f32 %v8439_v38, %v4674_v13  ;;  %v9127_v6 = vld [vmem:[#allocation76_spill] sm:$0xff] }
 0x3b9   : > { %v3735_v33 = vadd.f32 %v9127_v6, %v3337_v49 }
 0x3ba   : > { %v5108_v28 = vadd.f32 %v8494_v55, %v5072_v61  ;;  %v8561_v9 = vpop.f32.mrf.mxu0 }
 0x3bb   : > { %v3948_v14 = vpop.f32.mrf.mxu3 }
 0x3bc   : > { %v4021_v40 = vadd.f32 %v3948_v14, %v3734_v15  ;;  %v9128_v15 = vld [vmem:[#allocation65_spill] sm:$0xff]  ;;  %v8568_v10 = vpop.f32.mrf.mxu2 }
 0x3bd   : > { %v3338_v14 = vadd.f32 %v9128_v15, %v2684_v4  ;;  %v6183_v4 = vld [vmem:[#allocation2 + $0xa8] sm:$0xff] }
 0x3be   : > { %v4675_v5 = vadd.f32 %v8301_v35, %v4021_v40  ;;  %v5140_v35 = vmax.f32 %v5108_v28, 0.0  ;;  %v8564_v61 = vpop.f32.mrf.mxu1  ;;  %v9129_v40 = vld [vmem:[#allocation25_spill] sm:$0xff] }
 0x3c0   : > { %v5073_v19 = vadd.f32 %v8447_v3, %v4675_v5  ;;  %6047 = vmatmul.msk.bf16.gmra.mxu3 %vm1676_vm8, %v6182_v57  ;;  %v2685_v5 = vadd.f32 %v9129_v40, %v8295_v24  ;;  %v9130_v57 = vld [vmem:[#allocation80_spill] sm:$0xff] }
 0x3c1   : > { %v3736_v60 = vadd.f32 %v9130_v57, %v3338_v14  ;;  %v9132_v24 = vld [vmem:[#allocation28_spill] sm:$0xff] }
 0x3c2   : > { %v5109_v38 = vadd.f32 %v8494_v55, %v5073_v19 }
 0x3c3   : > { %v3951_v48 = vpop.f32.mrf.mxu3 }
 0x3c4   : > { %v5141_v13 = vmax.f32 %v5109_v38, 0.0  ;;  %v4022_v11 = vadd.f32 %v3951_v48, %v3735_v33  ;;  %v9131_v38 = vld [vmem:[#allocation68_spill] sm:$0xff]  ;;  %v8576_v33 = vpop.f32.mrf.mxu0 }
 0x3c5   : > { %v3339_v6 = vadd.f32 %v9131_v38, %v2685_v5  ;;  %v9133_v5 = vld [vmem:[#allocation72_spill] sm:$0xff] }
 0x3c6   : > { %v5170_v59 = vpack.c.bf16 %v5141_v13, %v5140_v35  ;;  %v4676_v3 = vadd.f32 %v8479_v17, %v4022_v11  ;;  %v2686_v35 = vadd.f32 %v9132_v24, %v8307_v18  ;;  %v8583_v13 = vpop.f32.mrf.mxu1  ;;  %v8587_v11 = vpop.f32.mrf.mxu2 }
 0x3c8   : > { %6102 = vmatmul.msk.bf16.gmra.mxu2 %vm1676_vm8, %v5170_v59  ;;  %v5074_v28 = vadd.f32 %v8481_v53, %v4676_v3 }
 0x3ca   : > { %v5110_v17 = vadd.f32 %v8494_v55, %v5074_v28 }
 0x3cb   : > { %v3953_v49 = vpop.f32.mrf.mxu3 }
 0x3cc   : > { %v4023_v19 = vadd.f32 %v3953_v49, %v3736_v60  ;;  %v5142_v15 = vmax.f32 %v5110_v17, 0.0  ;;  %v8592_v18 = vpop.f32.mrf.mxu0  ;;  %v9134_v60 = vld [vmem:[#allocation30_spill] sm:$0xff]  ;;  %v9135_v17 = vld [vmem:[#allocation75_spill] sm:$0xff] }
 0x3cd   : > { %v2687_v49 = vadd.f32 %v9134_v60, %v8313_v12  ;;  %v9136_v12 = vld [vmem:[#allocation32_spill] sm:$0xff] }
 0x3ce   : > { %v4677_v32 = vadd.f32 %v8496_v44, %v4023_v19  ;;  %v3737_v44 = vadd.f32 %v8397_v1, %v3339_v6  ;;  %v8597_v19 = vpop.f32.mrf.mxu1  ;;  %v8600_v38 = vpop.f32.mrf.mxu2 }
 0x3d0   : > { %v5075_v48 = vadd.f32 %v8500_v37, %v4677_v32  ;;  %6048 = vmatmul.msk.bf16.gmra.mxu3 %vm1676_vm8, %v6183_v4  ;;  %v3340_v37 = vadd.f32 %v9133_v5, %v2686_v35  ;;  %v4095_v5 = vld [vmem:[#allocation2 + $0xd4] sm:$0x1] }
 0x3d2   : > { %v5111_v53 = vadd.f32 %v8494_v55, %v5075_v48  ;;  %v3738_v1 = vadd.f32 %v8407_v29, %v3340_v37  ;;  %v3341_v48 = vadd.f32 %v9135_v17, %v2687_v49  ;;  %v2688_v29 = vadd.f32 %v9136_v12, %v8322_v7 }
 0x3d3   : > { %v3956_v59 = vpop.f32.mrf.mxu3 }
 0x3d4   : > { %v5143_v14 = vmax.f32 %v5111_v53, 0.0  ;;  %v4024_v3 = vadd.f32 %v3956_v59, %v3737_v44  ;;  %v8611_v59 = vpop.f32.mrf.mxu0 }
 0x3d6   : > { %v5171_v40 = vpack.c.bf16 %v5143_v14, %v5142_v15  ;;  %v4678_v57 = vadd.f32 %v8512_v62, %v4024_v3  ;;  %v6184_v62 = vld [vmem:[#allocation2 + $0xb4] sm:$0xff]  ;;  %v4093_v3 = vld [vmem:[#allocation2 + $0xcc] sm:$0xf]  ;;  %v8613_v49 = vpop.f32.mrf.mxu1 }
 0x3d7   : > { %v4457_v37 = vshrl.u32 %v4093_v3, 16 }
 0x3d8   : > { %6103 = vmatmul.msk.bf16.gmra.mxu2 %vm1676_vm8, %v5171_v40  ;;  %v5076_v32 = vadd.f32 %v8518_v41, %v4678_v57  ;;  %v3739_v41 = vadd.f32 %v8415_v26, %v3341_v48  ;;  %v4094_v40 = vld [vmem:[#allocation2 + $0xd0] sm:$0xf]  ;;  %v4717_v26 = vld [vmem:[#allocation2 + $0xcc] sm:$0xe] }
 0x3d9   : > { %v4466_v57 = vshll.u32 %v4094_v40, 16  ;;  %v4470_v60 = vshrl.u32 %v4094_v40, 16 }
 0x3da   : > { %v5112_v24 = vadd.f32 %v8494_v55, %v5076_v32  ;;  %v4476_v32 = vshll.u32 %v4095_v5, 16 }
 0x3db   : > { %v3958_v28 = vpop.f32.mrf.mxu3  ;;  %v4468_v48 = vrot.slane %v4466_v57, 5 }
 0x3dc   : > { %v4025_v4 = vadd.f32 %v3958_v28, %v3738_v1  ;;  %v9137_v1 = vld [vmem:[#allocation79_spill] sm:$0xff] }
 0x3dd   : > { %v3342_v28 = vadd.f32 %v9137_v1, %v2688_v29 }
 0x3de   : > { %v4679_v6 = vadd.f32 %v8531_v45, %v4025_v4  ;;  %v5144_v45 = vmax.f32 %v5112_v24, 0.0  ;;  %v4873_v4 = vrot.slane %v4094_v40, 5  ;;  %v4472_v24 = vrot.slane %v4470_v60, 4 }
 0x3df   : > { %v3740_v40 = vadd.f32 %v8424_v16, %v3342_v28  ;;  %v4627_v28 = vpop.f32.mrf.mxu0 }
 0x3e0   : > { %v5077_v35 = vadd.f32 %v8535_v52, %v4679_v6  ;;  %6049 = vmatmul.msk.bf16.gmra.mxu3 %vm1676_vm8, %v6184_v62  ;;  %v4460_v52 = vshll.u32 %v4093_v3, 16  ;;  %v8616_v6 = vpop.f32.mrf.mxu2  ;;  %v4459_v62 = vrot.slane %v4457_v37, 4  ;;  %v4473_v29 = vor.u32 %v4472_v24, %v4468_v48  ;;  %v5025_v24 = vpop.f32.mrf.mxu1 }
 0x3e1   : > { %v4876_v3 = vrot.slane %v4095_v5, 5 }
 0x3e2   : > { %v5113_v53 = vadd.f32 %v8494_v55, %v5077_v35  ;;  %v4462_v17 = vrot.slane %v4460_v52, 5  ;;  %v9138_v35 = vld [vmem:[#allocation34_spill] sm:$0xff]  ;;  %v4474_v60 = vrot.slane %v4473_v29, 4 }
 0x3e3   : > { %v3961_v44 = vpop.f32.mrf.mxu3  ;;  %v2689_v12 = vadd.f32 %v9138_v35, %v8336_v31 }
 0x3e4   : > { %v5145_v15 = vmax.f32 %v5113_v53, 0.0  ;;  %v4026_v14 = vadd.f32 %v3961_v44, %v3739_v41  ;;  %v6083_v41 = vrot.slane %v4717_v26, 9  ;;  %v4875_v44 = vrot.slane %v4873_v4, 4 }
 0x3e5   : > { %v3343_v26 = vadd.f32 %v8099_v20, %v2689_v12  ;;  %v2690_v12 = vadd.f32 %v9139_v39, %v8347_v23  ;;  %v9140_v23 = vld [vmem:[#allocation39_spill] sm:$0xff] }
 0x3e6   : > { %v5172_v7 = vpack.c.bf16 %v5145_v15, %v5144_v45  ;;  %v4680_v53 = vadd.f32 %v8545_v21, %v4026_v14  ;;  %v4463_v45 = vor.u32 %v4462_v17, %v4459_v62  ;;  %v4478_v15 = vrot.slane %v4476_v32, 5 }
 0x3e7   : > { %v4874_v37 = vsel %vm6745_vm15, %v6083_v41, %v4873_v4  ;;  %v4877_v31 = vsel %vm6745_vm15, %v4875_v44, %v4876_v3  ;;  %v6185_v4 = vld [vmem:[#allocation2 + $0xc0] sm:$0xff]  ;;  %v4630_v3 = vpop.f32.mrf.mxu0 }
 0x3e8   : > { %6104 = vmatmul.msk.bf16.gmra.mxu2 %vm1676_vm8, %v5172_v7  ;;  %v4464_v57 = vrot.slane %v4463_v45, 4  ;;  %v4910_v21 = vunpack.c.l.b16 %v4874_v37  ;;  %v5078_v14 = vadd.f32 %v8548_v46, %v4680_v53  ;;  %v4911_v1 = vunpack.c.l.b16 %v4877_v31 }
 0x3e9   : > { %v4479_v16 = vsel %vm6713_vm11, %v4474_v60, %v4478_v15  ;;  %v3741_v53 = vadd.f32 %v8437_v54, %v3343_v26  ;;  %v3344_v15 = vadd.f32 %v8139_v43, %v2690_v12  ;;  %v2691_v37 = vadd.f32 %v9140_v23, %v8355_v42 }
 0x3ea   : > { %v4469_v5 = vsel %vm6713_vm11, %v4464_v57, %v4468_v48  ;;  %v4513_v2 = vunpack.c.l.b16 %v4479_v16  ;;  %v4927_v17 = vpack.c.b16 %v4911_v1, %v4910_v21  ;;  %v5114_v46 = vadd.f32 %v8494_v55, %v5078_v14  ;;  %v8638_v48 = vpop.f32.mrf.mxu2  ;;  %v6186_v14 = vld [vmem:[#allocation2 + $0xcc] sm:$0xff] }
 0x3eb   : > { %v3963_v52 = vpop.f32.mrf.mxu3  ;;  %v4512_v62 = vunpack.c.l.b16 %v4469_v5  ;;  %v3742_v54 = vadd.f32 %v8444_v51, %v3344_v15  ;;  %v9141_v51 = vld [vmem:[#allocation41_spill] sm:$0xff] }
 0x3ec   : > { %v4027_v7 = vadd.f32 %v3963_v52, %v3740_v40  ;;  %6099 = vmatmul.msk.bf16.gmra.mxu1 %vm1676_vm8, %v4927_v17  ;;  %v5146_v44 = vmax.f32 %v5114_v46, 0.0  ;;  %v5028_v52 = vpop.f32.mrf.mxu1  ;;  %v2692_v26 = vadd.f32 %v9141_v51, %v8358_v22  ;;  %v9142_v22 = vld [vmem:[#allocation43_spill] sm:$0xff] }
 0x3ed   : > { %v4529_v20 = vpack.c.b16 %v4513_v2, %v4512_v62  ;;  %v2693_v46 = vadd.f32 %v9142_v22, %v8366_v8  ;;  %v9148_v51 = vld [vmem:[#allocation87_spill] sm:$0xff] }
 0x3ee   : > { %v4681_v32 = vadd.f32 %v8561_v9, %v4027_v7  ;;  %v3345_v7 = vadd.f32 %v8167_v0, %v2691_v37  ;;  %v9144_v37 = vld [vmem:[#allocation86_spill] sm:$0xff] }
 0x3ef   : > { %6067 = vmatmul.msk.bf16.gmra.mxu0 %vm1676_vm8, %v4529_v20  ;;  %v4632_v42 = vpop.f32.mrf.mxu0 }
 0x3f0   : > { %v5079_v35 = vadd.f32 %v8564_v61, %v4681_v32  ;;  %6050 = vmatmul.msk.bf16.gmra.mxu3 %vm1676_vm8, %v6185_v4 }
 0x3f2   : > { %v5115_v9 = vadd.f32 %v8494_v55, %v5079_v35  ;;  %v8651_v57 = vpop.f32.mrf.mxu2 }
 0x3f3   : > { %v3966_v41 = vpop.f32.mrf.mxu3 }
 0x3f4   : > { %v5147_v45 = vmax.f32 %v5115_v9, 0.0  ;;  %v4028_v61 = vadd.f32 %v3966_v41, %v3741_v53  ;;  %v5030_v32 = vpop.f32.mrf.mxu1  ;;  %v3347_v41 = vadd.f32 %v8200_v50, %v2693_v46 }
 0x3f6   : > { %v5173_v29 = vpack.c.bf16 %v5147_v45, %v5146_v44  ;;  %v4682_v40 = vadd.f32 %v8576_v33, %v4028_v61  ;;  %v9143_v45 = vld [vmem:[#allocation47_spill] sm:$0xff] }
 0x3f7   : > { %v4635_v20 = vpop.f32.mrf.mxu0  ;;  %v2694_v61 = vadd.f32 %v9143_v45, %v8371_v56  ;;  %v9146_v56 = vld [vmem:[#allocation49_spill] sm:$0xff] }
 0x3f8   : > { %6105 = vmatmul.msk.bf16.gmra.mxu2 %vm1676_vm8, %v5173_v29  ;;  %v5080_v31 = vadd.f32 %v8583_v13, %v4682_v40  ;;  %v3743_v13 = vadd.f32 %v8454_v27, %v3345_v7 }
 0x3f9   : > { %v3348_v50 = vadd.f32 %v9144_v37, %v2694_v61  ;;  %v9154_v37 = vld [vmem:[#allocation89_spill] sm:$0xff] }
 0x3fa   : > { %v5116_v33 = vadd.f32 %v8494_v55, %v5080_v31  ;;  %v8663_v0 = vpop.f32.mrf.mxu2  ;;  %v9145_v31 = vld [vmem:[#allocation27_spill] sm:$0xff] }
 0x3fb   : > { %v3968_v60 = vpop.f32.mrf.mxu3 }
 0x3fc   : > { %v4029_v21 = vadd.f32 %v3968_v60, %v3742_v54  ;;  %v5148_v4 = vmax.f32 %v5116_v33, 0.0  ;;  %v5033_v9 = vpop.f32.mrf.mxu1 }
 0x3fe   : > { %v4683_v43 = vadd.f32 %v8592_v18, %v4029_v21  ;;  %v2695_v21 = vadd.f32 %v9146_v56, %v9145_v31 }
 0x3ff   : > { %v4637_v23 = vpop.f32.mrf.mxu0 }
 0x400   : > { %v5081_v1 = vadd.f32 %v8597_v19, %v4683_v43  ;;  %6051 = vmatmul.msk.bf16.gmra.mxu3 %vm1676_vm8, %v6186_v14  ;;  %v3346_v19 = vadd.f32 %v8186_v63, %v2692_v26  ;;  %v9147_v14 = vld [vmem:[#allocation13_spill] sm:$0xff]  ;;  %v3349_v26 = vadd.f32 %v9148_v51, %v2695_v21  ;;  %v9155_v21 = vld [vmem:[#allocation35_spill] sm:$0xff] }
 0x401   : > { %v3746_v43 = vadd.f32 %v9147_v14, %v3348_v50  ;;  %v9156_v14 = vld [vmem:[#allocation60_spill] sm:$0xff] }
 0x402   : > { %v5117_v5 = vadd.f32 %v8494_v55, %v5081_v1  ;;  %v3744_v35 = vadd.f32 %v8460_v25, %v3346_v19  ;;  %v8673_v44 = vpop.f32.mrf.mxu2  ;;  %v3745_v25 = vadd.f32 %v8472_v47, %v3347_v41  ;;  %v3747_v19 = vadd.f32 %v8505_v30, %v3349_v26  ;;  %v9152_v30 = vld [vmem:[#allocation31_spill] sm:$0xff] }
 0x403   : > { %v3971_v16 = vpop.f32.mrf.mxu3 }
 0x404   : > { %v5149_v18 = vmax.f32 %v5117_v5, 0.0  ;;  %v4030_v62 = vadd.f32 %v3971_v16, %v3743_v13  ;;  %v5035_v54 = vpop.f32.mrf.mxu1  ;;  %v9149_v16 = vld [vmem:[#allocation62_spill] sm:$0xff] }
 0x406   : > { %v5174_v2 = vpack.c.bf16 %v5149_v18, %v5148_v4  ;;  %v4684_v17 = vadd.f32 %v8611_v59, %v4030_v62  ;;  %v9150_v4 = vld [vmem:[#allocation52_spill] sm:$0xff] }
 0x407   : > { %v4640_v5 = vpop.f32.mrf.mxu0  ;;  %v2696_v18 = vadd.f32 %v9150_v4, %v9149_v16 }
 0x408   : > { %6106 = vmatmul.msk.bf16.gmra.mxu2 %vm1676_vm8, %v5174_v2  ;;  %v5082_v39 = vadd.f32 %v8613_v49, %v4684_v17 }
 0x40a   : > { %v5118_v63 = vadd.f32 %v8494_v55, %v5082_v39 }
 0x40b   : > { %v3973_v27 = vpop.f32.mrf.mxu3 }
 0x40c   : > { %v4031_v12 = vadd.f32 %v3973_v27, %v3744_v35  ;;  %v5150_v15 = vmax.f32 %v5118_v63, 0.0  ;;  %v5038_v62 = vpop.f32.mrf.mxu1  ;;  %v9151_v27 = vld [vmem:[#allocation88_spill] sm:$0xff]  ;;  %v9153_v63 = vld [vmem:[#allocation55_spill] sm:$0xff] }
 0x40d   : > { %v3350_v39 = vadd.f32 %v9151_v27, %v2696_v18 }
 0x40e   : > { %v4685_v53 = vadd.f32 %v4627_v28, %v4031_v12  ;;  %v6189_v12 = vld [vmem:[%s6651_s29] sm:$0xff]  }
 0x40f   : > { %v4642_v41 = vpop.f32.mrf.mxu0  ;;  %v3748_v45 = vadd.f32 %v8521_v58, %v3350_v39  ;;  %v6190_v61 = vunpack.c.l.bf16 %v6189_v12  ;;  %v2698_v58 = vadd.f32 %v9156_v14, %v9155_v21 }
 0x410   : > { %v5083_v59 = vadd.f32 %v5025_v24, %v4685_v53  ;;  %v8682_v24 = vpop.f32.mrf.mxu2 }
 0x412   : > { %v5119_v8 = vadd.f32 %v8494_v55, %v5083_v59  ;;  %v2697_v59 = vadd.f32 %v9153_v63, %v9152_v30 }
 0x413   : > { %v3976_v29 = vpop.f32.mrf.mxu3 }
 0x414   : > { %v5151_v49 = vmax.f32 %v5119_v8, 0.0  ;;  %v4032_v40 = vadd.f32 %v3976_v29, %v3745_v25  ;;  %v5040_v29 = vpop.f32.mrf.mxu1  ;;  %v3351_v50 = vadd.f32 %v9154_v37, %v2697_v59 }
 0x416   : > { %v5175_v28 = vpack.c.bf16 %v5151_v49, %v5150_v15  ;;  %v4686_v60 = vadd.f32 %v4630_v3, %v4032_v40 }
 0x418   : > { %6107 = vmatmul.msk.bf16.gmra.mxu2 %vm1676_vm8, %v5175_v28  ;;  %v5084_v7 = vadd.f32 %v5028_v52, %v4686_v60  ;;  %v8693_v17 = vpop.f32.mrf.mxu2 }
 0x41a   : > { %v5120_v13 = vadd.f32 %v8494_v55, %v5084_v7  ;;  %v6191_v7 = vunpack.c.h.bf16 %v6189_v12 }
 0x41b   : > { %v3978_v47 = vpop.f32.mrf.mxu3 }
 0x41c   : > { %v4033_v33 = vadd.f32 %v3978_v47, %v3746_v43  ;;  %v5152_v22 = vmax.f32 %v5120_v13, 0.0 }
 0x41e   : > { %v4687_v1 = vadd.f32 %v4632_v42, %v4033_v33 }
 0x420   : > { %v5085_v3 = vadd.f32 %v5030_v32, %v4687_v1  ;;  %v8701_v32 = vld [vmem:[%s8932_s6] ss:$0 sm:$0xff]  ;;  %v4645_v1 = vpop.f32.mrf.mxu0 }
 0x422   : > { %v5121_v2 = vadd.f32 %v8494_v55, %v5085_v3  ;;  %v5043_v3 = vpop.f32.mrf.mxu1 }
 0x423   : > { %v3981_v52 = vpop.f32.mrf.mxu3 }
 0x424   : > { %v5153_v42 = vmax.f32 %v5121_v2, 0.0  ;;  %v4034_v46 = vadd.f32 %v3981_v52, %v3747_v19  ;;  %v6252_v2 = vld [vmem:[%s6651_s29 + $0x8] sm:$0xff]  }
 0x425   : > { %v6194_v39 = vunpack.c.l.bf16 %v6252_v2 }
 0x426   : > { %v5176_v35 = vpack.c.bf16 %v5153_v42, %v5152_v22  ;;  %v4688_v53 = vadd.f32 %v4635_v20, %v4034_v46  ;;  %v9158_v22 = vld [vmem:[#allocation36_spill] sm:$0xff] }
 0x427   : > { %v9159_v42 = vld [vmem:[#allocation64_spill] sm:$0xff] }
 0x428   : > { %6108 = vmatmul.msk.bf16.gmra.mxu2 %vm1676_vm8, %v5176_v35  ;;  %v5086_v15 = vadd.f32 %v5033_v9, %v4688_v53  ;;  %v3749_v9 = vadd.f32 %v8537_v34, %v3351_v50  ;;  %v9157_v34 = vld [vmem:[#allocation90_spill] sm:$0xff]  ;;  %v2699_v46 = vadd.f32 %v9159_v42, %v9158_v22 }
 0x429   : > { %v3352_v18 = vadd.f32 %v9157_v34, %v2698_v58 }
 0x42a   : > { %v5122_v60 = vadd.f32 %v8494_v55, %v5086_v15  ;;  %v5045_v15 = vpop.f32.mrf.mxu1 }
 0x42b   : > { %v3983_v8 = vpop.f32.mrf.mxu3  ;;  %v5249_v25 = vpop.f32.mrf.mxu2  ;;  %v3750_v27 = vadd.f32 %v8552_v36, %v3352_v18 }
 0x42c   : > { %v4035_v49 = vadd.f32 %v3983_v8, %v3748_v45  ;;  %v5250_v20 = vadd.f32 %v8701_v32, %v5249_v25  ;;  %v5154_v51 = vmax.f32 %v5122_v60, 0.0  ;;  %v4647_v45 = vpop.f32.mrf.mxu0  ;;  %v9160_v8 = vld [vmem:[#allocation91_spill] sm:$0xff] }
 0x42d   : > { %v3353_v25 = vadd.f32 %v9160_v8, %v2699_v46 }
 0x42e   : > { %v4689_v40 = vadd.f32 %v4637_v23, %v4035_v49  ;;  %v5393_v28 = vadd.f32 %v6190_v61, %v5250_v20 }
 0x42f   : > { %v3751_v60 = vadd.f32 %v8568_v10, %v3353_v25  ;;  %v9164_v10 = vld [vmem:[#allocation40_spill] sm:$0xff] }
 0x430   : > { %v5087_v31 = vadd.f32 %v5035_v54, %v4689_v40  ;;  %v5425_v56 = vmax.f32 %v5393_v28, 0.0  ;;  %v9161_v40 = vld [vmem:[#allocation38_spill] sm:$0xff]  ;;  %v9162_v28 = vld [vmem:[#allocation67_spill] sm:$0xff] }
 0x432   : > { %v5123_v43 = vadd.f32 %v8494_v55, %v5087_v31  ;;  %v5457_v47 = vpack.c.bf16 %v5425_v56, %v5425_v56  ;;  %v6195_v31 = vunpack.c.h.bf16 %v6252_v2 }
 0x433   : > { %v3986_v23 = vpop.f32.mrf.mxu3  ;;  %v5251_v33 = vpop.f32.mrf.mxu2 }
 0x434   : > { %v5155_v26 = vmax.f32 %v5123_v43, 0.0  ;;  %5490 = vst.msk [vmem:[%s8715_s30] sm:$0xf] %vm5489_vm0, %v5457_v47  ;;  %v4036_v54 = vadd.f32 %v3986_v23, %v3749_v9  ;;  %v5252_v13 = vadd.f32 %v8701_v32, %v5251_v33  ;;  %v9163_v9 = vld [vmem:[#allocation46_spill] sm:$0xff]  ;;  %v6253_v23 = vld [vmem:[%s6651_s29 + $0x10] sm:$0xff]   ;;  %v4650_v33 = vpop.f32.mrf.mxu0 }
 0x435   : > { %v6198_v18 = vunpack.c.l.bf16 %v6253_v23  ;;  %v6199_v8 = vunpack.c.h.bf16 %v6253_v23 }
 0x436   : > { %v5394_v16 = vadd.f32 %v6191_v7, %v5252_v13  ;;  %v5177_v4 = vpack.c.bf16 %v5155_v26, %v5154_v51  ;;  %v4690_v19 = vadd.f32 %v4640_v5, %v4036_v54  ;;  %v9165_v54 = vld [vmem:[#allocation71_spill] sm:$0xff] }
 0x437   : > { %v2701_v13 = vadd.f32 %v9165_v54, %v9164_v10  ;;  %v9172_v54 = vld [vmem:[#allocation50_spill] sm:$0xff] }
 0x438   : > { %v5426_v52 = vmax.f32 %v5394_v16, 0.0  ;;  %6109 = vmatmul.msk.bf16.gmra.mxu2 %vm1676_vm8, %v5177_v4  ;;  %v5088_v30 = vadd.f32 %v5038_v62, %v4690_v19  ;;  %v2700_v62 = vadd.f32 %v9162_v28, %v9161_v40  ;;  %v5048_v16 = vpop.f32.mrf.mxu1 }
 0x43a   : > { %v5458_v35 = vpack.c.bf16 %v5426_v52, %v5426_v52  ;;  %v5124_v49 = vadd.f32 %v8494_v55, %v5088_v30  ;;  %v3354_v7 = vadd.f32 %v9163_v9, %v2700_v62  ;;  %v9167_v30 = vld [vmem:[#allocation42_spill] sm:$0xff] }
 0x43b   : > { %v3988_v12 = vpop.f32.mrf.mxu3  ;;  %v5254_v53 = vpop.f32.mrf.mxu2 }
 0x43c   : > { %5491 = vst.msk [vmem:[%s8715_s30 + $0x4] sm:$0xf] %vm5489_vm0, %v5458_v35  ;;  %v4037_v63 = vadd.f32 %v3988_v12, %v3750_v27  ;;  %v5255_v59 = vadd.f32 %v8701_v32, %v5254_v53  ;;  %v5156_v21 = vmax.f32 %v5124_v49, 0.0  ;;  %v3752_v34 = vadd.f32 %v8587_v11, %v3354_v7  ;;  %v9166_v35 = vld [vmem:[#allocation20_spill] sm:$0xff]  ;;  %v9168_v11 = vld [vmem:[#allocation74_spill] sm:$0xff] }
 0x43d   : > { %v3355_v27 = vadd.f32 %v9166_v35, %v2701_v13 }
 0x43e   : > { %v4691_v5 = vadd.f32 %v4642_v41, %v4037_v63  ;;  %v5395_v61 = vadd.f32 %v6194_v39, %v5255_v59  ;;  %v2702_v63 = vadd.f32 %v9168_v11, %v9167_v30  ;;  %v4652_v59 = vpop.f32.mrf.mxu0 }
 0x440   : > { %v5089_v20 = vadd.f32 %v5040_v29, %v4691_v5  ;;  %v5427_v36 = vmax.f32 %v5395_v61, 0.0  ;;  %v3753_v61 = vadd.f32 %v8600_v38, %v3355_v27  ;;  %v5050_v49 = vpop.f32.mrf.mxu1  ;;  %v9170_v38 = vld [vmem:[#allocation44_spill] sm:$0xff] }
 0x442   : > { %v5125_v37 = vadd.f32 %v8494_v55, %v5089_v20  ;;  %v5459_v50 = vpack.c.bf16 %v5427_v36, %v5427_v36 }
 0x443   : > { %v3991_v41 = vpop.f32.mrf.mxu3  ;;  %v5256_v56 = vpop.f32.mrf.mxu2 }
 0x444   : > { %v5157_v14 = vmax.f32 %v5125_v37, 0.0  ;;  %5492 = vst.msk [vmem:[%s8715_s30 + $0x8] sm:$0xf] %vm5489_vm0, %v5459_v50  ;;  %v4038_v58 = vadd.f32 %v3991_v41, %v3751_v60  ;;  %v5257_v29 = vadd.f32 %v8701_v32, %v5256_v56  ;;  %v9169_v37 = vld [vmem:[#allocation22_spill] sm:$0xff]  ;;  %v6254_v60 = vld [vmem:[%s6651_s29 + $0x18] sm:$0xff]  }
 0x445   : > { %v3356_v50 = vadd.f32 %v9169_v37, %v2702_v63  ;;  %v9171_v56 = vld [vmem:[#allocation77_spill] sm:$0xff] }
 0x446   : > { %v5396_v43 = vadd.f32 %v6195_v31, %v5257_v29  ;;  %v5178_v47 = vpack.c.bf16 %v5157_v14, %v5156_v21  ;;  %v4692_v51 = vadd.f32 %v4645_v1, %v4038_v58  ;;  %v2703_v21 = vadd.f32 %v9171_v56, %v9170_v38  ;;  %v4655_v9 = vpop.f32.mrf.mxu0 }
 0x447   : > { %v3754_v58 = vadd.f32 %v8616_v6, %v3356_v50  ;;  %v6202_v29 = vunpack.c.l.bf16 %v6254_v60 }
 0x448   : > { %v5428_v26 = vmax.f32 %v5396_v43, 0.0  ;;  %6110 = vmatmul.msk.bf16.gmra.mxu2 %vm1676_vm8, %v5178_v47  ;;  %v5090_v52 = vadd.f32 %v5043_v3, %v4692_v51  ;;  %v3357_v13 = vadd.f32 %v9172_v54, %v2703_v21 }
 0x44a   : > { %v5460_v4 = vpack.c.bf16 %v5428_v26, %v5428_v26  ;;  %v5126_v39 = vadd.f32 %v8494_v55, %v5090_v52 }
 0x44b   : > { %v3993_v2 = vpop.f32.mrf.mxu3  ;;  %v5259_v19 = vpop.f32.mrf.mxu2 }
 0x44c   : > { %5493 = vst.msk [vmem:[%s8715_s30 + $0xc] sm:$0xf] %vm5489_vm0, %v5460_v4  ;;  %v4039_v22 = vadd.f32 %v3993_v2, %v3752_v34  ;;  %v5260_v42 = vadd.f32 %v8701_v32, %v5259_v19  ;;  %v5158_v20 = vmax.f32 %v5126_v39, 0.0  ;;  %v9174_v2 = vld [vmem:[#allocation81_spill] sm:$0xff] }
 0x44e   : > { %v4693_v1 = vadd.f32 %v4647_v45, %v4039_v22  ;;  %v5397_v46 = vadd.f32 %v6198_v18, %v5260_v42  ;;  %v9173_v18 = vld [vmem:[#allocation69_spill] sm:$0xff]  ;;  %v3755_v22 = vadd.f32 %v8638_v48, %v3357_v13  ;;  %v6203_v42 = vunpack.c.h.bf16 %v6254_v60  ;;  %v4657_v63 = vpop.f32.mrf.mxu0 }
 0x44f   : > { %v2704_v19 = vadd.f32 %v9174_v2, %v9173_v18  ;;  %v6255_v48 = vld [vmem:[%s6651_s29 + $0x20] sm:$0xff]  }
 0x450   : > { %v5091_v12 = vadd.f32 %v5045_v15, %v4693_v1  ;;  %v5429_v53 = vmax.f32 %v5397_v46, 0.0  ;;  %v9175_v1 = vld [vmem:[#allocation14_spill] sm:$0xff]  ;;  %v9176_v46 = vld [vmem:[#allocation85_spill] sm:$0xff]  ;;  %v6206_v37 = vunpack.c.l.bf16 %v6255_v48  ;;  %v6207_v54 = vunpack.c.h.bf16 %v6255_v48 }
 0x451   : > { %v2708_v35 = vadd.f32 %v9176_v46, %v9175_v1 }
 0x452   : > { %v5127_v3 = vadd.f32 %v8494_v55, %v5091_v12  ;;  %v5461_v5 = vpack.c.bf16 %v5429_v53, %v5429_v53 }
 0x453   : > { %v3996_v45 = vpop.f32.mrf.mxu3  ;;  %v5261_v25 = vpop.f32.mrf.mxu2 }
 0x454   : > { %v5159_v36 = vmax.f32 %v5127_v3, 0.0  ;;  %5494 = vst.msk [vmem:[%s8715_s30 + $0x10] sm:$0xf] %vm5489_vm0, %v5461_v5  ;;  %v4040_v15 = vadd.f32 %v3996_v45, %v3753_v61  ;;  %v5262_v40 = vadd.f32 %v8701_v32, %v5261_v25  ;;  %v9177_v5 = vld [vmem:[#allocation24_spill] sm:$0xff] }
 0x455   : > { %v3358_v61 = vadd.f32 %v9177_v5, %v2704_v19 }
 0x456   : > { %v5398_v28 = vadd.f32 %v6199_v8, %v5262_v40  ;;  %v5179_v62 = vpack.c.bf16 %v5159_v36, %v5158_v20  ;;  %v4694_v31 = vadd.f32 %v4650_v33, %v4040_v15  ;;  %v5053_v33 = vpop.f32.mrf.mxu1  ;;  %v9179_v36 = vld [vmem:[#allocation78_spill] sm:$0xff] }
 0x457   : > { %v9180_v15 = vld [vmem:[#allocation82_spill] sm:$0xff] }
 0x458   : > { %v5430_v41 = vmax.f32 %v5398_v28, 0.0  ;;  %6111 = vmatmul.msk.bf16.gmra.mxu2 %vm1676_vm8, %v5179_v62  ;;  %v5092_v7 = vadd.f32 %v5048_v16, %v4694_v31  ;;  %v2705_v40 = vadd.f32 %v9180_v15, %v9179_v36  ;;  %v3756_v62 = vadd.f32 %v8651_v57, %v3358_v61 }
 0x45a   : > { %v5462_v14 = vpack.c.bf16 %v5430_v41, %v5430_v41  ;;  %v5128_v4 = vadd.f32 %v8494_v55, %v5092_v7  ;;  %v9183_v7 = vld [vmem:[#allocation83_spill] sm:$0xff] }
 0x45b   : > { %v3998_v43 = vpop.f32.mrf.mxu3  ;;  %v5264_v47 = vpop.f32.mrf.mxu2 }
 0x45c   : > { %5495 = vst.msk [vmem:[%s8715_s30 + $0x14] sm:$0xf] %vm5489_vm0, %v5462_v14  ;;  %v4041_v23 = vadd.f32 %v3998_v43, %v3754_v58  ;;  %v5265_v51 = vadd.f32 %v8701_v32, %v5264_v47  ;;  %v5160_v12 = vmax.f32 %v5128_v4, 0.0  ;;  %v9181_v58 = vld [vmem:[#allocation26_spill] sm:$0xff]  ;;  %v4660_v43 = vpop.f32.mrf.mxu0 }
 0x45e   : > { %v4695_v26 = vadd.f32 %v4652_v59, %v4041_v23  ;;  %v5399_v10 = vadd.f32 %v6202_v29, %v5265_v51  ;;  %v5055_v8 = vpop.f32.mrf.mxu1  ;;  %v3359_v29 = vadd.f32 %v9181_v58, %v2705_v40 }
 0x460   : > { %v5093_v34 = vadd.f32 %v5050_v49, %v4695_v26  ;;  %v5431_v6 = vmax.f32 %v5399_v10, 0.0  ;;  %v9178_v49 = vld [vmem:[#allocation33_spill] sm:$0xff]  ;;  %v3757_v10 = vadd.f32 %v8663_v0, %v3359_v29  ;;  %v6257_v29 = vld [vmem:[%s6651_s29 + $0x30] sm:$0xff]  }
 0x461   : > { %v3362_v20 = vadd.f32 %v9178_v49, %v2708_v35  ;;  %v9185_v35 = vld [vmem:[#allocation93_spill] sm:$0xff] }
 0x462   : > { %v5129_v16 = vadd.f32 %v8494_v55, %v5093_v34  ;;  %v5463_v52 = vpack.c.bf16 %v5431_v6, %v5431_v6 }
 0x463   : > { %v4001_v27 = vpop.f32.mrf.mxu3  ;;  %v5266_v39 = vpop.f32.mrf.mxu2  ;;  %v8784_v50 = vadd.f32 %v8693_v17, %v3362_v20  ;;  %v9182_v17 = vld [vmem:[#allocation92_spill] sm:$0xff] }
 0x464   : > { %v5161_v53 = vmax.f32 %v5129_v16, 0.0  ;;  %5496 = vst.msk [vmem:[%s8715_s30 + $0x18] sm:$0xf] %vm5489_vm0, %v5463_v52  ;;  %v4042_v30 = vadd.f32 %v4001_v27, %v3755_v22  ;;  %v5267_v11 = vadd.f32 %v8701_v32, %v5266_v39  ;;  %v2706_v23 = vadd.f32 %v9183_v7, %v9182_v17  ;;  %v9184_v52 = vld [vmem:[#allocation57_spill] sm:$0xff]  ;;  %v4662_v0 = vpop.f32.mrf.mxu0  ;;  %v9186_v27 = vld [vmem:[#allocation84_spill] sm:$0xff] }
 0x465   : > { %v2707_v39 = vadd.f32 %v9186_v27, %v9185_v35 }
 0x466   : > { %v5400_v59 = vadd.f32 %v6203_v42, %v5267_v11  ;;  %v5180_v3 = vpack.c.bf16 %v5161_v53, %v5160_v12  ;;  %v4696_v45 = vadd.f32 %v4655_v9, %v4042_v30  ;;  %v5058_v51 = vpop.f32.mrf.mxu1  ;;  %v3360_v22 = vadd.f32 %v9184_v52, %v2706_v23  ;;  %v6256_v42 = vld [vmem:[%s6651_s29 + $0x28] sm:$0xff]  }
 0x467   : > { %v6210_v30 = vunpack.c.l.bf16 %v6256_v42 }
 0x468   : > { %v5432_v25 = vmax.f32 %v5400_v59, 0.0  ;;  %6112 = vmatmul.msk.bf16.gmra.mxu2 %vm1676_vm8, %v5180_v3  ;;  %v5094_v41 = vadd.f32 %v5053_v33, %v4696_v45  ;;  %v3758_v53 = vadd.f32 %v8673_v44, %v3360_v22  ;;  %v9187_v45 = vld [vmem:[#allocation29_spill] sm:$0xff] }
 0x46a   : > { %v5464_v28 = vpack.c.bf16 %v5432_v25, %v5432_v25  ;;  %v5130_v57 = vadd.f32 %v8494_v55, %v5094_v41  ;;  %v3361_v25 = vadd.f32 %v9187_v45, %v2707_v39 }
 0x46b   : > { %v4003_v60 = vpop.f32.mrf.mxu3  ;;  %v5269_v31 = vpop.f32.mrf.mxu2 }
 0x46c   : > { %5497 = vst.msk [vmem:[%s8715_s30 + $0x1c] sm:$0xf] %vm5489_vm0, %v5464_v28  ;;  %v4043_v38 = vadd.f32 %v4003_v60, %v3756_v62  ;;  %v5270_v56 = vadd.f32 %v8701_v32, %v5269_v31  ;;  %v5162_v34 = vmax.f32 %v5130_v57, 0.0  ;;  %v4665_v40 = vpop.f32.mrf.mxu0  ;;  %v3759_v28 = vadd.f32 %v8682_v24, %v3361_v25 }
 0x46d   : > { %v6211_v62 = vunpack.c.h.bf16 %v6256_v42  ;;  %v6214_v57 = vunpack.c.l.bf16 %v6257_v29 }
 0x46e   : > { %v4697_v21 = vadd.f32 %v4657_v63, %v4043_v38  ;;  %v5401_v14 = vadd.f32 %v6206_v37, %v5270_v56  ;;  %v5060_v61 = vpop.f32.mrf.mxu1 }
 0x470   : > { %v5095_v47 = vadd.f32 %v5055_v8, %v4697_v21  ;;  %v5433_v9 = vmax.f32 %v5401_v14, 0.0 }
 0x472   : > { %v5131_v33 = vadd.f32 %v8494_v55, %v5095_v47  ;;  %v5465_v26 = vpack.c.bf16 %v5433_v9, %v5433_v9 }
 0x473   : > { %v4006_v13 = vpop.f32.mrf.mxu3  ;;  %v5271_v4 = vpop.f32.mrf.mxu2 }
 0x474   : > { %v5163_v6 = vmax.f32 %v5131_v33, 0.0  ;;  %5498 = vst.msk [vmem:[%s8715_s30 + $0x20] sm:$0xf] %vm5489_vm0, %v5465_v26  ;;  %v4044_v18 = vadd.f32 %v4006_v13, %v3757_v10  ;;  %v5272_v2 = vadd.f32 %v8701_v32, %v5271_v4 }
 0x476   : > { %v5402_v19 = vadd.f32 %v6207_v54, %v5272_v2  ;;  %v5181_v16 = vpack.c.bf16 %v5163_v6, %v5162_v34  ;;  %v4698_v1 = vadd.f32 %v4660_v43, %v4044_v18  ;;  %v5063_v21 = vpop.f32.mrf.mxu1  ;;  %v6369_v54 = vld [vmem:[%s8930_s4] ss:$0 sm:$0xff]  ;;  %v6215_v2 = vunpack.c.h.bf16 %v6257_v29 }
 0x478   : > { %v5434_v46 = vmax.f32 %v5402_v19, 0.0  ;;  %6113 = vmatmul.msk.bf16.gmra.mxu2 %vm1676_vm8, %v5181_v16  ;;  %v5096_v59 = vadd.f32 %v5058_v51, %v4698_v1  ;;  %v4667_v51 = vpop.f32.mrf.mxu0  ;;  %v6258_v1 = vld [vmem:[%s6651_s29 + $0x38] sm:$0xff]  }
 0x479   : > { %v6218_v35 = vunpack.c.l.bf16 %v6258_v1 }
 0x47a   : > { %v5466_v12 = vpack.c.bf16 %v5434_v46, %v5434_v46  ;;  %v5132_v49 = vadd.f32 %v8494_v55, %v5096_v59 }
 0x47b   : > { %v4008_v11 = vpop.f32.mrf.mxu3  ;;  %v5274_v63 = vpop.f32.mrf.mxu2 }
 0x47c   : > { %5499 = vst.msk [vmem:[%s8715_s30 + $0x24] sm:$0xf] %vm5489_vm0, %v5466_v12  ;;  %v4045_v3 = vadd.f32 %v4008_v11, %v3758_v53  ;;  %v5275_v5 = vadd.f32 %v8701_v32, %v5274_v63  ;;  %v5164_v31 = vmax.f32 %v5132_v49, 0.0  ;;  %v6219_v11 = vunpack.c.h.bf16 %v6258_v1 }
 0x47e   : > { %v4699_v48 = vadd.f32 %v4662_v0, %v4045_v3  ;;  %v5403_v8 = vadd.f32 %v6210_v30, %v5275_v5  ;;  %v5065_v10 = vpop.f32.mrf.mxu1  ;;  %v6259_v5 = vld [vmem:[%s6651_s29 + $0x40] sm:$0xff]  }
 0x480   : > { %v5097_v20 = vadd.f32 %v5060_v61, %v4699_v48  ;;  %v5435_v36 = vmax.f32 %v5403_v8, 0.0  ;;  %v6222_v8 = vunpack.c.l.bf16 %v6259_v5 }
 0x482   : > { %v5133_v44 = vadd.f32 %v8494_v55, %v5097_v20  ;;  %v5467_v15 = vpack.c.bf16 %v5435_v36, %v5435_v36 }
 0x483   : > { %v4011_v37 = vpop.f32.mrf.mxu3  ;;  %v5276_v60 = vpop.f32.mrf.mxu2 }
 0x484   : > { %v5165_v41 = vmax.f32 %v5133_v44, 0.0  ;;  %5500 = vst.msk [vmem:[%s8715_s30 + $0x28] sm:$0xf] %vm5489_vm0, %v5467_v15  ;;  %v4046_v38 = vadd.f32 %v4011_v37, %v3759_v28  ;;  %v5277_v56 = vadd.f32 %v8701_v32, %v5276_v60  ;;  %v6223_v44 = vunpack.c.h.bf16 %v6259_v5 }
 0x486   : > { %v5404_v14 = vadd.f32 %v6211_v62, %v5277_v56  ;;  %v5182_v58 = vpack.c.bf16 %v5165_v41, %v5164_v31  ;;  %v4700_v55 = vadd.f32 %v4665_v40, %v4046_v38  ;;  %v6260_v62 = vld [vmem:[%s6651_s29 + $0x48] sm:$0xff]  }
 0x487   : > { %v6226_v31 = vunpack.c.l.bf16 %v6260_v62 }
 0x488   : > { %v5436_v43 = vmax.f32 %v5404_v14, 0.0  ;;  %6114 = vmatmul.msk.bf16.gmra.mxu2 %vm1676_vm8, %v5182_v58  ;;  %v5098_v17 = vadd.f32 %v5063_v21, %v4700_v55  ;;  %v6227_v58 = vunpack.c.h.bf16 %v6260_v62 }
 0x48a   : > { %v5468_v24 = vpack.c.bf16 %v5436_v43, %v5436_v43  ;;  %v5134_v13 = vadd.f32 %v6369_v54, %v5098_v17 }
 0x48b   : > { %v4013_v47 = vpop.f32.mrf.mxu3  ;;  %v5279_v9 = vpop.f32.mrf.mxu2 }
 0x48c   : > { %5501 = vst.msk [vmem:[%s8715_s30 + $0x2c] sm:$0xf] %vm5489_vm0, %v5468_v24  ;;  %v4047_v7 = vadd.f32 %v4013_v47, %v8784_v50  ;;  %v5280_v23 = vadd.f32 %v8701_v32, %v5279_v9  ;;  %v5166_v19 = vmax.f32 %v5134_v13, 0.0  ;;  %v6261_v24 = vld [vmem:[%s6651_s29 + $0x50] sm:$0xff]  }
 0x48d   : > { %v6230_v9 = vunpack.c.l.bf16 %v6261_v24 }
 0x48e   : > { %v4701_v33 = vadd.f32 %v4667_v51, %v4047_v7  ;;  %v5405_v26 = vadd.f32 %v6214_v57, %v5280_v23 }
 0x490   : > { %v5099_v4 = vadd.f32 %v5065_v10, %v4701_v33  ;;  %v5437_v34 = vmax.f32 %v5405_v26, 0.0  ;;  %v6231_v26 = vunpack.c.h.bf16 %v6261_v24 }
 0x492   : > { %v5135_v6 = vadd.f32 %v6369_v54, %v5099_v4  ;;  %v5469_v18 = vpack.c.bf16 %v5437_v34, %v5437_v34  ;;  %v6262_v4 = vld [vmem:[%s6651_s29 + $0x58] sm:$0xff]  }
 0x493   : > { %v5281_v50 = vpop.f32.mrf.mxu2 }
 0x494   : > { %v5167_v16 = vmax.f32 %v5135_v6, 0.0  ;;  %5502 = vst.msk [vmem:[%s8715_s30 + $0x30] sm:$0xf] %vm5489_vm0, %v5469_v18  ;;  %v5282_v52 = vadd.f32 %v8701_v32, %v5281_v50  ;;  %v6234_v18 = vunpack.c.l.bf16 %v6262_v4 }
 0x496   : > { %v5406_v22 = vadd.f32 %v6215_v2, %v5282_v52  ;;  %v5183_v42 = vpack.c.bf16 %v5167_v16, %v5166_v19 }
 0x498   : > { %v5438_v46 = vmax.f32 %v5406_v22, 0.0  ;;  %6115 = vmatmul.msk.bf16.gmra.mxu2 %vm1676_vm8, %v5183_v42  ;;  %v6235_v22 = vunpack.c.h.bf16 %v6262_v4 }
 0x49a   : > { %v5470_v0 = vpack.c.bf16 %v5438_v46, %v5438_v46 }
 0x49b   : > { %v5284_v27 = vpop.f32.mrf.mxu2 }
 0x49c   : > { %5503 = vst.msk [vmem:[%s8715_s30 + $0x34] sm:$0xf] %vm5489_vm0, %v5470_v0  ;;  %v5285_v39 = vadd.f32 %v8701_v32, %v5284_v27  ;;  %v6263_v0 = vld [vmem:[%s6651_s29 + $0x60] sm:$0xff]  }
 0x49e   : > { %v5407_v12 = vadd.f32 %v6218_v35, %v5285_v39  ;;  %v6238_v39 = vunpack.c.l.bf16 %v6263_v0 }
 0x4a0   : > { %v5439_v53 = vmax.f32 %v5407_v12, 0.0 }
 0x4a2   : > { %v5471_v30 = vpack.c.bf16 %v5439_v53, %v5439_v53 }
 0x4a3   : > { %v5286_v63 = vpop.f32.mrf.mxu2 }
 0x4a4   : > { %5504 = vst.msk [vmem:[%s8715_s30 + $0x38] sm:$0xf] %vm5489_vm0, %v5471_v30  ;;  %v5287_v59 = vadd.f32 %v8701_v32, %v5286_v63 }
 0x4a6   : > { %v5408_v3 = vadd.f32 %v6219_v11, %v5287_v59  ;;  %v6239_v59 = vunpack.c.h.bf16 %v6263_v0 }
 0x4a8   : > { %v5440_v61 = vmax.f32 %v5408_v3, 0.0 }
 0x4aa   : > { %v5472_v48 = vpack.c.bf16 %v5440_v61, %v5440_v61 }
 0x4ab   : > { %v5289_v45 = vpop.f32.mrf.mxu2 }
 0x4ac   : > { %5505 = vst.msk [vmem:[%s8715_s30 + $0x3c] sm:$0xf] %vm5489_vm0, %v5472_v48  ;;  %v5290_v25 = vadd.f32 %v8701_v32, %v5289_v45  ;;  %v6264_v48 = vld [vmem:[%s6651_s29 + $0x68] sm:$0xff]  }
 0x4ae   : > { %v5409_v49 = vadd.f32 %v6222_v8, %v5290_v25  ;;  %v6242_v25 = vunpack.c.l.bf16 %v6264_v48 }
 0x4b0   : > { %v5441_v20 = vmax.f32 %v5409_v49, 0.0 }
 0x4b2   : > { %v5473_v36 = vpack.c.bf16 %v5441_v20, %v5441_v20 }
 0x4b3   : > { %v5291_v15 = vpop.f32.mrf.mxu2 }
 0x4b4   : > { %5506 = vst.msk [vmem:[%s8715_s30 + $0x40] sm:$0xf] %vm5489_vm0, %v5473_v36  ;;  %v5292_v40 = vadd.f32 %v8701_v32, %v5291_v15 }
 0x4b6   : > { %v5410_v28 = vadd.f32 %v6223_v44, %v5292_v40  ;;  %v6243_v40 = vunpack.c.h.bf16 %v6264_v48 }
 0x4b8   : > { %v5442_v37 = vmax.f32 %v5410_v28, 0.0 }
 0x4ba   : > { %v5474_v60 = vpack.c.bf16 %v5442_v37, %v5442_v37 }
 0x4bb   : > { %v5294_v41 = vpop.f32.mrf.mxu2 }
 0x4bc   : > { %5507 = vst.msk [vmem:[%s8715_s30 + $0x44] sm:$0xf] %vm5489_vm0, %v5474_v60  ;;  %v5295_v38 = vadd.f32 %v8701_v32, %v5294_v41  ;;  %v6265_v60 = vld [vmem:[%s6651_s29 + $0x70] sm:$0xff]  }
 0x4be   : > { %v5411_v56 = vadd.f32 %v6226_v31, %v5295_v38  ;;  %v6246_v38 = vunpack.c.l.bf16 %v6265_v60 }
 0x4c0   : > { %v5443_v21 = vmax.f32 %v5411_v56, 0.0 }
 0x4c2   : > { %v5475_v14 = vpack.c.bf16 %v5443_v21, %v5443_v21 }
 0x4c3   : > { %v5296_v29 = vpop.f32.mrf.mxu2 }
 0x4c4   : > { %5508 = vst.msk [vmem:[%s8715_s30 + $0x48] sm:$0xf] %vm5489_vm0, %v5475_v14  ;;  %v5297_v55 = vadd.f32 %v8701_v32, %v5296_v29 }
 0x4c6   : > { %v5412_v43 = vadd.f32 %v6227_v58, %v5297_v55  ;;  %v6247_v55 = vunpack.c.h.bf16 %v6265_v60 }
 0x4c8   : > { %v5444_v57 = vmax.f32 %v5412_v43, 0.0 }
 0x4ca   : > { %v5476_v47 = vpack.c.bf16 %v5444_v57, %v5444_v57 }
 0x4cb   : > { %v5299_v17 = vpop.f32.mrf.mxu2 }
 0x4cc   : > { %5509 = vst.msk [vmem:[%s8715_s30 + $0x4c] sm:$0xf] %vm5489_vm0, %v5476_v47  ;;  %v5300_v7 = vadd.f32 %v8701_v32, %v5299_v17  ;;  %v6266_v47 = vld [vmem:[%s6651_s29 + $0x78] sm:$0xff]   ;;  %s5534_s29 = scalar_lea.hbm %s8933_s7, %s6187_s17 }
 0x4cd   : > { %s5537_s11 = sshll.u32 %s5534_s29, 4  ;;  %s5538_s11 = int_to_ptr.hbm [resolvable:$true] %s5537_s11 }
 0x4ce   : > { %v5413_v23 = vadd.f32 %v6230_v9, %v5300_v7  ;;  %v6250_v7 = vunpack.c.l.bf16 %v6266_v47  ;;  %s6444_s22 = sshra.s32 %s5538_s11, 4  ;;  %s6445_s22 = int_to_ptr.hbm [resolvable:$true] %s6444_s22 }
 0x4cf   : > { %s6446_s14 = scalar_lea.hbm %s6445_s22, 128  ;;  %p6451_p11 = scmp.lt.s32.totalorder %s6445_s22, %s8933_s7 }
 0x4d0   : > { %v5445_v51 = vmax.f32 %v5413_v23, 0.0  ;;  %p6447_p1 = scmp.ne.s32.totalorder %s6445_s22, %s6446_s14  ;;  %p6452_p9 = scmp.lt.s32.totalorder %s6450_s13, %s6446_s14 }
 0x4d2   : > { %v5477_v33 = vpack.c.bf16 %v5445_v51, %v5445_v51  ;;  %p6448_p4 = pnand %p6447_p1, %p6617_p7  ;;  %p6453_p2 = por %p6452_p9, %p6451_p11 }
 0x4d3   : > { %v5301_v10 = vpop.f32.mrf.mxu2 }
 0x4d4   : > { %5510 = vst.msk [vmem:[%s8715_s30 + $0x50] sm:$0xf] %vm5489_vm0, %v5477_v33  ;;  %v5302_v54 = vadd.f32 %v8701_v32, %v5301_v10  ;;  %p6449_p8 = pneg %p6448_p4 }
 0x4d6   : > { %v5414_v13 = vadd.f32 %v6231_v26, %v5302_v54  ;;  %v6251_v54 = vunpack.c.h.bf16 %v6266_v47  ;;  %p6454_p10 = pnand %p6453_p2, %p6449_p8 }
 0x4d8   : > { %v5446_v34 = vmax.f32 %v5414_v13, 0.0 }
 0x4da   : > { %v5478_v6 = vpack.c.bf16 %v5446_v34, %v5446_v34 }
 0x4db   : > { %v5304_v2 = vpop.f32.mrf.mxu2 }
 0x4dc   : > { %5511 = vst.msk [vmem:[%s8715_s30 + $0x54] sm:$0xf] %vm5489_vm0, %v5478_v6  ;;  %v5305_v50 = vadd.f32 %v8701_v32, %v5304_v2 }
 0x4de   : > { %v5415_v19 = vadd.f32 %v6234_v18, %v5305_v50 }
 0x4e0   : > { %v5447_v16 = vmax.f32 %v5415_v19, 0.0 }
 0x4e2   : > { %v5479_v52 = vpack.c.bf16 %v5447_v16, %v5447_v16 }
 0x4e3   : > { %v5306_v42 = vpop.f32.mrf.mxu2 }
 0x4e4   : > { %5512 = vst.msk [vmem:[%s8715_s30 + $0x58] sm:$0xf] %vm5489_vm0, %v5479_v52  ;;  %v5307_v1 = vadd.f32 %v8701_v32, %v5306_v42 }
 0x4e6   : > { %v5416_v46 = vadd.f32 %v6235_v22, %v5307_v1 }
 0x4e8   : > { %v5448_v35 = vmax.f32 %v5416_v46, 0.0 }
 0x4ea   : > { %v5480_v27 = vpack.c.bf16 %v5448_v35, %v5448_v35 }
 0x4eb   : > { %v5309_v12 = vpop.f32.mrf.mxu2 }
 0x4ec   : > { %5513 = vst.msk [vmem:[%s8715_s30 + $0x5c] sm:$0xf] %vm5489_vm0, %v5480_v27  ;;  %v5310_v53 = vadd.f32 %v8701_v32, %v5309_v12 }
 0x4ee   : > { %v5417_v30 = vadd.f32 %v6238_v39, %v5310_v53 }
 0x4f0   : > { %v5449_v11 = vmax.f32 %v5417_v30, 0.0 }
 0x4f2   : > { %v5481_v63 = vpack.c.bf16 %v5449_v11, %v5449_v11 }
 0x4f3   : > { %v5311_v3 = vpop.f32.mrf.mxu2 }
 0x4f4   : > { %5514 = vst.msk [vmem:[%s8715_s30 + $0x60] sm:$0xf] %vm5489_vm0, %v5481_v63  ;;  %v5312_v5 = vadd.f32 %v8701_v32, %v5311_v3 }
 0x4f6   : > { %v5418_v61 = vadd.f32 %v6239_v59, %v5312_v5 }
 0x4f8   : > { %v5450_v8 = vmax.f32 %v5418_v61, 0.0 }
 0x4fa   : > { %v5482_v45 = vpack.c.bf16 %v5450_v8, %v5450_v8 }
 0x4fb   : > { %v5314_v49 = vpop.f32.mrf.mxu2 }
 0x4fc   : > { %5515 = vst.msk [vmem:[%s8715_s30 + $0x64] sm:$0xf] %vm5489_vm0, %v5482_v45  ;;  %v5315_v20 = vadd.f32 %v8701_v32, %v5314_v49 }
 0x4fe   : > { %v5419_v36 = vadd.f32 %v6242_v25, %v5315_v20 }
 0x500   : > { %v5451_v44 = vmax.f32 %v5419_v36, 0.0 }
 0x502   : > { %v5483_v15 = vpack.c.bf16 %v5451_v44, %v5451_v44 }
 0x503   : > { %v5316_v28 = vpop.f32.mrf.mxu2 }
 0x504   : > { %5516 = vst.msk [vmem:[%s8715_s30 + $0x68] sm:$0xf] %vm5489_vm0, %v5483_v15  ;;  %v5317_v62 = vadd.f32 %v8701_v32, %v5316_v28 }
 0x506   : > { %v5420_v37 = vadd.f32 %v6243_v40, %v5317_v62 }
 0x508   : > { %v5452_v31 = vmax.f32 %v5420_v37, 0.0 }
 0x50a   : > { %v5484_v41 = vpack.c.bf16 %v5452_v31, %v5452_v31 }
 0x50b   : > { %v5319_v56 = vpop.f32.mrf.mxu2 }
 0x50c   : > { %5517 = vst.msk [vmem:[%s8715_s30 + $0x6c] sm:$0xf] %vm5489_vm0, %v5484_v41  ;;  %v5320_v21 = vadd.f32 %v8701_v32, %v5319_v56 }
 0x50e   : > { %v5421_v14 = vadd.f32 %v6246_v38, %v5320_v21 }
 0x510   : > { %v5453_v58 = vmax.f32 %v5421_v14, 0.0 }
 0x512   : > { %v5485_v29 = vpack.c.bf16 %v5453_v58, %v5453_v58 }
 0x513   : > { %v5321_v43 = vpop.f32.mrf.mxu2 }
 0x514   : > { %5518 = vst.msk [vmem:[%s8715_s30 + $0x70] sm:$0xf] %vm5489_vm0, %v5485_v29  ;;  %v5322_v24 = vadd.f32 %v8701_v32, %v5321_v43 }
 0x516   : > { %v5422_v57 = vadd.f32 %v6247_v55, %v5322_v24 }
 0x518   : > { %v5454_v9 = vmax.f32 %v5422_v57, 0.0 }
 0x51a   : > { %v5486_v17 = vpack.c.bf16 %v5454_v9, %v5454_v9 }
 0x51b   : > { %v5324_v23 = vpop.f32.mrf.mxu2 }
 0x51c   : > { %5519 = vst.msk [vmem:[%s8715_s30 + $0x74] sm:$0xf] %vm5489_vm0, %v5486_v17  ;;  %v5325_v51 = vadd.f32 %v8701_v32, %v5324_v23 }
 0x51e   : > { %v5423_v33 = vadd.f32 %v6250_v7, %v5325_v51 }
 0x520   : > { %v5455_v26 = vmax.f32 %v5423_v33, 0.0 }
 0x522   : > { %v5487_v10 = vpack.c.bf16 %v5455_v26, %v5455_v26 }
 0x523   : > { %v5326_v13 = vpop.f32.mrf.mxu2 }
 0x524   : > { %5520 = vst.msk [vmem:[%s8715_s30 + $0x78] sm:$0xf] %vm5489_vm0, %v5487_v10  ;;  %v5327_v4 = vadd.f32 %v8701_v32, %v5326_v13 }
 0x526   : > { %v5424_v34 = vadd.f32 %v6251_v54, %v5327_v4 }
 0x528   : > { %v5456_v6 = vmax.f32 %v5424_v34, 0.0 }
 0x52a   : > { %v5488_v18 = vpack.c.bf16 %v5456_v6, %v5456_v6 }
 0x52c   : > { %5521 = vst.msk [vmem:[%s8715_s30 + $0x7c] sm:$0xf] %vm5489_vm0, %v5488_v18 }
 0x52d   : > { %6457 = shalt.err (!%p6454_p10)
}
 0x52e   : > { %s6508_s23 = smov 64   ;;  %s6509_s30 = smov 4  }
 0x52f   : > { %6276 = dma.vmem_to_hbm [thread:$0]  (%p6617_p7), %s5536_s10, 2048, %s5538_s11, %s5523_s28, %s6508_s23, %s6508_s23, %s6509_s30  }
 0x530 PF: > { %s5552_s17 = sand.u32 1, %s6488_s24   ;;  %p9188_p12 = scmp.ge.s32.totalorder %s6500_s27, 2 }
 0x531   : > { %s5553_s18 = scalar_lea.sflag [#allocation5], %s5552_s17 }
 0x532   : > { %p6287_p13 = pnand %p9188_p12, %p6585_p6 }
 0x534   : > { %p6288_p0 = pneg %p6287_p13 }
 0x536   : > { %6483 = dma.done.wait (%p6288_p0), %s5553_s18, 2048  }
 0x537   : > { %6485 = vsyncadd (%p6288_p0), %s5553_s18, 4294965248  ;;  %p21_p3 = scmp.ge.s32.totalorder %s6603_s15, 4   ;;  %s9189_s24 = smov %s6492_s25 }
 0x538   : > { %s9190_s25 = smov %s6496_s26  ;;  %s9191_s26 = smov %s6613_s20 }
 0x539   : > { %s9192_s27 = smov %s6603_s15  ;;  %23 = sbr.rel (!%p21_p3) target bundleno = 8 (0x8), region = 108 }
 0x53e   :  { %5559 = vsyncpa [#allocation4], 1 }
 0x53f   :  { %5561 = vsyncpa [#allocation4 + $0x1], 1 }
 0x540   :  { %5562 = vsyncpa [#allocation7], 1 }
 0x541   :  { %5563 = vsyncpa [#allocation5], 1 }
 0x542   :  { %5565 = vsyncpa [#allocation5 + $0x1], 1 }

</bundles_post_ra>
